<compile_context>
chip_gen: v7x
topology: tpu7x:2x2x1
jax: 0.10.0
libtpu: 0.0.40
codegen_flags: <defaults>
</compile_context>

<pallas_src>
import math
from functools import partial

import numpy as np
import jax
import jax.numpy as jnp
from jax.experimental import pallas as pl
from jax.experimental.pallas import tpu as pltpu


# ----------------------------------------------------------------------------
# Fused kernel factory
# ----------------------------------------------------------------------------
def _make_fused_head_kernel(*, Cin, H, W, hidden_features, hidden_kernels,
                            Ch, Cobj, Cbox, Cpad, anchors, activation,
                            eps, min_val, max_val, half_max, Mext):
    HW = H * W
    L = len(hidden_features)
    n_inter = min(L - 1, 2)          # ping-pong buffers for inter-layer feats

    def kernel(*refs):
        idx = 0
        x_ref = refs[idx]; idx += 1          # (1, Cin, HW)  one batch element
        cm_ref = refs[idx]; idx += 1         # (2*half_max+1, HW) column masks
        subnet_wb = []
        for _s in range(2):                  # obj subnet, then box subnet
            layers = []
            for _l in range(L):
                layers.append((refs[idx], refs[idx + 1]))   # (w_flat, shift)
                idx += 2
            subnet_wb.append(layers)
        wh_ref = refs[idx]; idx += 1         # (Cpad, 2*Ch)  fused 1x1 heads
        bh_ref = refs[idx]; idx += 1         # (Cpad, 1)
        o_ref = refs[idx]; idx += 1          # (1, Cpad, HW)
        xbuf = refs[idx]; idx += 1           # (Cin, HW + 2*Mext)   zero-extended input
        im2col = refs[idx]; idx += 1         # (Kmax, HW)
        featcat = refs[idx]; idx += 1        # (2*Ch, HW)  [obj_feat; box_feat]
        interbufs = refs[idx:idx + n_inter]  # (Cinter, HW + 2*Mext) each

        # ---- stage the zero-extended flat input once per grid step ----------
        xbuf[...] = jnp.zeros_like(xbuf)
        xbuf[0:Cin, Mext:Mext + HW] = x_ref[0].astype(jnp.float32)

        # ---- the two conv subnets; all intermediates stay in VMEM -----------
        for s in range(2):
            cur_ref, cur_c = xbuf, Cin
            for l in range(L):
                k = hidden_kernels[l]
                half = k // 2
                cout = hidden_features[l]
                # im2col: K = k*k*cur_c rows, one statically shifted window
                # of the zero-extended flat buffer per conv tap.
                tap = 0
                for dy in range(-half, half + 1):
                    for dx in range(-half, half + 1):
                        sft = dy * W + dx
                        win = cur_ref[0:cur_c, Mext + sft:Mext + sft + HW]
                        if dx != 0:      # mask positions whose column wraps
                            j = half_max + dx
                            win = win * cm_ref[j:j + 1, :]
                        im2col[tap * cur_c:(tap + 1) * cur_c, :] = win
                        tap += 1
                kdim = k * k * cur_c
                w_ref, sh_ref = subnet_wb[s][l]
                # single MXU matmul per conv layer (BN scale folded into w)
                y = jnp.dot(w_ref[...].astype(jnp.float32),
                            im2col[0:kdim, :],
                            preferred_element_type=jnp.float32)
                y = y + sh_ref[...]                 # folded BN shift (+ bias)
                y = jnp.maximum(y, 0.0)             # ReLU
                if activation == "relu6":
                    y = jnp.minimum(y, 6.0)
                if l == L - 1:
                    featcat[s * Ch:(s + 1) * Ch, :] = y
                else:
                    nbuf = interbufs[l % n_inter]
                    nbuf[...] = jnp.zeros_like(nbuf)
                    nbuf[0:cout, Mext:Mext + HW] = y
                    cur_ref, cur_c = nbuf, cout

        # ---- fused 1x1 heads + NormTanh / max(., eps) epilogue --------------
        raw = jnp.dot(wh_ref[...].astype(jnp.float32), featcat[...],
                      preferred_element_type=jnp.float32) + bh_ref[...]
        n = anchors
        # NormTanh(min_val=-1, max_val=2) exactly as in the PyTorch module:
        # (tanh(x) + min_val + 1) * max_val / (min_val + 2)
        coord = (jnp.tanh(raw) + min_val + 1.0) * (max_val / (min_val + 2.0))
        size = jnp.maximum(raw, eps)
        row = jax.lax.broadcasted_iota(jnp.int32, raw.shape, 0)
        out = jnp.where(row < Cobj, raw,
                        jnp.where(row < Cobj + 2 * n, coord, size))
        out = jnp.where(row < Cobj + Cbox, out, 0.0)   # zero the pad rows
        # single lane-dense store of the whole (Cpad, HW) slab
        o_ref[0, :, :] = out.astype(o_ref.dtype)

    return kernel


def _build_colmask(W, HW, half_max):
    """(2*half_max+1, HW) masks: row j valid where column x + (j-half_max) is in-range."""
    xcol = np.arange(HW, dtype=np.int64) % W
    rows = []
    for dx in range(-half_max, half_max + 1):
        rows.append(((xcol + dx >= 0) & (xcol + dx < W)).astype(np.float32))
    return jnp.asarray(np.stack(rows, axis=0))


# ----------------------------------------------------------------------------
# Forward pass (matches YoloHeadSplit.forward, NCHW in / NCHW out)
# ----------------------------------------------------------------------------
@partial(jax.jit, static_argnames=("anchors", "clsnums", "hidden_features",
                                   "hidden_kernels", "activation", "eps",
                                   "min_val", "max_val"))
def yolo_head_split_forward(x_nchw, params, *, anchors=1, clsnums=(),
                            hidden_features=(32, 32), hidden_kernels=(3, 3),
                            activation="relu", eps=1e-5,
                            min_val=-1.0, max_val=2.0):
    B, Cin, H, W = x_nchw.shape
    HW = H * W
    L = len(hidden_features)
    half_max = max(k // 2 for k in hidden_kernels)
    Mext = half_max * (W + 1)              # zero extension covers max |dy*W+dx|
    Ch = hidden_features[-1]
    Cobj = anchors * (1 + sum(clsnums))
    Cbox = 4 * anchors
    Cpad = ((Cobj + Cbox + 7) // 8) * 8    # pad output channels to sublane tile

    x_flat = x_nchw.reshape(B, Cin, HW).astype(jnp.float32)   # NCHW, flat spatial
    colmask = _build_colmask(W, HW, half_max)

    # flatten inputs / specs in the kernel's fixed order
    flat_inputs = [x_flat, colmask]
    in_specs = [
        pl.BlockSpec((1, Cin, HW), lambda b: (b, 0, 0)),
        pl.BlockSpec(colmask.shape, lambda b: (0, 0)),
    ]
    for s in range(2):
        for (w, shift) in params["subnets"][s]:
            flat_inputs += [w, shift]
            in_specs += [pl.BlockSpec(w.shape, lambda b: (0, 0)),
                         pl.BlockSpec(shift.shape, lambda b: (0, 0))]
    flat_inputs += [params["w_head"], params["b_head"]]
    in_specs += [pl.BlockSpec(params["w_head"].shape, lambda b: (0, 0)),
                 pl.BlockSpec(params["b_head"].shape, lambda b: (0, 0))]

    cin_seq = (Cin,) + tuple(hidden_features[:-1])
    Kmax = max(k * k * c for k, c in zip(hidden_kernels, cin_seq))
    n_inter = min(L - 1, 2)
    scratch_shapes = [
        pltpu.VMEM((Cin, HW + 2 * Mext), jnp.float32),    # zero-extended input
        pltpu.VMEM((Kmax, HW), jnp.float32),              # im2col buffer
        pltpu.VMEM((2 * Ch, HW), jnp.float32),            # [obj_feat; box_feat]
    ]
    if n_inter > 0:
        c_inter = max(hidden_features[:-1])
        scratch_shapes += [pltpu.VMEM((c_inter, HW + 2 * Mext), jnp.float32)
                           for _ in range(n_inter)]

    kernel = _make_fused_head_kernel(
        Cin=Cin, H=H, W=W, hidden_features=tuple(hidden_features),
        hidden_kernels=tuple(hidden_kernels), Ch=Ch, Cobj=Cobj, Cbox=Cbox,
        Cpad=Cpad, anchors=anchors, activation=activation, eps=float(eps),
        min_val=float(min_val), max_val=float(max_val),
        half_max=half_max, Mext=Mext)

    out_flat = pl.pallas_call(
        kernel,
        out_shape=jax.ShapeDtypeStruct((B, Cpad, HW), jnp.float32),
        grid_spec=pltpu.PrefetchScalarGridSpec(
            num_scalar_prefetch=0,
            grid=(B,),
            in_specs=in_specs,
            out_specs=pl.BlockSpec((1, Cpad, HW), lambda b: (b, 0, 0)),
            scratch_shapes=scratch_shapes),
        compiler_params=pltpu.CompilerParams(
            dimension_semantics=("parallel",),
            vmem_limit_bytes=32 * 1024 * 1024),
    )(*flat_inputs)

    # (B, Cpad, H*W) -> (B, Cobj + 4*anchors, H, W): free reshape + tiny slice
    return out_flat.reshape(B, Cpad, H, W)[:, :Cobj + Cbox]


# ----------------------------------------------------------------------------
# Parameter init (deterministic, mirrors the PyTorch __init__; BN folded, eval)
# ----------------------------------------------------------------------------
def _kaiming_uniform(key, shape, fan_in):
    # kaiming_uniform_(mode='fan_in', nonlinearity='relu'): bound = sqrt(6/fan_in)
    bound = math.sqrt(6.0 / fan_in)
    return jax.random.uniform(key, shape, jnp.float32, -bound, bound)


def init_yolo_head_params(key, in_features, hidden_features, hidden_kernels,
                          anchors=1, clsnums=(), bn_eps=1e-5,
                          weight_dtype=jnp.bfloat16):
    Ch = hidden_features[-1]
    Cobj = anchors * (1 + sum(clsnums))
    Cbox = 4 * anchors
    Cpad = ((Cobj + Cbox + 7) // 8) * 8

    def make_subnet(key):
        layers = []
        cin = in_features
        for cout, k in zip(hidden_features, hidden_kernels):
            key, kw = jax.random.split(key)
            # PyTorch Conv2d weight layout (Cout, Cin, kH, kW), fan_in = Cin*k*k
            w = _kaiming_uniform(kw, (cout, cin, k, k), fan_in=cin * k * k)
            conv_bias = jnp.zeros((cout,), jnp.float32)
            # BatchNorm2d eval: gamma=1, beta=0, running_mean=0, running_var=1
            gamma = jnp.ones((cout,), jnp.float32)
            beta = jnp.zeros((cout,), jnp.float32)
            r_mean = jnp.zeros((cout,), jnp.float32)
            r_var = jnp.ones((cout,), jnp.float32)
            scale = gamma / jnp.sqrt(r_var + bn_eps)
            shift = beta + (conv_bias - r_mean) * scale
            # fold BN scale into weights; flatten to (Cout, k*k*Cin) in
            # (kh, kw, cin) tap order to match the kernel's im2col layout
            w = w * scale[:, None, None, None]
            w_flat = jnp.transpose(w, (0, 2, 3, 1)).reshape(cout, k * k * cin)
            layers.append((w_flat.astype(weight_dtype),
                           shift.reshape(cout, 1).astype(jnp.float32)))
            cin = cout
        return layers, key

    obj_layers, key = make_subnet(key)
    box_layers, key = make_subnet(key)

    key, ko, kb = jax.random.split(key, 3)
    w_obj = _kaiming_uniform(ko, (Cobj, Ch), fan_in=Ch)   # 1x1 conv, fan_in = Ch
    w_box = _kaiming_uniform(kb, (Cbox, Ch), fan_in=Ch)
    # block-diagonal fused head over [obj_feat; box_feat], padded to Cpad rows
    w_head = jnp.zeros((Cpad, 2 * Ch), jnp.float32)
    w_head = w_head.at[0:Cobj, 0:Ch].set(w_obj)
    w_head = w_head.at[Cobj:Cobj + Cbox, Ch:2 * Ch].set(w_box)
    b_head = jnp.zeros((Cpad, 1), jnp.float32)            # both head biases = 0

    return {"subnets": [obj_layers, box_layers],
            "w_head": w_head.astype(weight_dtype),
            "b_head": b_head}


if __name__ == "__main__":
    key = jax.random.PRNGKey(0)

    # Small shapes consistent with the module's forward
    B, Cin, H, W = 2, 4, 16, 16
    anchors = 1
    clsnums = ()
    hidden_features = (32, 32)
    hidden_kernels = (3, 3)

    key, kp, kx = jax.random.split(key, 3)
    params = init_yolo_head_params(kp, Cin, hidden_features, hidden_kernels,
                                   anchors=anchors, clsnums=clsnums)
    x = jax.random.normal(kx, (B, Cin, H, W), jnp.float32)

    out = yolo_head_split_forward(
        x, params, anchors=anchors, clsnums=clsnums,
        hidden_features=hidden_features, hidden_kernels=hidden_kernels,
        activation="relu", eps=1e-5)
    out = jax.block_until_ready(out)

    expected_channels = anchors * (1 + sum(clsnums)) + 4 * anchors  # = 5
    assert out.shape == (B, expected_channels, H, W), out.shape
    assert bool(jnp.all(jnp.isfinite(out)))
    # size channels (last 2*anchors of the box part) must be >= eps
    assert bool(jnp.all(out[:, -2 * anchors:, :, :] >= 1e-5))

    print("KERNEL_OK")
</pallas_src>

<mosaic_0001>
module attributes {stable_mosaic.version = 11 : i64} {
  func.func @kernel(%arg0: i32, %arg1: memref<1x4x256xf32, #tpu.memory_space<vmem>>, %arg2: memref<3x256xf32, #tpu.memory_space<vmem>>, %arg3: memref<32x36xbf16, #tpu.memory_space<vmem>>, %arg4: memref<32x1xf32, #tpu.memory_space<vmem>>, %arg5: memref<32x288xbf16, #tpu.memory_space<vmem>>, %arg6: memref<32x1xf32, #tpu.memory_space<vmem>>, %arg7: memref<32x36xbf16, #tpu.memory_space<vmem>>, %arg8: memref<32x1xf32, #tpu.memory_space<vmem>>, %arg9: memref<32x288xbf16, #tpu.memory_space<vmem>>, %arg10: memref<32x1xf32, #tpu.memory_space<vmem>>, %arg11: memref<8x64xbf16, #tpu.memory_space<vmem>>, %arg12: memref<8x1xf32, #tpu.memory_space<vmem>>, %arg13: memref<1x8x256xf32, #tpu.memory_space<vmem>>, %arg14: memref<4x290xf32, #tpu.memory_space<vmem>>, %arg15: memref<288x256xf32, #tpu.memory_space<vmem>>, %arg16: memref<64x256xf32, #tpu.memory_space<vmem>>, %arg17: memref<32x290xf32, #tpu.memory_space<vmem>>) attributes {dimension_semantics = [#tpu.dimension_semantics<parallel>], iteration_bounds = array<i64: 2>, scalar_prefetch = 0 : i64, scratch_operands = 4 : i64, tpu.core_type = #tpu.core_type<tc>, window_params = [{transform_indices = @transform_0, window_bounds = array<i64: 1, 4, 256>}, {pipeline_mode = #tpu.pipeline_mode<synchronous>, transform_indices = @transform_1, window_bounds = array<i64: 3, 256>}, {pipeline_mode = #tpu.pipeline_mode<synchronous>, transform_indices = @transform_2, window_bounds = array<i64: 32, 36>}, {pipeline_mode = #tpu.pipeline_mode<synchronous>, transform_indices = @transform_3, window_bounds = array<i64: 32, 1>}, {pipeline_mode = #tpu.pipeline_mode<synchronous>, transform_indices = @transform_4, window_bounds = array<i64: 32, 288>}, {pipeline_mode = #tpu.pipeline_mode<synchronous>, transform_indices = @transform_5, window_bounds = array<i64: 32, 1>}, {pipeline_mode = #tpu.pipeline_mode<synchronous>, transform_indices = @transform_6, window_bounds = array<i64: 32, 36>}, {pipeline_mode = #tpu.pipeline_mode<synchronous>, transform_indices = @transform_7, window_bounds = array<i64: 32, 1>}, {pipeline_mode = #tpu.pipeline_mode<synchronous>, transform_indices = @transform_8, window_bounds = array<i64: 32, 288>}, {pipeline_mode = #tpu.pipeline_mode<synchronous>, transform_indices = @transform_9, window_bounds = array<i64: 32, 1>}, {pipeline_mode = #tpu.pipeline_mode<synchronous>, transform_indices = @transform_10, window_bounds = array<i64: 8, 64>}, {pipeline_mode = #tpu.pipeline_mode<synchronous>, transform_indices = @transform_11, window_bounds = array<i64: 8, 1>}, {transform_indices = @transform_12, window_bounds = array<i64: 1, 8, 256>}]} {
    %cst = arith.constant 0.000000e+00 : f32
    %0 = vector.broadcast %cst : f32 to vector<4x290xf32>
    %c0 = arith.constant 0 : index
    %c0_0 = arith.constant 0 : index
    %1 = vector.load %arg14[%c0, %c0_0] : memref<4x290xf32, #tpu.memory_space<vmem>>, vector<4x290xf32>
    tpu.vector_store %arg14[%c0, %c0_0], %0 {strides = array<i32>} : memref<4x290xf32, #tpu.memory_space<vmem>>, vector<4x290xf32>,
    %c0_1 = arith.constant 0 : index
    %c0_2 = arith.constant 0 : index
    %c0_3 = arith.constant 0 : index
    %2 = vector.load %arg1[%c0_1, %c0_2, %c0_3] : memref<1x4x256xf32, #tpu.memory_space<vmem>>, vector<1x4x256xf32>
    %3 = vector.shape_cast %2 : vector<1x4x256xf32> to vector<4x256xf32>
    %c0_4 = arith.constant 0 : index
    %c17 = arith.constant 17 : index
    %4 = vector.load %arg14[%c0_4, %c17] : memref<4x290xf32, #tpu.memory_space<vmem>>, vector<4x256xf32>
    tpu.vector_store %arg14[%c0_4, %c17], %3 {strides = array<i32>} : memref<4x290xf32, #tpu.memory_space<vmem>>, vector<4x256xf32>,
    %c0_5 = arith.constant 0 : index
    %c0_6 = arith.constant 0 : index
    %5 = vector.load %arg14[%c0_5, %c0_6] : memref<4x290xf32, #tpu.memory_space<vmem>>, vector<4x256xf32>
    %c0_7 = arith.constant 0 : index
    %c0_8 = arith.constant 0 : index
    %6 = vector.load %arg2[%c0_7, %c0_8] : memref<3x256xf32, #tpu.memory_space<vmem>>, vector<1x256xf32>
    %7 = vector.broadcast %6 : vector<1x256xf32> to vector<4x256xf32>
    %8 = arith.mulf %5, %7 : vector<4x256xf32>
    %c0_9 = arith.constant 0 : index
    %c0_10 = arith.constant 0 : index
    %9 = vector.load %arg15[%c0_9, %c0_10] : memref<288x256xf32, #tpu.memory_space<vmem>>, vector<4x256xf32>
    tpu.vector_store %arg15[%c0_9, %c0_10], %8 {strides = array<i32>} : memref<288x256xf32, #tpu.memory_space<vmem>>, vector<4x256xf32>,
    %c0_11 = arith.constant 0 : index
    %c1 = arith.constant 1 : index
    %10 = vector.load %arg14[%c0_11, %c1] : memref<4x290xf32, #tpu.memory_space<vmem>>, vector<4x256xf32>
    %c4 = arith.constant 4 : index
    %c0_12 = arith.constant 0 : index
    %11 = vector.load %arg15[%c4, %c0_12] : memref<288x256xf32, #tpu.memory_space<vmem>>, vector<4x256xf32>
    tpu.vector_store %arg15[%c4, %c0_12], %10 {strides = array<i32>} : memref<288x256xf32, #tpu.memory_space<vmem>>, vector<4x256xf32>,
    %c0_13 = arith.constant 0 : index
    %c2 = arith.constant 2 : index
    %12 = vector.load %arg14[%c0_13, %c2] : memref<4x290xf32, #tpu.memory_space<vmem>>, vector<4x256xf32>
    %c2_14 = arith.constant 2 : index
    %c0_15 = arith.constant 0 : index
    %13 = vector.load %arg2[%c2_14, %c0_15] : memref<3x256xf32, #tpu.memory_space<vmem>>, vector<1x256xf32>
    %14 = vector.broadcast %13 : vector<1x256xf32> to vector<4x256xf32>
    %15 = arith.mulf %12, %14 : vector<4x256xf32>
    %c8 = arith.constant 8 : index
    %c0_16 = arith.constant 0 : index
    %16 = vector.load %arg15[%c8, %c0_16] : memref<288x256xf32, #tpu.memory_space<vmem>>, vector<4x256xf32>
    tpu.vector_store %arg15[%c8, %c0_16], %15 {strides = array<i32>} : memref<288x256xf32, #tpu.memory_space<vmem>>, vector<4x256xf32>,
    %c0_17 = arith.constant 0 : index
    %c16 = arith.constant 16 : index
    %17 = vector.load %arg14[%c0_17, %c16] : memref<4x290xf32, #tpu.memory_space<vmem>>, vector<4x256xf32>
    %c0_18 = arith.constant 0 : index
    %c0_19 = arith.constant 0 : index
    %18 = vector.load %arg2[%c0_18, %c0_19] : memref<3x256xf32, #tpu.memory_space<vmem>>, vector<1x256xf32>
    %19 = vector.broadcast %18 : vector<1x256xf32> to vector<4x256xf32>
    %20 = arith.mulf %17, %19 : vector<4x256xf32>
    %c12 = arith.constant 12 : index
    %c0_20 = arith.constant 0 : index
    %21 = vector.load %arg15[%c12, %c0_20] : memref<288x256xf32, #tpu.memory_space<vmem>>, vector<4x256xf32>
    tpu.vector_store %arg15[%c12, %c0_20], %20 {strides = array<i32>} : memref<288x256xf32, #tpu.memory_space<vmem>>, vector<4x256xf32>,
    %c0_21 = arith.constant 0 : index
    %c17_22 = arith.constant 17 : index
    %22 = vector.load %arg14[%c0_21, %c17_22] : memref<4x290xf32, #tpu.memory_space<vmem>>, vector<4x256xf32>
    %c16_23 = arith.constant 16 : index
    %c0_24 = arith.constant 0 : index
    %23 = vector.load %arg15[%c16_23, %c0_24] : memref<288x256xf32, #tpu.memory_space<vmem>>, vector<4x256xf32>
    tpu.vector_store %arg15[%c16_23, %c0_24], %22 {strides = array<i32>} : memref<288x256xf32, #tpu.memory_space<vmem>>, vector<4x256xf32>,
    %c0_25 = arith.constant 0 : index
    %c18 = arith.constant 18 : index
    %24 = vector.load %arg14[%c0_25, %c18] : memref<4x290xf32, #tpu.memory_space<vmem>>, vector<4x256xf32>
    %c2_26 = arith.constant 2 : index
    %c0_27 = arith.constant 0 : index
    %25 = vector.load %arg2[%c2_26, %c0_27] : memref<3x256xf32, #tpu.memory_space<vmem>>, vector<1x256xf32>
    %26 = vector.broadcast %25 : vector<1x256xf32> to vector<4x256xf32>
    %27 = arith.mulf %24, %26 : vector<4x256xf32>
    %c20 = arith.constant 20 : index
    %c0_28 = arith.constant 0 : index
    %28 = vector.load %arg15[%c20, %c0_28] : memref<288x256xf32, #tpu.memory_space<vmem>>, vector<4x256xf32>
    tpu.vector_store %arg15[%c20, %c0_28], %27 {strides = array<i32>} : memref<288x256xf32, #tpu.memory_space<vmem>>, vector<4x256xf32>,
    %c0_29 = arith.constant 0 : index
    %c32 = arith.constant 32 : index
    %29 = vector.load %arg14[%c0_29, %c32] : memref<4x290xf32, #tpu.memory_space<vmem>>, vector<4x256xf32>
    %c0_30 = arith.constant 0 : index
    %c0_31 = arith.constant 0 : index
    %30 = vector.load %arg2[%c0_30, %c0_31] : memref<3x256xf32, #tpu.memory_space<vmem>>, vector<1x256xf32>
    %31 = vector.broadcast %30 : vector<1x256xf32> to vector<4x256xf32>
    %32 = arith.mulf %29, %31 : vector<4x256xf32>
    %c24 = arith.constant 24 : index
    %c0_32 = arith.constant 0 : index
    %33 = vector.load %arg15[%c24, %c0_32] : memref<288x256xf32, #tpu.memory_space<vmem>>, vector<4x256xf32>
    tpu.vector_store %arg15[%c24, %c0_32], %32 {strides = array<i32>} : memref<288x256xf32, #tpu.memory_space<vmem>>, vector<4x256xf32>,
    %c0_33 = arith.constant 0 : index
    %c33 = arith.constant 33 : index
    %34 = vector.load %arg14[%c0_33, %c33] : memref<4x290xf32, #tpu.memory_space<vmem>>, vector<4x256xf32>
    %c28 = arith.constant 28 : index
    %c0_34 = arith.constant 0 : index
    %35 = vector.load %arg15[%c28, %c0_34] : memref<288x256xf32, #tpu.memory_space<vmem>>, vector<4x256xf32>
    tpu.vector_store %arg15[%c28, %c0_34], %34 {strides = array<i32>} : memref<288x256xf32, #tpu.memory_space<vmem>>, vector<4x256xf32>,
    %c0_35 = arith.constant 0 : index
    %c34 = arith.constant 34 : index
    %36 = vector.load %arg14[%c0_35, %c34] : memref<4x290xf32, #tpu.memory_space<vmem>>, vector<4x256xf32>
    %c2_36 = arith.constant 2 : index
    %c0_37 = arith.constant 0 : index
    %37 = vector.load %arg2[%c2_36, %c0_37] : memref<3x256xf32, #tpu.memory_space<vmem>>, vector<1x256xf32>
    %38 = vector.broadcast %37 : vector<1x256xf32> to vector<4x256xf32>
    %39 = arith.mulf %36, %38 : vector<4x256xf32>
    %c32_38 = arith.constant 32 : index
    %c0_39 = arith.constant 0 : index
    %40 = vector.load %arg15[%c32_38, %c0_39] : memref<288x256xf32, #tpu.memory_space<vmem>>, vector<4x256xf32>
    tpu.vector_store %arg15[%c32_38, %c0_39], %39 {strides = array<i32>} : memref<288x256xf32, #tpu.memory_space<vmem>>, vector<4x256xf32>,
    %c0_40 = arith.constant 0 : index
    %c0_41 = arith.constant 0 : index
    %41 = vector.load %arg3[%c0_40, %c0_41] : memref<32x36xbf16, #tpu.memory_space<vmem>>, vector<32x36xbf16>
    %42 = arith.extf %41 : vector<32x36xbf16> to vector<32x36xf32>
    %c0_42 = arith.constant 0 : index
    %c0_43 = arith.constant 0 : index
    %43 = vector.load %arg15[%c0_42, %c0_43] : memref<288x256xf32, #tpu.memory_space<vmem>>, vector<36x256xf32>
    %cst_44 = arith.constant dense<0.000000e+00> : vector<32x256xf32>
    %44 = tpu.matmul %42, %43, %cst_44 {dimension_numbers = #tpu.dot_dimension_numbers<[1], [0], [0], [1], [0, 0, 1, 1], [], []>} : vector<32x36xf32>, vector<36x256xf32>, vector<32x256xf32> -> vector<32x256xf32>
    %c0_45 = arith.constant 0 : index
    %c0_46 = arith.constant 0 : index
    %45 = vector.load %arg4[%c0_45, %c0_46] : memref<32x1xf32, #tpu.memory_space<vmem>>, vector<32x1xf32>
    %46 = vector.broadcast %45 : vector<32x1xf32> to vector<32x256xf32>
    %47 = arith.addf %44, %46 : vector<32x256xf32>
    %cst_47 = arith.constant 0.000000e+00 : f32
    %48 = vector.broadcast %cst_47 : f32 to vector<32x256xf32>
    %49 = arith.maximumf %47, %48 : vector<32x256xf32>
    %cst_48 = arith.constant 0.000000e+00 : f32
    %50 = vector.broadcast %cst_48 : f32 to vector<32x290xf32>
    %c0_49 = arith.constant 0 : index
    %c0_50 = arith.constant 0 : index
    %51 = vector.load %arg17[%c0_49, %c0_50] : memref<32x290xf32, #tpu.memory_space<vmem>>, vector<32x290xf32>
    tpu.vector_store %arg17[%c0_49, %c0_50], %50 {strides = array<i32>} : memref<32x290xf32, #tpu.memory_space<vmem>>, vector<32x290xf32>,
    %c0_51 = arith.constant 0 : index
    %c17_52 = arith.constant 17 : index
    %52 = vector.load %arg17[%c0_51, %c17_52] : memref<32x290xf32, #tpu.memory_space<vmem>>, vector<32x256xf32>
    tpu.vector_store %arg17[%c0_51, %c17_52], %49 {strides = array<i32>} : memref<32x290xf32, #tpu.memory_space<vmem>>, vector<32x256xf32>,
    %c0_53 = arith.constant 0 : index
    %c0_54 = arith.constant 0 : index
    %53 = vector.load %arg17[%c0_53, %c0_54] : memref<32x290xf32, #tpu.memory_space<vmem>>, vector<32x256xf32>
    %c0_55 = arith.constant 0 : index
    %c0_56 = arith.constant 0 : index
    %54 = vector.load %arg2[%c0_55, %c0_56] : memref<3x256xf32, #tpu.memory_space<vmem>>, vector<1x256xf32>
    %55 = vector.broadcast %54 : vector<1x256xf32> to vector<32x256xf32>
    %56 = arith.mulf %53, %55 : vector<32x256xf32>
    %c0_57 = arith.constant 0 : index
    %c0_58 = arith.constant 0 : index
    %57 = vector.load %arg15[%c0_57, %c0_58] : memref<288x256xf32, #tpu.memory_space<vmem>>, vector<32x256xf32>
    tpu.vector_store %arg15[%c0_57, %c0_58], %56 {strides = array<i32>} : memref<288x256xf32, #tpu.memory_space<vmem>>, vector<32x256xf32>,
    %c0_59 = arith.constant 0 : index
    %c1_60 = arith.constant 1 : index
    %58 = vector.load %arg17[%c0_59, %c1_60] : memref<32x290xf32, #tpu.memory_space<vmem>>, vector<32x256xf32>
    %c32_61 = arith.constant 32 : index
    %c0_62 = arith.constant 0 : index
    %59 = vector.load %arg15[%c32_61, %c0_62] : memref<288x256xf32, #tpu.memory_space<vmem>>, vector<32x256xf32>
    tpu.vector_store %arg15[%c32_61, %c0_62], %58 {strides = array<i32>} : memref<288x256xf32, #tpu.memory_space<vmem>>, vector<32x256xf32>,
    %c0_63 = arith.constant 0 : index
    %c2_64 = arith.constant 2 : index
    %60 = vector.load %arg17[%c0_63, %c2_64] : memref<32x290xf32, #tpu.memory_space<vmem>>, vector<32x256xf32>
    %c2_65 = arith.constant 2 : index
    %c0_66 = arith.constant 0 : index
    %61 = vector.load %arg2[%c2_65, %c0_66] : memref<3x256xf32, #tpu.memory_space<vmem>>, vector<1x256xf32>
    %62 = vector.broadcast %61 : vector<1x256xf32> to vector<32x256xf32>
    %63 = arith.mulf %60, %62 : vector<32x256xf32>
    %c64 = arith.constant 64 : index
    %c0_67 = arith.constant 0 : index
    %64 = vector.load %arg15[%c64, %c0_67] : memref<288x256xf32, #tpu.memory_space<vmem>>, vector<32x256xf32>
    tpu.vector_store %arg15[%c64, %c0_67], %63 {strides = array<i32>} : memref<288x256xf32, #tpu.memory_space<vmem>>, vector<32x256xf32>,
    %c0_68 = arith.constant 0 : index
    %c16_69 = arith.constant 16 : index
    %65 = vector.load %arg17[%c0_68, %c16_69] : memref<32x290xf32, #tpu.memory_space<vmem>>, vector<32x256xf32>
    %c0_70 = arith.constant 0 : index
    %c0_71 = arith.constant 0 : index
    %66 = vector.load %arg2[%c0_70, %c0_71] : memref<3x256xf32, #tpu.memory_space<vmem>>, vector<1x256xf32>
    %67 = vector.broadcast %66 : vector<1x256xf32> to vector<32x256xf32>
    %68 = arith.mulf %65, %67 : vector<32x256xf32>
    %c96 = arith.constant 96 : index
    %c0_72 = arith.constant 0 : index
    %69 = vector.load %arg15[%c96, %c0_72] : memref<288x256xf32, #tpu.memory_space<vmem>>, vector<32x256xf32>
    tpu.vector_store %arg15[%c96, %c0_72], %68 {strides = array<i32>} : memref<288x256xf32, #tpu.memory_space<vmem>>, vector<32x256xf32>,
    %c0_73 = arith.constant 0 : index
    %c17_74 = arith.constant 17 : index
    %70 = vector.load %arg17[%c0_73, %c17_74] : memref<32x290xf32, #tpu.memory_space<vmem>>, vector<32x256xf32>
    %c128 = arith.constant 128 : index
    %c0_75 = arith.constant 0 : index
    %71 = vector.load %arg15[%c128, %c0_75] : memref<288x256xf32, #tpu.memory_space<vmem>>, vector<32x256xf32>
    tpu.vector_store %arg15[%c128, %c0_75], %70 {strides = array<i32>} : memref<288x256xf32, #tpu.memory_space<vmem>>, vector<32x256xf32>,
    %c0_76 = arith.constant 0 : index
    %c18_77 = arith.constant 18 : index
    %72 = vector.load %arg17[%c0_76, %c18_77] : memref<32x290xf32, #tpu.memory_space<vmem>>, vector<32x256xf32>
    %c2_78 = arith.constant 2 : index
    %c0_79 = arith.constant 0 : index
    %73 = vector.load %arg2[%c2_78, %c0_79] : memref<3x256xf32, #tpu.memory_space<vmem>>, vector<1x256xf32>
    %74 = vector.broadcast %73 : vector<1x256xf32> to vector<32x256xf32>
    %75 = arith.mulf %72, %74 : vector<32x256xf32>
    %c160 = arith.constant 160 : index
    %c0_80 = arith.constant 0 : index
    %76 = vector.load %arg15[%c160, %c0_80] : memref<288x256xf32, #tpu.memory_space<vmem>>, vector<32x256xf32>
    tpu.vector_store %arg15[%c160, %c0_80], %75 {strides = array<i32>} : memref<288x256xf32, #tpu.memory_space<vmem>>, vector<32x256xf32>,
    %c0_81 = arith.constant 0 : index
    %c32_82 = arith.constant 32 : index
    %77 = vector.load %arg17[%c0_81, %c32_82] : memref<32x290xf32, #tpu.memory_space<vmem>>, vector<32x256xf32>
    %c0_83 = arith.constant 0 : index
    %c0_84 = arith.constant 0 : index
    %78 = vector.load %arg2[%c0_83, %c0_84] : memref<3x256xf32, #tpu.memory_space<vmem>>, vector<1x256xf32>
    %79 = vector.broadcast %78 : vector<1x256xf32> to vector<32x256xf32>
    %80 = arith.mulf %77, %79 : vector<32x256xf32>
    %c192 = arith.constant 192 : index
    %c0_85 = arith.constant 0 : index
    %81 = vector.load %arg15[%c192, %c0_85] : memref<288x256xf32, #tpu.memory_space<vmem>>, vector<32x256xf32>
    tpu.vector_store %arg15[%c192, %c0_85], %80 {strides = array<i32>} : memref<288x256xf32, #tpu.memory_space<vmem>>, vector<32x256xf32>,
    %c0_86 = arith.constant 0 : index
    %c33_87 = arith.constant 33 : index
    %82 = vector.load %arg17[%c0_86, %c33_87] : memref<32x290xf32, #tpu.memory_space<vmem>>, vector<32x256xf32>
    %c224 = arith.constant 224 : index
    %c0_88 = arith.constant 0 : index
    %83 = vector.load %arg15[%c224, %c0_88] : memref<288x256xf32, #tpu.memory_space<vmem>>, vector<32x256xf32>
    tpu.vector_store %arg15[%c224, %c0_88], %82 {strides = array<i32>} : memref<288x256xf32, #tpu.memory_space<vmem>>, vector<32x256xf32>,
    %c0_89 = arith.constant 0 : index
    %c34_90 = arith.constant 34 : index
    %84 = vector.load %arg17[%c0_89, %c34_90] : memref<32x290xf32, #tpu.memory_space<vmem>>, vector<32x256xf32>
    %c2_91 = arith.constant 2 : index
    %c0_92 = arith.constant 0 : index
    %85 = vector.load %arg2[%c2_91, %c0_92] : memref<3x256xf32, #tpu.memory_space<vmem>>, vector<1x256xf32>
    %86 = vector.broadcast %85 : vector<1x256xf32> to vector<32x256xf32>
    %87 = arith.mulf %84, %86 : vector<32x256xf32>
    %c256 = arith.constant 256 : index
    %c0_93 = arith.constant 0 : index
    %88 = vector.load %arg15[%c256, %c0_93] : memref<288x256xf32, #tpu.memory_space<vmem>>, vector<32x256xf32>
    tpu.vector_store %arg15[%c256, %c0_93], %87 {strides = array<i32>} : memref<288x256xf32, #tpu.memory_space<vmem>>, vector<32x256xf32>,
    %c0_94 = arith.constant 0 : index
    %c0_95 = arith.constant 0 : index
    %89 = vector.load %arg5[%c0_94, %c0_95] : memref<32x288xbf16, #tpu.memory_space<vmem>>, vector<32x288xbf16>
    %90 = arith.extf %89 : vector<32x288xbf16> to vector<32x288xf32>
    %c0_96 = arith.constant 0 : index
    %c0_97 = arith.constant 0 : index
    %91 = vector.load %arg15[%c0_96, %c0_97] : memref<288x256xf32, #tpu.memory_space<vmem>>, vector<288x256xf32>
    %cst_98 = arith.constant dense<0.000000e+00> : vector<32x256xf32>
    %92 = tpu.matmul %90, %91, %cst_98 {dimension_numbers = #tpu.dot_dimension_numbers<[1], [0], [0], [1], [0, 0, 1, 1], [], []>} : vector<32x288xf32>, vector<288x256xf32>, vector<32x256xf32> -> vector<32x256xf32>
    %c0_99 = arith.constant 0 : index
    %c0_100 = arith.constant 0 : index
    %93 = vector.load %arg6[%c0_99, %c0_100] : memref<32x1xf32, #tpu.memory_space<vmem>>, vector<32x1xf32>
    %94 = vector.broadcast %93 : vector<32x1xf32> to vector<32x256xf32>
    %95 = arith.addf %92, %94 : vector<32x256xf32>
    %cst_101 = arith.constant 0.000000e+00 : f32
    %96 = vector.broadcast %cst_101 : f32 to vector<32x256xf32>
    %97 = arith.maximumf %95, %96 : vector<32x256xf32>
    %c0_102 = arith.constant 0 : index
    %c0_103 = arith.constant 0 : index
    %98 = vector.load %arg16[%c0_102, %c0_103] : memref<64x256xf32, #tpu.memory_space<vmem>>, vector<32x256xf32>
    tpu.vector_store %arg16[%c0_102, %c0_103], %97 {strides = array<i32>} : memref<64x256xf32, #tpu.memory_space<vmem>>, vector<32x256xf32>,
    %c0_104 = arith.constant 0 : index
    %c0_105 = arith.constant 0 : index
    %99 = vector.load %arg14[%c0_104, %c0_105] : memref<4x290xf32, #tpu.memory_space<vmem>>, vector<4x256xf32>
    %c0_106 = arith.constant 0 : index
    %c0_107 = arith.constant 0 : index
    %100 = vector.load %arg2[%c0_106, %c0_107] : memref<3x256xf32, #tpu.memory_space<vmem>>, vector<1x256xf32>
    %101 = vector.broadcast %100 : vector<1x256xf32> to vector<4x256xf32>
    %102 = arith.mulf %99, %101 : vector<4x256xf32>
    %c0_108 = arith.constant 0 : index
    %c0_109 = arith.constant 0 : index
    %103 = vector.load %arg15[%c0_108, %c0_109] : memref<288x256xf32, #tpu.memory_space<vmem>>, vector<4x256xf32>
    tpu.vector_store %arg15[%c0_108, %c0_109], %102 {strides = array<i32>} : memref<288x256xf32, #tpu.memory_space<vmem>>, vector<4x256xf32>,
    %c0_110 = arith.constant 0 : index
    %c1_111 = arith.constant 1 : index
    %104 = vector.load %arg14[%c0_110, %c1_111] : memref<4x290xf32, #tpu.memory_space<vmem>>, vector<4x256xf32>
    %c4_112 = arith.constant 4 : index
    %c0_113 = arith.constant 0 : index
    %105 = vector.load %arg15[%c4_112, %c0_113] : memref<288x256xf32, #tpu.memory_space<vmem>>, vector<4x256xf32>
    tpu.vector_store %arg15[%c4_112, %c0_113], %104 {strides = array<i32>} : memref<288x256xf32, #tpu.memory_space<vmem>>, vector<4x256xf32>,
    %c0_114 = arith.constant 0 : index
    %c2_115 = arith.constant 2 : index
    %106 = vector.load %arg14[%c0_114, %c2_115] : memref<4x290xf32, #tpu.memory_space<vmem>>, vector<4x256xf32>
    %c2_116 = arith.constant 2 : index
    %c0_117 = arith.constant 0 : index
    %107 = vector.load %arg2[%c2_116, %c0_117] : memref<3x256xf32, #tpu.memory_space<vmem>>, vector<1x256xf32>
    %108 = vector.broadcast %107 : vector<1x256xf32> to vector<4x256xf32>
    %109 = arith.mulf %106, %108 : vector<4x256xf32>
    %c8_118 = arith.constant 8 : index
    %c0_119 = arith.constant 0 : index
    %110 = vector.load %arg15[%c8_118, %c0_119] : memref<288x256xf32, #tpu.memory_space<vmem>>, vector<4x256xf32>
    tpu.vector_store %arg15[%c8_118, %c0_119], %109 {strides = array<i32>} : memref<288x256xf32, #tpu.memory_space<vmem>>, vector<4x256xf32>,
    %c0_120 = arith.constant 0 : index
    %c16_121 = arith.constant 16 : index
    %111 = vector.load %arg14[%c0_120, %c16_121] : memref<4x290xf32, #tpu.memory_space<vmem>>, vector<4x256xf32>
    %c0_122 = arith.constant 0 : index
    %c0_123 = arith.constant 0 : index
    %112 = vector.load %arg2[%c0_122, %c0_123] : memref<3x256xf32, #tpu.memory_space<vmem>>, vector<1x256xf32>
    %113 = vector.broadcast %112 : vector<1x256xf32> to vector<4x256xf32>
    %114 = arith.mulf %111, %113 : vector<4x256xf32>
    %c12_124 = arith.constant 12 : index
    %c0_125 = arith.constant 0 : index
    %115 = vector.load %arg15[%c12_124, %c0_125] : memref<288x256xf32, #tpu.memory_space<vmem>>, vector<4x256xf32>
    tpu.vector_store %arg15[%c12_124, %c0_125], %114 {strides = array<i32>} : memref<288x256xf32, #tpu.memory_space<vmem>>, vector<4x256xf32>,
    %c0_126 = arith.constant 0 : index
    %c17_127 = arith.constant 17 : index
    %116 = vector.load %arg14[%c0_126, %c17_127] : memref<4x290xf32, #tpu.memory_space<vmem>>, vector<4x256xf32>
    %c16_128 = arith.constant 16 : index
    %c0_129 = arith.constant 0 : index
    %117 = vector.load %arg15[%c16_128, %c0_129] : memref<288x256xf32, #tpu.memory_space<vmem>>, vector<4x256xf32>
    tpu.vector_store %arg15[%c16_128, %c0_129], %116 {strides = array<i32>} : memref<288x256xf32, #tpu.memory_space<vmem>>, vector<4x256xf32>,
    %c0_130 = arith.constant 0 : index
    %c18_131 = arith.constant 18 : index
    %118 = vector.load %arg14[%c0_130, %c18_131] : memref<4x290xf32, #tpu.memory_space<vmem>>, vector<4x256xf32>
    %c2_132 = arith.constant 2 : index
    %c0_133 = arith.constant 0 : index
    %119 = vector.load %arg2[%c2_132, %c0_133] : memref<3x256xf32, #tpu.memory_space<vmem>>, vector<1x256xf32>
    %120 = vector.broadcast %119 : vector<1x256xf32> to vector<4x256xf32>
    %121 = arith.mulf %118, %120 : vector<4x256xf32>
    %c20_134 = arith.constant 20 : index
    %c0_135 = arith.constant 0 : index
    %122 = vector.load %arg15[%c20_134, %c0_135] : memref<288x256xf32, #tpu.memory_space<vmem>>, vector<4x256xf32>
    tpu.vector_store %arg15[%c20_134, %c0_135], %121 {strides = array<i32>} : memref<288x256xf32, #tpu.memory_space<vmem>>, vector<4x256xf32>,
    %c0_136 = arith.constant 0 : index
    %c32_137 = arith.constant 32 : index
    %123 = vector.load %arg14[%c0_136, %c32_137] : memref<4x290xf32, #tpu.memory_space<vmem>>, vector<4x256xf32>
    %c0_138 = arith.constant 0 : index
    %c0_139 = arith.constant 0 : index
    %124 = vector.load %arg2[%c0_138, %c0_139] : memref<3x256xf32, #tpu.memory_space<vmem>>, vector<1x256xf32>
    %125 = vector.broadcast %124 : vector<1x256xf32> to vector<4x256xf32>
    %126 = arith.mulf %123, %125 : vector<4x256xf32>
    %c24_140 = arith.constant 24 : index
    %c0_141 = arith.constant 0 : index
    %127 = vector.load %arg15[%c24_140, %c0_141] : memref<288x256xf32, #tpu.memory_space<vmem>>, vector<4x256xf32>
    tpu.vector_store %arg15[%c24_140, %c0_141], %126 {strides = array<i32>} : memref<288x256xf32, #tpu.memory_space<vmem>>, vector<4x256xf32>,
    %c0_142 = arith.constant 0 : index
    %c33_143 = arith.constant 33 : index
    %128 = vector.load %arg14[%c0_142, %c33_143] : memref<4x290xf32, #tpu.memory_space<vmem>>, vector<4x256xf32>
    %c28_144 = arith.constant 28 : index
    %c0_145 = arith.constant 0 : index
    %129 = vector.load %arg15[%c28_144, %c0_145] : memref<288x256xf32, #tpu.memory_space<vmem>>, vector<4x256xf32>
    tpu.vector_store %arg15[%c28_144, %c0_145], %128 {strides = array<i32>} : memref<288x256xf32, #tpu.memory_space<vmem>>, vector<4x256xf32>,
    %c0_146 = arith.constant 0 : index
    %c34_147 = arith.constant 34 : index
    %130 = vector.load %arg14[%c0_146, %c34_147] : memref<4x290xf32, #tpu.memory_space<vmem>>, vector<4x256xf32>
    %c2_148 = arith.constant 2 : index
    %c0_149 = arith.constant 0 : index
    %131 = vector.load %arg2[%c2_148, %c0_149] : memref<3x256xf32, #tpu.memory_space<vmem>>, vector<1x256xf32>
    %132 = vector.broadcast %131 : vector<1x256xf32> to vector<4x256xf32>
    %133 = arith.mulf %130, %132 : vector<4x256xf32>
    %c32_150 = arith.constant 32 : index
    %c0_151 = arith.constant 0 : index
    %134 = vector.load %arg15[%c32_150, %c0_151] : memref<288x256xf32, #tpu.memory_space<vmem>>, vector<4x256xf32>
    tpu.vector_store %arg15[%c32_150, %c0_151], %133 {strides = array<i32>} : memref<288x256xf32, #tpu.memory_space<vmem>>, vector<4x256xf32>,
    %c0_152 = arith.constant 0 : index
    %c0_153 = arith.constant 0 : index
    %135 = vector.load %arg7[%c0_152, %c0_153] : memref<32x36xbf16, #tpu.memory_space<vmem>>, vector<32x36xbf16>
    %136 = arith.extf %135 : vector<32x36xbf16> to vector<32x36xf32>
    %c0_154 = arith.constant 0 : index
    %c0_155 = arith.constant 0 : index
    %137 = vector.load %arg15[%c0_154, %c0_155] : memref<288x256xf32, #tpu.memory_space<vmem>>, vector<36x256xf32>
    %cst_156 = arith.constant dense<0.000000e+00> : vector<32x256xf32>
    %138 = tpu.matmul %136, %137, %cst_156 {dimension_numbers = #tpu.dot_dimension_numbers<[1], [0], [0], [1], [0, 0, 1, 1], [], []>} : vector<32x36xf32>, vector<36x256xf32>, vector<32x256xf32> -> vector<32x256xf32>
    %c0_157 = arith.constant 0 : index
    %c0_158 = arith.constant 0 : index
    %139 = vector.load %arg8[%c0_157, %c0_158] : memref<32x1xf32, #tpu.memory_space<vmem>>, vector<32x1xf32>
    %140 = vector.broadcast %139 : vector<32x1xf32> to vector<32x256xf32>
    %141 = arith.addf %138, %140 : vector<32x256xf32>
    %cst_159 = arith.constant 0.000000e+00 : f32
    %142 = vector.broadcast %cst_159 : f32 to vector<32x256xf32>
    %143 = arith.maximumf %141, %142 : vector<32x256xf32>
    %cst_160 = arith.constant 0.000000e+00 : f32
    %144 = vector.broadcast %cst_160 : f32 to vector<32x290xf32>
    %c0_161 = arith.constant 0 : index
    %c0_162 = arith.constant 0 : index
    %145 = vector.load %arg17[%c0_161, %c0_162] : memref<32x290xf32, #tpu.memory_space<vmem>>, vector<32x290xf32>
    tpu.vector_store %arg17[%c0_161, %c0_162], %144 {strides = array<i32>} : memref<32x290xf32, #tpu.memory_space<vmem>>, vector<32x290xf32>,
    %c0_163 = arith.constant 0 : index
    %c17_164 = arith.constant 17 : index
    %146 = vector.load %arg17[%c0_163, %c17_164] : memref<32x290xf32, #tpu.memory_space<vmem>>, vector<32x256xf32>
    tpu.vector_store %arg17[%c0_163, %c17_164], %143 {strides = array<i32>} : memref<32x290xf32, #tpu.memory_space<vmem>>, vector<32x256xf32>,
    %c0_165 = arith.constant 0 : index
    %c0_166 = arith.constant 0 : index
    %147 = vector.load %arg17[%c0_165, %c0_166] : memref<32x290xf32, #tpu.memory_space<vmem>>, vector<32x256xf32>
    %c0_167 = arith.constant 0 : index
    %c0_168 = arith.constant 0 : index
    %148 = vector.load %arg2[%c0_167, %c0_168] : memref<3x256xf32, #tpu.memory_space<vmem>>, vector<1x256xf32>
    %149 = vector.broadcast %148 : vector<1x256xf32> to vector<32x256xf32>
    %150 = arith.mulf %147, %149 : vector<32x256xf32>
    %c0_169 = arith.constant 0 : index
    %c0_170 = arith.constant 0 : index
    %151 = vector.load %arg15[%c0_169, %c0_170] : memref<288x256xf32, #tpu.memory_space<vmem>>, vector<32x256xf32>
    tpu.vector_store %arg15[%c0_169, %c0_170], %150 {strides = array<i32>} : memref<288x256xf32, #tpu.memory_space<vmem>>, vector<32x256xf32>,
    %c0_171 = arith.constant 0 : index
    %c1_172 = arith.constant 1 : index
    %152 = vector.load %arg17[%c0_171, %c1_172] : memref<32x290xf32, #tpu.memory_space<vmem>>, vector<32x256xf32>
    %c32_173 = arith.constant 32 : index
    %c0_174 = arith.constant 0 : index
    %153 = vector.load %arg15[%c32_173, %c0_174] : memref<288x256xf32, #tpu.memory_space<vmem>>, vector<32x256xf32>
    tpu.vector_store %arg15[%c32_173, %c0_174], %152 {strides = array<i32>} : memref<288x256xf32, #tpu.memory_space<vmem>>, vector<32x256xf32>,
    %c0_175 = arith.constant 0 : index
    %c2_176 = arith.constant 2 : index
    %154 = vector.load %arg17[%c0_175, %c2_176] : memref<32x290xf32, #tpu.memory_space<vmem>>, vector<32x256xf32>
    %c2_177 = arith.constant 2 : index
    %c0_178 = arith.constant 0 : index
    %155 = vector.load %arg2[%c2_177, %c0_178] : memref<3x256xf32, #tpu.memory_space<vmem>>, vector<1x256xf32>
    %156 = vector.broadcast %155 : vector<1x256xf32> to vector<32x256xf32>
    %157 = arith.mulf %154, %156 : vector<32x256xf32>
    %c64_179 = arith.constant 64 : index
    %c0_180 = arith.constant 0 : index
    %158 = vector.load %arg15[%c64_179, %c0_180] : memref<288x256xf32, #tpu.memory_space<vmem>>, vector<32x256xf32>
    tpu.vector_store %arg15[%c64_179, %c0_180], %157 {strides = array<i32>} : memref<288x256xf32, #tpu.memory_space<vmem>>, vector<32x256xf32>,
    %c0_181 = arith.constant 0 : index
    %c16_182 = arith.constant 16 : index
    %159 = vector.load %arg17[%c0_181, %c16_182] : memref<32x290xf32, #tpu.memory_space<vmem>>, vector<32x256xf32>
    %c0_183 = arith.constant 0 : index
    %c0_184 = arith.constant 0 : index
    %160 = vector.load %arg2[%c0_183, %c0_184] : memref<3x256xf32, #tpu.memory_space<vmem>>, vector<1x256xf32>
    %161 = vector.broadcast %160 : vector<1x256xf32> to vector<32x256xf32>
    %162 = arith.mulf %159, %161 : vector<32x256xf32>
    %c96_185 = arith.constant 96 : index
    %c0_186 = arith.constant 0 : index
    %163 = vector.load %arg15[%c96_185, %c0_186] : memref<288x256xf32, #tpu.memory_space<vmem>>, vector<32x256xf32>
    tpu.vector_store %arg15[%c96_185, %c0_186], %162 {strides = array<i32>} : memref<288x256xf32, #tpu.memory_space<vmem>>, vector<32x256xf32>,
    %c0_187 = arith.constant 0 : index
    %c17_188 = arith.constant 17 : index
    %164 = vector.load %arg17[%c0_187, %c17_188] : memref<32x290xf32, #tpu.memory_space<vmem>>, vector<32x256xf32>
    %c128_189 = arith.constant 128 : index
    %c0_190 = arith.constant 0 : index
    %165 = vector.load %arg15[%c128_189, %c0_190] : memref<288x256xf32, #tpu.memory_space<vmem>>, vector<32x256xf32>
    tpu.vector_store %arg15[%c128_189, %c0_190], %164 {strides = array<i32>} : memref<288x256xf32, #tpu.memory_space<vmem>>, vector<32x256xf32>,
    %c0_191 = arith.constant 0 : index
    %c18_192 = arith.constant 18 : index
    %166 = vector.load %arg17[%c0_191, %c18_192] : memref<32x290xf32, #tpu.memory_space<vmem>>, vector<32x256xf32>
    %c2_193 = arith.constant 2 : index
    %c0_194 = arith.constant 0 : index
    %167 = vector.load %arg2[%c2_193, %c0_194] : memref<3x256xf32, #tpu.memory_space<vmem>>, vector<1x256xf32>
    %168 = vector.broadcast %167 : vector<1x256xf32> to vector<32x256xf32>
    %169 = arith.mulf %166, %168 : vector<32x256xf32>
    %c160_195 = arith.constant 160 : index
    %c0_196 = arith.constant 0 : index
    %170 = vector.load %arg15[%c160_195, %c0_196] : memref<288x256xf32, #tpu.memory_space<vmem>>, vector<32x256xf32>
    tpu.vector_store %arg15[%c160_195, %c0_196], %169 {strides = array<i32>} : memref<288x256xf32, #tpu.memory_space<vmem>>, vector<32x256xf32>,
    %c0_197 = arith.constant 0 : index
    %c32_198 = arith.constant 32 : index
    %171 = vector.load %arg17[%c0_197, %c32_198] : memref<32x290xf32, #tpu.memory_space<vmem>>, vector<32x256xf32>
    %c0_199 = arith.constant 0 : index
    %c0_200 = arith.constant 0 : index
    %172 = vector.load %arg2[%c0_199, %c0_200] : memref<3x256xf32, #tpu.memory_space<vmem>>, vector<1x256xf32>
    %173 = vector.broadcast %172 : vector<1x256xf32> to vector<32x256xf32>
    %174 = arith.mulf %171, %173 : vector<32x256xf32>
    %c192_201 = arith.constant 192 : index
    %c0_202 = arith.constant 0 : index
    %175 = vector.load %arg15[%c192_201, %c0_202] : memref<288x256xf32, #tpu.memory_space<vmem>>, vector<32x256xf32>
    tpu.vector_store %arg15[%c192_201, %c0_202], %174 {strides = array<i32>} : memref<288x256xf32, #tpu.memory_space<vmem>>, vector<32x256xf32>,
    %c0_203 = arith.constant 0 : index
    %c33_204 = arith.constant 33 : index
    %176 = vector.load %arg17[%c0_203, %c33_204] : memref<32x290xf32, #tpu.memory_space<vmem>>, vector<32x256xf32>
    %c224_205 = arith.constant 224 : index
    %c0_206 = arith.constant 0 : index
    %177 = vector.load %arg15[%c224_205, %c0_206] : memref<288x256xf32, #tpu.memory_space<vmem>>, vector<32x256xf32>
    tpu.vector_store %arg15[%c224_205, %c0_206], %176 {strides = array<i32>} : memref<288x256xf32, #tpu.memory_space<vmem>>, vector<32x256xf32>,
    %c0_207 = arith.constant 0 : index
    %c34_208 = arith.constant 34 : index
    %178 = vector.load %arg17[%c0_207, %c34_208] : memref<32x290xf32, #tpu.memory_space<vmem>>, vector<32x256xf32>
    %c2_209 = arith.constant 2 : index
    %c0_210 = arith.constant 0 : index
    %179 = vector.load %arg2[%c2_209, %c0_210] : memref<3x256xf32, #tpu.memory_space<vmem>>, vector<1x256xf32>
    %180 = vector.broadcast %179 : vector<1x256xf32> to vector<32x256xf32>
    %181 = arith.mulf %178, %180 : vector<32x256xf32>
    %c256_211 = arith.constant 256 : index
    %c0_212 = arith.constant 0 : index
    %182 = vector.load %arg15[%c256_211, %c0_212] : memref<288x256xf32, #tpu.memory_space<vmem>>, vector<32x256xf32>
    tpu.vector_store %arg15[%c256_211, %c0_212], %181 {strides = array<i32>} : memref<288x256xf32, #tpu.memory_space<vmem>>, vector<32x256xf32>,
    %c0_213 = arith.constant 0 : index
    %c0_214 = arith.constant 0 : index
    %183 = vector.load %arg9[%c0_213, %c0_214] : memref<32x288xbf16, #tpu.memory_space<vmem>>, vector<32x288xbf16>
    %184 = arith.extf %183 : vector<32x288xbf16> to vector<32x288xf32>
    %c0_215 = arith.constant 0 : index
    %c0_216 = arith.constant 0 : index
    %185 = vector.load %arg15[%c0_215, %c0_216] : memref<288x256xf32, #tpu.memory_space<vmem>>, vector<288x256xf32>
    %cst_217 = arith.constant dense<0.000000e+00> : vector<32x256xf32>
    %186 = tpu.matmul %184, %185, %cst_217 {dimension_numbers = #tpu.dot_dimension_numbers<[1], [0], [0], [1], [0, 0, 1, 1], [], []>} : vector<32x288xf32>, vector<288x256xf32>, vector<32x256xf32> -> vector<32x256xf32>
    %c0_218 = arith.constant 0 : index
    %c0_219 = arith.constant 0 : index
    %187 = vector.load %arg10[%c0_218, %c0_219] : memref<32x1xf32, #tpu.memory_space<vmem>>, vector<32x1xf32>
    %188 = vector.broadcast %187 : vector<32x1xf32> to vector<32x256xf32>
    %189 = arith.addf %186, %188 : vector<32x256xf32>
    %cst_220 = arith.constant 0.000000e+00 : f32
    %190 = vector.broadcast %cst_220 : f32 to vector<32x256xf32>
    %191 = arith.maximumf %189, %190 : vector<32x256xf32>
    %c32_221 = arith.constant 32 : index
    %c0_222 = arith.constant 0 : index
    %192 = vector.load %arg16[%c32_221, %c0_222] : memref<64x256xf32, #tpu.memory_space<vmem>>, vector<32x256xf32>
    tpu.vector_store %arg16[%c32_221, %c0_222], %191 {strides = array<i32>} : memref<64x256xf32, #tpu.memory_space<vmem>>, vector<32x256xf32>,
    %c0_223 = arith.constant 0 : index
    %c0_224 = arith.constant 0 : index
    %193 = vector.load %arg11[%c0_223, %c0_224] : memref<8x64xbf16, #tpu.memory_space<vmem>>, vector<8x64xbf16>
    %194 = arith.extf %193 : vector<8x64xbf16> to vector<8x64xf32>
    %c0_225 = arith.constant 0 : index
    %c0_226 = arith.constant 0 : index
    %195 = vector.load %arg16[%c0_225, %c0_226] : memref<64x256xf32, #tpu.memory_space<vmem>>, vector<64x256xf32>
    %cst_227 = arith.constant dense<0.000000e+00> : vector<8x256xf32>
    %196 = tpu.matmul %194, %195, %cst_227 {dimension_numbers = #tpu.dot_dimension_numbers<[1], [0], [0], [1], [0, 0, 1, 1], [], []>} : vector<8x64xf32>, vector<64x256xf32>, vector<8x256xf32> -> vector<8x256xf32>
    %c0_228 = arith.constant 0 : index
    %c0_229 = arith.constant 0 : index
    %197 = vector.load %arg12[%c0_228, %c0_229] : memref<8x1xf32, #tpu.memory_space<vmem>>, vector<8x1xf32>
    %198 = vector.broadcast %197 : vector<8x1xf32> to vector<8x256xf32>
    %199 = arith.addf %196, %198 : vector<8x256xf32>
    %200 = math.tanh %199 : vector<8x256xf32>
    %cst_230 = arith.constant -1.000000e+00 : f32
    %201 = vector.broadcast %cst_230 : f32 to vector<8x256xf32>
    %202 = arith.addf %200, %201 : vector<8x256xf32>
    %cst_231 = arith.constant 1.000000e+00 : f32
    %203 = vector.broadcast %cst_231 : f32 to vector<8x256xf32>
    %204 = arith.addf %202, %203 : vector<8x256xf32>
    %cst_232 = arith.constant 2.000000e+00 : f32
    %205 = vector.broadcast %cst_232 : f32 to vector<8x256xf32>
    %206 = arith.mulf %204, %205 : vector<8x256xf32>
    %cst_233 = arith.constant 9.99999974E-6 : f32
    %207 = vector.broadcast %cst_233 : f32 to vector<8x256xf32>
    %208 = arith.maximumf %199, %207 : vector<8x256xf32>
    %209 = tpu.iota {dimensions = array<i32: 0>} : vector<8x256xi32>
    %c1_i32 = arith.constant 1 : i32
    %210 = vector.broadcast %c1_i32 : i32 to vector<8x256xi32>
    %211 = arith.cmpi slt, %209, %210 : vector<8x256xi32>
    %c3_i32 = arith.constant 3 : i32
    %212 = vector.broadcast %c3_i32 : i32 to vector<8x256xi32>
    %213 = arith.cmpi slt, %209, %212 : vector<8x256xi32>
    %214 = arith.select %213, %206, %208 : vector<8x256xi1>, vector<8x256xf32>
    %215 = arith.select %211, %199, %214 : vector<8x256xi1>, vector<8x256xf32>
    %c5_i32 = arith.constant 5 : i32
    %216 = vector.broadcast %c5_i32 : i32 to vector<8x256xi32>
    %217 = arith.cmpi slt, %209, %216 : vector<8x256xi32>
    %cst_234 = arith.constant 0.000000e+00 : f32
    %218 = vector.broadcast %cst_234 : f32 to vector<8x256xf32>
    %219 = arith.select %217, %215, %218 : vector<8x256xi1>, vector<8x256xf32>
    %c0_235 = arith.constant 0 : index
    %c0_236 = arith.constant 0 : index
    %c0_237 = arith.constant 0 : index
    %220 = vector.load %arg13[%c0_235, %c0_236, %c0_237] : memref<1x8x256xf32, #tpu.memory_space<vmem>>, vector<1x8x256xf32>
    %221 = vector.shape_cast %220 : vector<1x8x256xf32> to vector<8x256xf32>
    %222 = vector.shape_cast %219 : vector<8x256xf32> to vector<1x8x256xf32>
    tpu.vector_store %arg13[%c0_235, %c0_236, %c0_237], %222 {strides = array<i32>} : memref<1x8x256xf32, #tpu.memory_space<vmem>>, vector<1x8x256xf32>,
    return
  }
  func.func @transform_0(%arg0: i32) -> (i32, i32, i32) {
    %c0_i32 = arith.constant 0 : i32
    %c0_i32_0 = arith.constant 0 : i32
    %c0_i32_1 = arith.constant 0 : i32
    return %arg0, %c0_i32, %c0_i32_0 : i32, i32, i32
  }
  func.func @transform_1(%arg0: i32) -> (i32, i32) {
    %c0_i32 = arith.constant 0 : i32
    %c0_i32_0 = arith.constant 0 : i32
    %c0_i32_1 = arith.constant 0 : i32
    return %c0_i32, %c0_i32_0 : i32, i32
  }
  func.func @transform_2(%arg0: i32) -> (i32, i32) {
    %c0_i32 = arith.constant 0 : i32
    %c0_i32_0 = arith.constant 0 : i32
    %c0_i32_1 = arith.constant 0 : i32
    return %c0_i32, %c0_i32_0 : i32, i32
  }
  func.func @transform_3(%arg0: i32) -> (i32, i32) {
    %c0_i32 = arith.constant 0 : i32
    %c0_i32_0 = arith.constant 0 : i32
    %c0_i32_1 = arith.constant 0 : i32
    return %c0_i32, %c0_i32_0 : i32, i32
  }
  func.func @transform_4(%arg0: i32) -> (i32, i32) {
    %c0_i32 = arith.constant 0 : i32
    %c0_i32_0 = arith.constant 0 : i32
    %c0_i32_1 = arith.constant 0 : i32
    return %c0_i32, %c0_i32_0 : i32, i32
  }
  func.func @transform_5(%arg0: i32) -> (i32, i32) {
    %c0_i32 = arith.constant 0 : i32
    %c0_i32_0 = arith.constant 0 : i32
    %c0_i32_1 = arith.constant 0 : i32
    return %c0_i32, %c0_i32_0 : i32, i32
  }
  func.func @transform_6(%arg0: i32) -> (i32, i32) {
    %c0_i32 = arith.constant 0 : i32
    %c0_i32_0 = arith.constant 0 : i32
    %c0_i32_1 = arith.constant 0 : i32
    return %c0_i32, %c0_i32_0 : i32, i32
  }
  func.func @transform_7(%arg0: i32) -> (i32, i32) {
    %c0_i32 = arith.constant 0 : i32
    %c0_i32_0 = arith.constant 0 : i32
    %c0_i32_1 = arith.constant 0 : i32
    return %c0_i32, %c0_i32_0 : i32, i32
  }
  func.func @transform_8(%arg0: i32) -> (i32, i32) {
    %c0_i32 = arith.constant 0 : i32
    %c0_i32_0 = arith.constant 0 : i32
    %c0_i32_1 = arith.constant 0 : i32
    return %c0_i32, %c0_i32_0 : i32, i32
  }
  func.func @transform_9(%arg0: i32) -> (i32, i32) {
    %c0_i32 = arith.constant 0 : i32
    %c0_i32_0 = arith.constant 0 : i32
    %c0_i32_1 = arith.constant 0 : i32
    return %c0_i32, %c0_i32_0 : i32, i32
  }
  func.func @transform_10(%arg0: i32) -> (i32, i32) {
    %c0_i32 = arith.constant 0 : i32
    %c0_i32_0 = arith.constant 0 : i32
    %c0_i32_1 = arith.constant 0 : i32
    return %c0_i32, %c0_i32_0 : i32, i32
  }
  func.func @transform_11(%arg0: i32) -> (i32, i32) {
    %c0_i32 = arith.constant 0 : i32
    %c0_i32_0 = arith.constant 0 : i32
    %c0_i32_1 = arith.constant 0 : i32
    return %c0_i32, %c0_i32_0 : i32, i32
  }
  func.func @transform_12(%arg0: i32) -> (i32, i32, i32) {
    %c0_i32 = arith.constant 0 : i32
    %c0_i32_0 = arith.constant 0 : i32
    %c0_i32_1 = arith.constant 0 : i32
    return %arg0, %c0_i32, %c0_i32_0 : i32, i32, i32
  }
}

</mosaic_0001>

<bundles_post_ra>
// kernel: yolo_head_split_forward.1
= control target key start
LH: loop header
LB: loop body
LE: loop exit
PB: predicated region body
PF: predicated region fallthrough
CT: control target
= control target key end

     0   :  { %s4140_s21 = smov 0   ;;  %s5930_s0 = inlined_call_operand.vmem [shape: f32[2,4,256], index: 0, kind: input, shape index: {}]   ;;  %s5931_s1 = inlined_call_operand.vmem [shape: f32[3,256], index: 1, kind: input, shape index: {}]   ;;  %s5932_s2 = inlined_call_operand.vmem [shape: bf16[32,36], index: 2, kind: input, shape index: {}]   ;;  %s5933_s3 = inlined_call_operand.vmem [shape: f32[32,1], index: 3, kind: input, shape index: {}]   ;;  %s5934_s4 = inlined_call_operand.vmem [shape: bf16[32,288], index: 4, kind: input, shape index: {}]   ;;  %s5935_s5 = inlined_call_operand.vmem [shape: f32[32,1], index: 5, kind: input, shape index: {}]   ;;  %s5936_s6 = inlined_call_operand.vmem [shape: bf16[32,36], index: 6, kind: input, shape index: {}]   ;;  %s5937_s7 = inlined_call_operand.vmem [shape: f32[32,1], index: 7, kind: input, shape index: {}]   ;;  %s5938_s8 = inlined_call_operand.vmem [shape: bf16[32,288], index: 8, kind: input, shape index: {}]   ;;  %s5939_s9 = inlined_call_operand.vmem [shape: f32[32,1], index: 9, kind: input, shape index: {}]   ;;  %s5940_s10 = inlined_call_operand.vmem [shape: bf16[8,64], index: 10, kind: input, shape index: {}]   ;;  %s5941_s11 = inlined_call_operand.vmem [shape: f32[8,1], index: 11, kind: input, shape index: {}]   ;;  %s5942_s12 = inlined_call_operand.vmem [shape: f32[2,8,256], index: 12, kind: output, shape index: {}]  }
   0x1 LB: > { %s3744_s22 = sadd.s32 4294967295, %s4057_s21   ;;  %p3748_p0 = scmp.ge.s32.totalorder %s4057_s21, 1  ;;  %s4057_s21 = sphi %s4140_s21, %s22_s21  }
   0x2   : > { %p362_p1 = scmp.lt.s32.totalorder %s4057_s21, 3 }
   0x4   : > { %p363_p2 = pnand %p3748_p0, %p362_p1 }
   0x6   : > { %366 = sbr.rel (%p363_p2) target bundleno = 1930 (0x78a), region = 68 }
   0xd   : > { %p404_p3 = scmp.lt.s32.totalorder %s3744_s22, 1  ;;  %v435_v0 = vlaneseq  ;;  %v4059_v1 = vmov 0.0   ;;  %vm415_vm0 = vcmask 273408   ;;  %v511_v3 = vld [vmem:[%s5931_s1] ss:$4 sm:$0x3] }
   0xe   : > { %414 = vst [vmem:[#allocation2] sm:$0xff] %v4059_v1  ;;  %859 = vst [vmem:[#allocation5] sm:$0xff] %v4059_v1  ;;  %826 = vmatprep.mubr.f32.mxu1 %v4059_v1  ;;  %2386 = vmatprep.mubr.f32.mxu0 %v4059_v1  ;;  %v3753_v4 = vld [vmem:[%s5931_s1 + $0x2] ss:$4 sm:$0x3]  ;;  %s5957_s17 = smov 17  }
   0xf   : > { %862 = vst [vmem:[#allocation5 + $0x18] sm:$0xff] %v4059_v1  ;;  %865 = vst [vmem:[#allocation5 + $0x30] sm:$0xff] %v4059_v1  ;;  %s6086_s22 = smov (!%p404_p3, %s3744_s22), 1  ;;  %v4157_v2 = vshrl.u32 %v435_v0, 7  ;;  %vm678_vm1 = vcmask 277504   ;;  %s4061_s20 = smov 16  }
  0x10   : > { %868 = vst [vmem:[#allocation5 + $0x48] sm:$0xff] %v4059_v1  ;;  %416 = vst.msk [vmem:[#allocation2 + $0x8] sm:$0xf] %vm415_vm0, %v4059_v1  ;;  %v607_v5 = vld [vmem:[%s5931_s1] ss:$4 sm:$0x3] }
  0x11   : > { %5992 = vst [vmem:[#allocation6_spill] sm:$0xff] %v4157_v2  ;;  %s3788_s29 = sshll.u32 %s6086_s22, 3  ;;  %v4171_v6 = vsub.s32 0, %v4157_v2  ;;  %v4174_v7 = vsub.s32 1, %v4157_v2  ;;  %861 = vst.msk [vmem:[#allocation5 + $0x10] sm:$0xff] %vm678_vm1, %v4059_v1  ;;  %s4062_s23 = smov 2  }
  0x12   : > { %v3754_v8 = vld [vmem:[%s5931_s1 + $0x2] ss:$4 sm:$0x3]  ;;  %s408_s16 = scalar_lea.vmem %s5930_s0, %s3788_s29  ;;  %864 = vst.msk [vmem:[#allocation5 + $0x28] sm:$0xff] %vm678_vm1, %v4059_v1  ;;  %867 = vst.msk [vmem:[#allocation5 + $0x40] sm:$0xff] %vm678_vm1, %v4059_v1  ;;  %s5959_s24 = smov 32  }
  0x13   : > { %5993 = vst [vmem:[#allocation7_spill] sm:$0xff] %v4171_v6  ;;  %5994 = vst [vmem:[#allocation8_spill] sm:$0xff] %v4174_v7  ;;  %v417_v9 = vld [vmem:[%s408_s16] sm:$0xff]  ;;  %v516_v10 = vrot.slane %v511_v3, %v4171_v6  ;;  %v520_v11 = vrot.slane %v511_v3, %v4174_v7  ;;  %v478_v12 = vrot.slane %v3753_v4, %v4171_v6  ;;  %s5961_s25 = smov 18   ;;  %s5955_s26 = smov 34   ;;  %v4066_v26 = vmov 0  }
  0x14   : > { %v482_v13 = vrot.slane %v3753_v4, %v4174_v7  ;;  %419 = vrot.lane.b32.xlu0 %v417_v9, %s5957_s17  ;;  %v612_v14 = vrot.slane %v607_v5, %v4171_v6  ;;  %v616_v15 = vrot.slane %v607_v5, %v4174_v7  ;;  %v573_v16 = vrot.slane %v3754_v8, %v4171_v6  ;;  %v3755_v18 = vld [vmem:[%s5931_s1 + $0x2] ss:$4 sm:$0x3]  ;;  %v433_v31 = vld [vmem:[%s5931_s1] ss:$4 sm:$0x3] }
  0x15   : > { %v577_v17 = vrot.slane %v3754_v8, %v4174_v7  ;;  %v521_v19 = vcombine.low %v516_v10, %v520_v11  ;;  %v669_v22 = vrot.slane %v3755_v18, %v4171_v6  ;;  %v673_v23 = vrot.slane %v3755_v18, %v4174_v7  ;;  %870 = vst.msk [vmem:[#allocation5 + $0x58] sm:$0xff] %vm678_vm1, %v4059_v1  ;;  %s5945_s29 = smov 111   ;;  %s5951_s30 = smov 95  }
  0x16   : > { %v483_v20 = vcombine.low %v478_v12, %v482_v13  ;;  %v617_v21 = vcombine.low %v612_v14, %v616_v15  ;;  %4040 = vset.pattern.permute.xlu0 %v4066_v26  ;;  %4041 = vset.pattern.permute.xlu1 %v4066_v26  ;;  %vm426_vm2 = vcmask 1043592   ;;  %vm427_vm3 = vcmask 1047556   ;;  %s4069_s13 = smov 127   ;;  %s5947_s14 = smov 96  }
  0x17   : > { %522 = vrot.lane.b32.xlu1 %v521_v19, %s4061_s20  ;;  %v578_v24 = vcombine.low %v573_v16, %v577_v17  ;;  %v674_v25 = vcombine.low %v669_v22, %v673_v23  ;;  %vm422_vm4 = vcmask 138240   ;;  %vm430_vm5 = vcmask 134144   ;;  %vm428_vm6 = vmor %vm427_vm3, %vm426_vm2  ;;  %s5953_s15 = smov 126   ;;  %s5949_s16 = smov 112   ;;  %v718_v19 = vld [vmem:[%s5933_s3] sm:$0xff] }
  0x18   : > { %484 = vrot.lane.b32.xlu0 %v483_v20, %s4062_s23  ;;  %v438_v32 = vrot.slane %v433_v31, %v4171_v6  ;;  %v442_v33 = vrot.slane %v433_v31, %v4174_v7  ;;  %vm525_vm7 = vcmask 130048   ;;  %vm487_vm8 = vcmask 15360   ;;  %s5943_s18 = smov 110   ;;  %s4074_s19 = smov 94  }
  0x19   : > { %vm582_vm9 = vcmask 146432   ;;  %vm5963_vm10 = vcmask 261120   ;;  %v2083_v20 = vld [vmem:[%s5931_s1] ss:$4 sm:$0x3]  ;;  %vm463_vm11 = vcmask 1039360  }
  0x1a   : > { %v443_v37 = vcombine.low %v438_v32, %v442_v33  ;;  %v3769_v22 = vld [vmem:[%s5931_s1 + $0x2] ss:$4 sm:$0x3]  ;;  %v2088_v23 = vrot.slane %v2083_v20, %v4171_v6  ;;  %vm655_vm12 = vcmask 777216   ;;  %vm559_vm13 = vcmask 908288   ;;  %s5997_s27 = smov 111  }
  0x1b   : > { %618 = vrot.lane.b32.xlu1 %v617_v21, %s5959_s24  ;;  %v719_v21 = vld [vmem:[%s5933_s3 + $0x8] sm:$0xff]  ;;  %v2052_v26 = vrot.slane %v3769_v22, %v4171_v6  ;;  %vm598_vm14 = vcmask 900096   ;;  %vm502_vm15 = vcmask 1031168   ;;  %vm541_vm0 = vcmask 916480   ;;  %s5998_s28 = smov 110  }
  0x1c   : > { %579 = vrot.lane.b32.xlu0 %v578_v24, %s5961_s25  ;;  %v2092_v24 = vrot.slane %v2083_v20, %v4174_v7  ;;  %vm636_vm2 = vcmask 785408   ;;  %vm693_vm3 = vcmask 769024  }
  0x1e   : > { %v2093_v31 = vcombine.low %v2088_v23, %v2092_v24 }
  0x1f   : > { %675 = vrot.lane.b32.xlu1 %v674_v25, %s5955_s26  ;;  %v721_v25 = vld [vmem:[%s5933_s3 + $0x18] sm:$0xff] }
  0x86   : > { %v420_v27 = vpop.permute.xlu0 %419 }
  0x87   : > { %v421_v28 = vrot.slane %v420_v27, 4 }
  0x89   : > { %v423_v29 = vsel %vm422_vm4, %v421_v28, %v420_v27  ;;  %431 = vst.msk [vmem:[#allocation2 + $0x8] sm:$0xf] %vm430_vm5, %v421_v28  ;;  %v4210_v30 = vpop.permute.xlu1 %522  ;;  %v2056_v27 = vrot.slane %v3769_v22, %v4174_v7  ;;  %v3770_v28 = vld [vmem:[%s5931_s1 + $0x2] ss:$4 sm:$0x3]  ;;  %vm755_vm5 = vcmask 1043456  }
  0x8a   : > { %429 = vst.msk [vmem:[#allocation2] sm:$0xff] %vm428_vm6, %v423_v29  ;;  %v485_v40 = vpop.permute.xlu0 %484  ;;  %v524_v43 = vrot.slane %v4210_v30, 4  ;;  %v720_v29 = vld [vmem:[%s5933_s3 + $0x10] sm:$0xff]  ;;  %v2142_v32 = vrot.slane %v3770_v28, %v4171_v6  ;;  %v2146_v33 = vrot.slane %v3770_v28, %v4174_v7  ;;  %vm742_vm6 = vcmask 293888  }
  0x8b   : > { %v486_v44 = vrot.slane %v485_v40, 4 }
  0x8c   : > { %v526_v49 = vsel %vm525_vm7, %v524_v43, %v4210_v30  ;;  %v2174_v30 = vld [vmem:[%s5931_s1] ss:$4 sm:$0x3] }
  0x8d   : > { %v619_v34 = vpop.permute.xlu1 %618  ;;  %v488_v52 = vsel %vm487_vm8, %v486_v44, %v485_v40 }
  0x8e   : > { %v620_v38 = vrot.slane %v619_v34, 4  ;;  %v580_v50 = vpop.permute.xlu0 %579 }
  0x8f   : > { %v581_v53 = vrot.slane %v580_v50, 4 }
  0x90   : > { %v549_v35 = vld [vmem:[#allocation2 + $0x8] sm:$0xf]  ;;  %v622_v63 = vsel %vm5963_vm10, %v620_v38, %v619_v34  ;;  %v2057_v34 = vcombine.low %v2052_v26, %v2056_v27 }
  0x91   : > { %v4217_v36 = vld [vmem:[#allocation2] sm:$0xff]  ;;  %557 = vrot.lane.b32.xlu0 %v549_v35, %s5945_s29  ;;  %v606_v39 = vld [vmem:[#allocation2 + $0x8] sm:$0xf]  ;;  %v583_v60 = vsel %vm582_vm9, %v581_v53, %v580_v50  ;;  %v676_v3 = vpop.permute.xlu1 %675  ;;  %v2179_v35 = vrot.slane %v2174_v30, %v4171_v6 }
  0x92   : > { %651 = vrot.lane.b32.xlu1 %v4217_v36, %s5951_s30  ;;  %v445_v41 = vmul.f32 %v4217_v36, %v443_v37  ;;  %v626_v42 = vmul.f32 %v620_v38, %v606_v39  ;;  %v4042_v45 = vld [vmem:[#allocation2 + $0x8] ss:$0 sps:$4 sm:$0xff]   ;;  %v529_v54 = vmul.f32 %v4217_v36, %v526_v49  ;;  %v491_v55 = vmul.f32 %v4217_v36, %v488_v52  ;;  %v3771_v38 = vld [vmem:[%s5931_s1 + $0x2] ss:$4 sm:$0x3] }
  0x93   : > { %v471_v47 = vld [vmem:[#allocation2 + $0x8] sm:$0xf]  ;;  %v4241_v57 = vcombine.low %v4217_v36, %v4217_v36  ;;  %v4245_v59 = vcombine.high %v4217_v36, %v4217_v36  ;;  %v586_v62 = vmul.f32 %v4217_v36, %v583_v60  ;;  %v625_v5 = vmul.f32 %v4217_v36, %v622_v63 }
  0x94   : > { %v447_v46 = vcombine.high %v445_v41, %v445_v41  ;;  %449 = vst [vmem:[#allocation3] sm:$0xf] %v445_v41  ;;  %v4043_v48 = vld [vmem:[#allocation2 + $0x8] ss:$0 sps:$4 sm:$0xff]   ;;  %v492_v51 = vmul.f32 %v486_v44, %v471_v47  ;;  %v495_v4 = vcombine.high %v491_v55, %v491_v55  ;;  %v677_v9 = vrot.slane %v676_v3, 4 }
  0x95   : > { %459 = vrot.lane.b32.xlu0 %v4217_v36, %s4069_s13  ;;  %v567_v56 = vld [vmem:[#allocation2 + $0x8] sm:$0xf]  ;;  %v533_v10 = vcombine.low %v529_v54, %v529_v54  ;;  %v590_v13 = vcombine.low %v586_v62, %v586_v62  ;;  %v629_v15 = vcombine.high %v625_v5, %v625_v5  ;;  %v2183_v37 = vrot.slane %v2174_v30, %v4174_v7 }
  0x96   : > { %553 = vrot.lane.b32.xlu1 %v4217_v36, %s5945_s29  ;;  %450 = vst [vmem:[#allocation3 + $0x8] sm:$0xf] %v447_v46  ;;  %v587_v58 = vmul.f32 %v581_v53, %v567_v56  ;;  %v510_v0 = vld [vmem:[#allocation2 + $0x8] sm:$0xf]  ;;  %v679_v12 = vsel %vm678_vm1, %v677_v9, %v676_v3  ;;  %v2147_v39 = vcombine.low %v2142_v32, %v2146_v33 }
  0x97   : > { %v530_v8 = vmul.f32 %v524_v43, %v510_v0  ;;  %v682_v14 = vmul.f32 %v679_v12, %v4217_v36  ;;  %v663_v17 = vld [vmem:[#allocation2 + $0x8] sm:$0xf]  ;;  %v2184_v40 = vcombine.low %v2179_v35, %v2183_v37  ;;  %v2233_v41 = vrot.slane %v3771_v38, %v4171_v6 }
  0x98   : > { %v591_v61 = vcombine.low %v587_v58, %v587_v58  ;;  %v683_v18 = vmul.f32 %v677_v9, %v663_v17 }
  0x99   : > { %634 = vrot.lane.b32.xlu0 %v626_v42, %s5947_s14  ;;  %v534_v11 = vcombine.low %v530_v8, %v530_v8  ;;  %v686_v16 = vcombine.high %v682_v14, %v682_v14  ;;  %v2237_v42 = vrot.slane %v3771_v38, %v4174_v7 }
  0x9a   : > { %461 = vrot.lane.b32.xlu1 %v4042_v45, %s4069_s13 }
  0x9b   : > { %v2238_v43 = vcombine.low %v2233_v41, %v2237_v42 }
  0x9d   : > { %653 = vrot.lane.b32.xlu0 %v4043_v48, %s5951_s30 }
  0x9e   : > { %500 = vrot.lane.b32.xlu1 %v492_v51, %s5953_s15 }
  0xa1   : > { %537 = vrot.lane.b32.xlu0 %v529_v54, %s5949_s16 }
  0xa2   : > { %496 = vrot.lane.b32.xlu1 %v491_v55, %s5953_s15 }
  0xa5   : > { %457 = vrot.lane.b32.xlu0 %v4241_v57, %s4069_s13 }
  0xa6   : > { %555 = vrot.lane.b32.xlu1 %v4245_v59, %s5945_s29  ;;  %s5999_s29 = smov 96  }
  0xa9   : > { %596 = vrot.lane.b32.xlu0 %v591_v61, %s5943_s18 }
  0xaa   : > { %594 = vrot.lane.b32.xlu1 %v586_v62, %s5943_s18 }
  0xad   : > { %498 = vrot.lane.b32.xlu0 %v495_v4, %s5953_s15  ;;  %s6003_s15 = smov 18  }
  0xae   : > { %630 = vrot.lane.b32.xlu1 %v625_v5, %s5947_s14 }
  0xb1   : > { %535 = vrot.lane.b32.xlu0 %v533_v10, %s5949_s16 }
  0xb2   : > { %539 = vrot.lane.b32.xlu1 %v534_v11, %s5949_s16  ;;  %s5995_s16 = smov 126  }
  0xb5   : > { %592 = vrot.lane.b32.xlu0 %v590_v13, %s5943_s18  ;;  %s5996_s18 = smov 112  }
  0xb6   : > { %632 = vrot.lane.b32.xlu1 %v629_v15, %s5947_s14  ;;  %s6000_s14 = smov 95  }
  0xb9   : > { %649 = vrot.lane.b32.xlu0 %v4241_v57, %s5951_s30 }
  0xba   : > { %689 = vrot.lane.b32.xlu1 %v686_v16, %s4074_s19 }
  0xbd   : > { %691 = vrot.lane.b32.xlu0 %v683_v18, %s4074_s19 }
  0xbe   : > { %687 = vrot.lane.b32.xlu1 %v682_v14, %s4074_s19 }
  0xc1   : > { %724 = vperm.xlu0 %4040, %v718_v19  }
  0xc2   : > { %729 = vperm.xlu1 %4041, %v719_v21  }
  0xc5   : > { %739 = vperm.xlu0 %4040, %v721_v25  }
  0xc6   : > { %734 = vperm.xlu1 %4041, %v720_v29  }
  0xc9   : > { %2094 = vrot.lane.b32.xlu0 %v2093_v31, %s4061_s20 }
  0xca   : > { %2058 = vrot.lane.b32.xlu1 %v2057_v34, %s4062_s23 }
  0xcd   : > { %2148 = vrot.lane.b32.xlu0 %v2147_v39, %s5961_s25  ;;  %v3791_v39 = vld [vmem:[%s5932_s2] sm:$0xff]  }
  0xce   : > { %2185 = vrot.lane.b32.xlu1 %v2184_v40, %s5959_s24  ;;  %v3792_v41 = vunpack.c.l.bf16 %v3791_v39  ;;  %s6004_s24 = smov 32  }
  0xd2   : > { %2239 = vrot.lane.b32.xlu1 %v2238_v43, %s5955_s26  ;;  %v3793_v43 = vunpack.c.h.bf16 %v3791_v39 }
 0x103   : > { %v558_v44 = vpop.permute.xlu0 %557 }
 0x104   : > { %v652_v45 = vpop.permute.xlu1 %651 }
 0x107   : > { %v460_v46 = vpop.permute.xlu0 %459 }
 0x108   : > { %v554_v47 = vpop.permute.xlu1 %553 }
 0x10b   : > { %v635_v48 = vpop.permute.xlu0 %634 }
 0x10c   : > { %v462_v49 = vpop.permute.xlu1 %461 }
 0x10d   : > { %v465_v50 = vsel %vm463_vm11, %v460_v46, %v462_v49 }
 0x10e   : > { %469 = vst [vmem:[#allocation3 + $0x8] sm:$0xf0] %v465_v50 }
 0x10f   : > { %v654_v51 = vpop.permute.xlu0 %653 }
 0x110   : > { %v657_v52 = vsel %vm655_vm12, %v652_v45, %v654_v51  ;;  %v501_v53 = vpop.permute.xlu1 %500 }
 0x111   : > { %661 = vst [vmem:[#allocation3 + $0x38] sm:$0xf0] %v657_v52 }
 0x113   : > { %v538_v54 = vpop.permute.xlu0 %537 }
 0x114   : > { %v497_v55 = vpop.permute.xlu1 %496 }
 0x115   : > { %v709_v23 = vld [vmem:[#allocation3 + $0x8] sm:$0xff] }
 0x117   : > { %v458_v56 = vpop.permute.xlu0 %457 }
 0x118   : > { %v464_v58 = vsel %vm463_vm11, %v458_v56, %v460_v46  ;;  %v556_v60 = vpop.permute.xlu1 %555 }
 0x119   : > { %468 = vst [vmem:[#allocation3] sm:$0xf0] %v464_v58  ;;  %v560_v61 = vsel %vm559_vm13, %v554_v47, %v556_v60  ;;  %v561_v62 = vsel %vm559_vm13, %v556_v60, %v558_v44  ;;  %v3806_v44 = vld [vmem:[%s5932_s2 + $0x8] sm:$0xff]  }
 0x11a   : > { %564 = vst [vmem:[#allocation3 + $0x20] sm:$0xf] %v560_v61  ;;  %565 = vst [vmem:[#allocation3 + $0x28] sm:$0xf] %v561_v62  ;;  %v3797_v46 = vunpack.c.h.bf16 %v3806_v44 }
 0x11b   : > { %v597_v63 = vpop.permute.xlu0 %596 }
 0x11c   : > { %v595_v0 = vpop.permute.xlu1 %594 }
 0x11d   : > { %v600_v3 = vsel %vm598_vm14, %v595_v0, %v597_v63 }
 0x11e   : > { %604 = vst [vmem:[#allocation3 + $0x28] sm:$0xf0] %v600_v3 }
 0x11f   : > { %v499_v4 = vpop.permute.xlu0 %498 }
 0x120   : > { %v503_v5 = vsel %vm502_vm15, %v497_v55, %v499_v4  ;;  %v504_v8 = vsel %vm502_vm15, %v499_v4, %v501_v53  ;;  %v631_v9 = vpop.permute.xlu1 %630  ;;  %v708_v26 = vld [vmem:[#allocation3] sm:$0xff]  ;;  %v4044_v4 = vld [vmem:[#allocation2 + $0x8] ss:$0 sps:$4 sm:$0xff]  }
 0x121   : > { %507 = vst [vmem:[#allocation3 + $0x10] sm:$0xf] %v503_v5  ;;  %508 = vst [vmem:[#allocation3 + $0x18] sm:$0xf] %v504_v8 }
 0x123   : > { %v536_v10 = vpop.permute.xlu0 %535 }
 0x124   : > { %v542_v11 = vsel %vm541_vm0, %v536_v10, %v538_v54  ;;  %v540_v12 = vpop.permute.xlu1 %539  ;;  %v2046_v10 = vld [vmem:[#allocation2 + $0x8] sm:$0xf] }
 0x125   : > { %546 = vst [vmem:[#allocation3 + $0x10] sm:$0xf0] %v542_v11  ;;  %v543_v13 = vsel %vm541_vm0, %v538_v54, %v540_v12  ;;  %v713_v32 = vld [vmem:[#allocation3 + $0x28] sm:$0xff]  ;;  %v2082_v11 = vld [vmem:[#allocation2 + $0x8] sm:$0xf] }
 0x126   : > { %547 = vst [vmem:[#allocation3 + $0x18] sm:$0xf0] %v543_v13 }
 0x127   : > { %v593_v14 = vpop.permute.xlu0 %592 }
 0x128   : > { %v599_v15 = vsel %vm598_vm14, %v593_v14, %v595_v0  ;;  %v633_v16 = vpop.permute.xlu1 %632 }
 0x129   : > { %603 = vst [vmem:[#allocation3 + $0x20] sm:$0xf0] %v599_v15  ;;  %v637_v17 = vsel %vm636_vm2, %v631_v9, %v633_v16  ;;  %v638_v18 = vsel %vm636_vm2, %v633_v16, %v635_v48 }
 0x12a   : > { %641 = vst [vmem:[#allocation3 + $0x30] sm:$0xf] %v637_v17  ;;  %642 = vst [vmem:[#allocation3 + $0x38] sm:$0xf] %v638_v18 }
 0x12b   : > { %v650_v19 = vpop.permute.xlu0 %649 }
 0x12c   : > { %v656_v20 = vsel %vm655_vm12, %v650_v19, %v652_v45  ;;  %v690_v21 = vpop.permute.xlu1 %689  ;;  %v710_v22 = vld [vmem:[#allocation3 + $0x10] sm:$0xff]  ;;  %v3796_v45 = vunpack.c.l.bf16 %v3806_v44 }
 0x12d   : > { %660 = vst [vmem:[#allocation3 + $0x30] sm:$0xf0] %v656_v20  ;;  %v711_v24 = vld [vmem:[#allocation3 + $0x18] sm:$0xff]  ;;  %v3810_v28 = vpack.c.bf16 %v710_v22, %v708_v26 }
 0x12e   : > { %v3808_v25 = vpack.c.bf16 %v711_v24, %v709_v23  ;;  %v2136_v23 = vld [vmem:[#allocation2 + $0x8] sm:$0xf] }
 0x12f   : > { %v692_v27 = vpop.permute.xlu0 %691 }
 0x130   : > { %v695_v29 = vsel %vm693_vm3, %v690_v21, %v692_v27  ;;  %v688_v30 = vpop.permute.xlu1 %687  ;;  %3809 = vmatprep.subr.bf16.mxu1 %v3808_v25  ;;  %v712_v35 = vld [vmem:[#allocation3 + $0x20] sm:$0xff]  ;;  %v2119_v25 = vld [vmem:[#allocation2 + $0x8] sm:$0xf] }
 0x131   : > { %699 = vst [vmem:[#allocation3 + $0x48] sm:$0xf] %v695_v29  ;;  %v694_v31 = vsel %vm693_vm3, %v688_v30, %v690_v21  ;;  %3811 = vmatpush1.bf16.msra.mxu1 %v3810_v28  ;;  %v715_v33 = vld [vmem:[#allocation3 + $0x38] sm:$0xff] }
 0x132   : > { %698 = vst [vmem:[#allocation3 + $0x40] sm:$0xf] %v694_v31  ;;  %v3812_v34 = vpack.c.bf16 %v715_v33, %v713_v32  ;;  %v2173_v31 = vld [vmem:[#allocation2 + $0x8] sm:$0xf] }
 0x134   : > { %3813 = vmatprep.subr.bf16.mxu1 %v3812_v34  ;;  %v714_v37 = vld [vmem:[#allocation3 + $0x30] sm:$0xff] }
 0x135   : > { %v3814_v38 = vpack.c.bf16 %v714_v37, %v712_v35  ;;  %v4045_v35 = vld [vmem:[#allocation2 + $0x8] ss:$0 sps:$4 sm:$0xff]  }
 0x137   : > { %3815 = vmatpush1.bf16.msra.mxu1 %v3814_v38 }
 0x138   : > { %v717_v40 = vld [vmem:[#allocation3 + $0x48] sm:$0xf] }
 0x139   : > { %3756 = vmatprep.subr.msk.mxu1 %vm755_vm5, %v717_v40  ;;  %v716_v42 = vld [vmem:[#allocation3 + $0x40] sm:$0xf] }
 0x13b   : > { %3757 = vmatpush1.msk.msra.mxu1 %vm755_vm5, %v716_v42 }
 0x13c   : > { %3758 = vmatmul.mubr.msk.f32.vlgmr.msra.gmra.mrb[0].mxu1 %vm742_vm6, %v3792_v41 }
 0x13d   : > { %832 = vmatprep.mubr.f32.mxu1 %v4059_v1 }
 0x140   : > { %3759 = vmatmul.mubr.msk.f32.gmra.mrb[2].mxu1 %vm742_vm6, %v3793_v43  ;;  %v725_v48 = vpop.permute.xlu0 %724 }
 0x141   : > { %838 = vmatprep.mubr.f32.mxu1 %v4059_v1  ;;  %v4343_v47 = vpop.permute.xlu1 %729 }
 0x144   : > { %3760 = vmatmul.mubr.msk.f32.gmra.mrb[4].mxu1 %vm742_vm6, %v3796_v45  ;;  %v4347_v50 = vpop.permute.xlu0 %739 }
 0x145   : > { %844 = vmatprep.mubr.f32.mxu1 %v4059_v1  ;;  %v4345_v49 = vpop.permute.xlu1 %734 }
 0x148   : > { %3761 = vmatmul.mubr.msk.f32.gmra.mrb[6].mxu1 %vm742_vm6, %v3797_v46  ;;  %v2095_v60 = vpop.permute.xlu0 %2094 }
 0x149   : > { %v2059_v51 = vpop.permute.xlu1 %2058  ;;  %v2096_v3 = vrot.slane %v2095_v60, 4 }
 0x14a   : > { %v2060_v53 = vrot.slane %v2059_v51, 4 }
 0x14b   : > { %v2101_v13 = vmul.f32 %v2096_v3, %v2082_v11  ;;  %v2097_v16 = vsel %vm525_vm7, %v2096_v3, %v2095_v60 }
 0x14c   : > { %v2061_v63 = vsel %vm487_vm8, %v2060_v53, %v2059_v51  ;;  %v2065_v12 = vmul.f32 %v2060_v53, %v2046_v10  ;;  %v2149_v19 = vpop.permute.xlu0 %2148  ;;  %v2100_v20 = vmul.f32 %v2097_v16, %v4217_v36 }
 0x14d   : > { %v2064_v5 = vmul.f32 %v2061_v63, %v4217_v36  ;;  %v2105_v18 = vcombine.low %v2101_v13, %v2101_v13  ;;  %v2150_v21 = vrot.slane %v2149_v19, 4  ;;  %v2186_v22 = vpop.permute.xlu1 %2185 }
 0x14e   : > { %v2104_v26 = vcombine.low %v2100_v20, %v2100_v20  ;;  %v2187_v27 = vrot.slane %v2186_v22, 4 }
 0x14f   : > { %v2068_v15 = vcombine.high %v2064_v5, %v2064_v5  ;;  %v2155_v24 = vmul.f32 %v2150_v21, %v2136_v23  ;;  %v2151_v29 = vsel %vm582_vm9, %v2150_v21, %v2149_v19  ;;  %v2281_v19 = vld [vmem:[%s5937_s7 + $0x8] sm:$0xff]  ;;  %v3762_v23 = vld [vmem:[%s5931_s1 + $0x2] ss:$4 sm:$0x3] }
 0x150   : > { %v2188_v30 = vsel %vm5963_vm10, %v2187_v27, %v2186_v22  ;;  %v2192_v32 = vmul.f32 %v2187_v27, %v2173_v31  ;;  %v2154_v34 = vmul.f32 %v2151_v29, %v4217_v36  ;;  %vm911_vm10 = vcmask 1047688   ;;  %v2282_v22 = vld [vmem:[%s5937_s7 + $0x10] sm:$0xff] }
 0x151   : > { %v2159_v28 = vcombine.low %v2155_v24, %v2155_v24  ;;  %v2191_v33 = vmul.f32 %v2188_v30, %v4217_v36  ;;  %v2240_v45 = vpop.permute.xlu1 %2239  ;;  %v2283_v24 = vld [vmem:[%s5937_s7 + $0x18] sm:$0xff]  ;;  %v1049_v27 = vrot.slane %v3762_v23, %v4171_v6  ;;  %v1053_v29 = vrot.slane %v3762_v23, %v4174_v7  ;;  %v1146_v30 = vld [vmem:[%s5931_s1] ss:$4 sm:$0x3] }
 0x152   : > { %v2158_v39 = vcombine.low %v2154_v34, %v2154_v34  ;;  %v2241_v51 = vrot.slane %v2240_v45, 4 }
 0x153   : > { %v2195_v37 = vcombine.high %v2191_v33, %v2191_v33 }
 0x20f   : > { %v828_v52 = vpop.f32.mrb[0].mxu1 }
 0x210   : > { %v829_v54 = vadd.f32 %v828_v52, %v725_v48  ;;  %v830_v55 = vpop.f32.mrb[1].mxu1 }
 0x211   : > { %v831_v56 = vadd.f32 %v830_v55, %v725_v48 }
 0x212   : > { %v851_v58 = vmax.f32 %v829_v54, 0.0  ;;  %v2227_v54 = vld [vmem:[#allocation2 + $0x8] sm:$0xf] }
 0x213   : > { %v852_v61 = vmax.f32 %v831_v56, 0.0  ;;  %v834_v62 = vpop.f32.mrb[2].mxu1  ;;  %v2246_v55 = vmul.f32 %v2241_v51, %v2227_v54 }
 0x214   : > { %879 = vrot.lane.b32.xlu1 %v851_v58, %s5957_s17  ;;  %v836_v0 = vpop.f32.mrb[3].mxu1  ;;  %v835_v41 = vadd.f32 %v834_v62, %v4343_v47  ;;  %v2009_v58 = vld [vmem:[%s5931_s1] ss:$4 sm:$0x3] }
 0x215   : > { %881 = vrot.lane.b32.xlu0 %v852_v61, %s5957_s17  ;;  %v837_v38 = vadd.f32 %v836_v0, %v4343_v47  ;;  %v2014_v60 = vrot.slane %v2009_v58, %v4171_v6  ;;  %v2018_v61 = vrot.slane %v2009_v58, %v4174_v7  ;;  %v932_v62 = vld [vmem:[%s5931_s1] ss:$4 sm:$0x3] }
 0x216   : > { %v853_v43 = vmax.f32 %v835_v41, 0.0  ;;  %v4415_v0 = vrot.slane %v932_v62, %v4174_v7 }
 0x217   : > { %v840_v8 = vpop.f32.mrb[4].mxu1  ;;  %v2019_v63 = vcombine.low %v2014_v60, %v2018_v61  ;;  %v2981_v61 = vld [vmem:[%s5931_s1] ss:$4 sm:$0x3] }
 0x218   : > { %2037 = vrot.lane.b32.xlu1 %v4044_v4, %s4069_s13  ;;  %v842_v9 = vpop.f32.mrb[5].mxu1  ;;  %v841_v44 = vadd.f32 %v840_v8, %v4345_v49 }
 0x219   : > { %2035 = vrot.lane.b32.xlu0 %v4217_v36, %s4069_s13  ;;  %v843_v40 = vadd.f32 %v842_v9, %v4345_v49  ;;  %v2242_v49 = vsel %vm678_vm1, %v2241_v51, %v2240_v45  ;;  %v2021_v4 = vmul.f32 %v2019_v63, %v4217_v36  ;;  %v3763_v45 = vld [vmem:[%s5931_s1 + $0x2] ss:$4 sm:$0x3] }
 0x21a   : > { %v855_v47 = vmax.f32 %v841_v44, 0.0  ;;  %v2245_v56 = vmul.f32 %v2242_v49, %v4217_v36  ;;  %v1329_v51 = vrot.slane %v3763_v45, %v4174_v7 }
 0x21b   : > { %v846_v14 = vpop.f32.mrb[6].mxu1  ;;  %v856_v42 = vmax.f32 %v843_v40, 0.0  ;;  %v2023_v11 = vcombine.high %v2021_v4, %v2021_v4  ;;  %v2705_v40 = vld [vmem:[%s5931_s1] ss:$4 sm:$0x3] }
 0x21c   : > { %v848_v17 = vpop.f32.mrb[7].mxu1  ;;  %2073 = vrot.lane.b32.xlu1 %v2065_v12, %s5995_s16  ;;  %v847_v48 = vadd.f32 %v846_v14, %v4347_v50  ;;  %v2714_v44 = vrot.slane %v2705_v40, %v4174_v7 }
 0x21d   : > { %2071 = vrot.lane.b32.xlu0 %v2068_v15, %s5995_s16  ;;  %v849_v46 = vadd.f32 %v848_v17, %v4347_v50  ;;  %v2249_v50 = vcombine.high %v2245_v56, %v2245_v56 }
 0x21e   : > { %v857_v53 = vmax.f32 %v847_v48, 0.0  ;;  %v1325_v48 = vrot.slane %v3763_v45, %v4171_v6 }
 0x21f   : > { %v858_v52 = vmax.f32 %v849_v46, 0.0 }
 0x220   : > { %2110 = vrot.lane.b32.xlu1 %v2105_v18, %s5996_s18 }
 0x221   : > { %2108 = vrot.lane.b32.xlu0 %v2100_v20, %s5996_s18 }
 0x224   : > { %2069 = vrot.lane.b32.xlu1 %v2064_v5, %s5995_s16 }
 0x225   : > { %2033 = vrot.lane.b32.xlu0 %v4241_v57, %s4069_s13 }
 0x228   : > { %2127 = vrot.lane.b32.xlu1 %v2119_v25, %s5997_s27 }
 0x229   : > { %2106 = vrot.lane.b32.xlu0 %v2104_v26, %s5996_s18 }
 0x22c   : > { %2164 = vrot.lane.b32.xlu1 %v2159_v28, %s5998_s28 }
 0x22d   : > { %2125 = vrot.lane.b32.xlu0 %v4245_v59, %s5997_s27  ;;  %v854_v59 = vmax.f32 %v837_v38, 0.0 }
 0x230   : > { %2200 = vrot.lane.b32.xlu1 %v2192_v32, %s5999_s29 }
 0x231   : > { %2162 = vrot.lane.b32.xlu0 %v2154_v34, %s5998_s28  ;;  %v1155_v34 = vrot.slane %v1146_v30, %v4174_v7 }
 0x234   : > { %2218 = vrot.lane.b32.xlu1 %v4045_v35, %s6000_s14  ;;  %v3778_v35 = vld [vmem:[%s5931_s1 + $0x2] ss:$4 sm:$0x3] }
 0x235   : > { %2198 = vrot.lane.b32.xlu0 %v2195_v37, %s5999_s29 }
 0x238   : > { %2160 = vrot.lane.b32.xlu1 %v2158_v39, %s5998_s28  ;;  %v2608_v39 = vrot.slane %v3778_v35, %v4171_v6 }
 0x239   : > { %2216 = vrot.lane.b32.xlu0 %v4217_v36, %s6000_s14 }
 0x23c   : > { %885 = vrot.lane.b32.xlu1 %v854_v59, %s5957_s17  ;;  %v2612_v59 = vrot.slane %v3778_v35, %v4174_v7 }
 0x23d   : > { %2123 = vrot.lane.b32.xlu0 %v4217_v36, %s5997_s27  ;;  %v4430_v36 = vrot.slane %v932_v62, %v4171_v6 }
 0x240   : > { %889 = vrot.lane.b32.xlu1 %v856_v42, %s5957_s17 }
 0x241   : > { %883 = vrot.lane.b32.xlu0 %v853_v43, %s5957_s17  ;;  %v2710_v43 = vrot.slane %v2705_v40, %v4171_v6 }
 0x244   : > { %2214 = vrot.lane.b32.xlu1 %v4241_v57, %s6000_s14  ;;  %v2280_v57 = vld [vmem:[%s5937_s7] sm:$0xff] }
 0x245   : > { %887 = vrot.lane.b32.xlu0 %v855_v47, %s5957_s17 }
 0x248   : > { %893 = vrot.lane.b32.xlu1 %v858_v52, %s5957_s17  ;;  %v1422_v52 = vld [vmem:[%s5931_s1] ss:$4 sm:$0x3] }
 0x249   : > { %891 = vrot.lane.b32.xlu0 %v857_v53, %s5957_s17  ;;  %v1427_v54 = vrot.slane %v1422_v52, %v4171_v6 }
 0x24c   : > { %2254 = vrot.lane.b32.xlu1 %v2246_v55, %s4074_s19  ;;  %v1431_v55 = vrot.slane %v1422_v52, %v4174_v7 }
 0x24d   : > { %2196 = vrot.lane.b32.xlu0 %v2191_v33, %s5999_s29  ;;  %v1151_v33 = vrot.slane %v1146_v30, %v4171_v6 }
 0x250   : > { %2286 = vperm.xlu1 %4041, %v2280_v57  }
 0x251   : > { %2252 = vrot.lane.b32.xlu0 %v2249_v50, %s4074_s19 }
 0x255   : > { %2250 = vrot.lane.b32.xlu0 %v2245_v56, %s4074_s19  ;;  %v3779_v56 = vld [vmem:[%s5931_s1 + $0x2] ss:$4 sm:$0x3] }
 0x256   : > { %v2884_v58 = vrot.slane %v3779_v56, %v4171_v6  ;;  %v2888_v60 = vrot.slane %v3779_v56, %v4174_v7 }
 0x286   : > { %v880_v3 = vpop.permute.xlu1 %879 }
 0x287   : > { %912 = vst.msk [vmem:[#allocation5] sm:$0xff] %vm911_vm10, %v880_v3  ;;  %v882_v5 = vpop.permute.xlu0 %881 }
 0x288   : > { %v4420_v8 = vsel %vm422_vm4, %v880_v3, %v882_v5  ;;  %914 = vst.msk [vmem:[#allocation5 + $0x10] sm:$0xff] %vm422_vm4, %v882_v5  ;;  %v2986_v3 = vrot.slane %v2981_v61, %v4171_v6  ;;  %v2990_v5 = vrot.slane %v2981_v61, %v4174_v7 }
 0x289   : > { %913 = vst [vmem:[#allocation5 + $0x8] sm:$0xff] %v4420_v8  ;;  %v4426_v9 = vmul.f32 %v4415_v0, %v4420_v8 }
 0x28a   : > { %v2038_v10 = vpop.permute.xlu1 %2037 }
 0x28b   : > { %953 = vst [vmem:[#allocation3 + $0x8] sm:$0xff] %v4426_v9  ;;  %v2036_v12 = vpop.permute.xlu0 %2035 }
 0x28c   : > { %2026 = vst [vmem:[#allocation3 + $0x8] sm:$0xf] %v2023_v11  ;;  %v2040_v13 = vsel %vm463_vm11, %v2036_v12, %v2038_v10  ;;  %v3764_v10 = vld [vmem:[%s5931_s1 + $0x2] ss:$4 sm:$0x3] }
 0x28d   : > { %2044 = vst [vmem:[#allocation3 + $0x8] sm:$0xf0] %v2040_v13 }
 0x28e   : > { %v4433_v14 = vld [vmem:[#allocation5] sm:$0xff]  ;;  %v4435_v15 = vpop.permute.xlu1 %2073 }
 0x28f   : > { %6001 = vst [vmem:[#allocation9_spill] sm:$0xff] %v4433_v14  ;;  %v4437_v16 = vld [vmem:[#allocation5 + $0x10] sm:$0xff]  ;;  %984 = vrot.lane.b32.xlu1 %v4433_v14, %s4069_s13  ;;  %v4441_v17 = vpop.permute.xlu0 %2071  ;;  %v4445_v18 = vmul.f32 %v4433_v14, %v4430_v36  ;;  %2419 = vst [vmem:[#allocation5] sm:$0xff] %v4059_v1 }
 0x290   : > { %6002 = vst [vmem:[#allocation10_spill] sm:$0xff] %v4437_v16  ;;  %988 = vrot.lane.b32.xlu0 %v4437_v16, %s4069_s13  ;;  %2421 = vst.msk [vmem:[#allocation5 + $0x10] sm:$0xff] %vm678_vm1, %v4059_v1 }
 0x291   : > { %952 = vst [vmem:[#allocation3] sm:$0xff] %v4445_v18 }
 0x292   : > { %v4456_v20 = vpop.permute.xlu1 %2110  ;;  %2025 = vst [vmem:[#allocation3] sm:$0xf] %v2021_v4 }
 0x293   : > { %986 = vrot.lane.b32.xlu1 %v4420_v8, %s4069_s13  ;;  %v4460_v21 = vpop.permute.xlu0 %2108 }
 0x294   : > { %2291 = vperm.xlu0 %4040, %v2281_v19   ;;  %v2076_v19 = vsel %vm502_vm15, %v4441_v17, %v4435_v15  ;;  %v1601_v15 = vrot.slane %v3764_v10, %v4171_v6 }
 0x296   : > { %v4471_v25 = vpop.permute.xlu1 %2069 }
 0x297   : > { %2296 = vperm.xlu1 %4041, %v2282_v22   ;;  %v2034_v26 = vpop.permute.xlu0 %2033  ;;  %v2113_v22 = vsel %vm541_vm0, %v4460_v21, %v4456_v20  ;;  %v3780_v20 = vld [vmem:[%s5931_s1 + $0x2] ss:$4 sm:$0x3] }
 0x298   : > { %v2039_v28 = vsel %vm463_vm11, %v2034_v26, %v2036_v12  ;;  %2301 = vperm.xlu0 %4040, %v2283_v24   ;;  %v1605_v24 = vrot.slane %v3764_v10, %v4174_v7  ;;  %v3164_v35 = vrot.slane %v3780_v20, %v4174_v7 }
 0x299   : > { %2043 = vst [vmem:[#allocation3] sm:$0xf0] %v2039_v28 }
 0x29a   : > { %v4479_v31 = vpop.permute.xlu1 %2127 }
 0x29b   : > { %1054 = vrot.lane.b32.xlu1 %v1049_v27, %s4062_s23  ;;  %v4482_v32 = vpop.permute.xlu0 %2106 }
 0x29c   : > { %1056 = vrot.lane.b32.xlu0 %v1053_v29, %s4062_s23 }
 0x29e   : > { %v4490_v37 = vpop.permute.xlu1 %2164 }
 0x29f   : > { %1156 = vrot.lane.b32.xlu1 %v1151_v33, %s4061_s20  ;;  %v4493_v38 = vpop.permute.xlu0 %2125 }
 0x2a0   : > { %1158 = vrot.lane.b32.xlu0 %v1155_v34, %s4061_s20  ;;  %v2130_v29 = vsel %vm559_vm13, %v4493_v38, %v4479_v31 }
 0x2a2   : > { %v4501_v41 = vpop.permute.xlu1 %2200 }
 0x2a3   : > { %2613 = vrot.lane.b32.xlu1 %v2608_v39, %s4062_s23  ;;  %v4504_v42 = vpop.permute.xlu0 %2162  ;;  %v4599_v39 = vld [vmem:[#allocation5 + $0x48] sm:$0xff] }
 0x2a4   : > { %2615 = vrot.lane.b32.xlu0 %v2612_v59, %s4062_s23  ;;  %v2167_v30 = vsel %vm598_vm14, %v4504_v42, %v4490_v37  ;;  %6009 = vst [vmem:[#allocation14_spill] sm:$0xff] %v4599_v39  ;;  %v3160_v37 = vrot.slane %v3780_v20, %v4171_v6  ;;  %s6032_s23 = smov 17  }
 0x2a6   : > { %v4512_v46 = vpop.permute.xlu1 %2218 }
 0x2a7   : > { %2715 = vrot.lane.b32.xlu1 %v2710_v43, %s4061_s20  ;;  %v4515_v47 = vpop.permute.xlu0 %2198  ;;  %v2075_v43 = vsel %vm502_vm15, %v4471_v25, %v4441_v17 }
 0x2a8   : > { %2717 = vrot.lane.b32.xlu0 %v2714_v44, %s4061_s20  ;;  %s6008_s20 = smov 34   ;;  %v2112_v44 = vsel %vm541_vm0, %v4482_v32, %v4460_v21  ;;  %v2271_v21 = vld [vmem:[#allocation3 + $0x8] sm:$0xff] }
 0x2aa   : > { %v4523_v53 = vpop.permute.xlu1 %2160 }
 0x2ab   : > { %1330 = vrot.lane.b32.xlu1 %v1325_v48, %s6003_s15  ;;  %v4526_v49 = vpop.permute.xlu0 %2216  ;;  %v2203_v48 = vsel %vm636_vm2, %v4515_v47, %v4501_v41  ;;  %v2166_v41 = vsel %vm598_vm14, %v4523_v53, %v4504_v42 }
 0x2ac   : > { %1332 = vrot.lane.b32.xlu0 %v1329_v51, %s6003_s15  ;;  %v2221_v51 = vsel %vm655_vm12, %v4526_v49, %v4512_v46 }
 0x2ae   : > { %v886_v57 = vpop.permute.xlu1 %885 }
 0x2af   : > { %917 = vst.msk [vmem:[#allocation5 + $0x28] sm:$0xff] %vm422_vm4, %v886_v57  ;;  %1432 = vrot.lane.b32.xlu1 %v1427_v54, %s6004_s24  ;;  %v4536_v50 = vpop.permute.xlu0 %2123 }
 0x2b0   : > { %1434 = vrot.lane.b32.xlu0 %v1431_v55, %s6004_s24  ;;  %v2129_v46 = vsel %vm559_vm13, %v4536_v50, %v4493_v38 }
 0x2b2   : > { %v890_v62 = vpop.permute.xlu1 %889 }
 0x2b3   : > { %920 = vst.msk [vmem:[#allocation5 + $0x40] sm:$0xff] %vm422_vm4, %v890_v62  ;;  %2889 = vrot.lane.b32.xlu1 %v2884_v58, %s6003_s15  ;;  %v884_v63 = vpop.permute.xlu0 %883 }
 0x2b4   : > { %v4548_v4 = vsel %vm422_vm4, %v884_v63, %v886_v57  ;;  %915 = vst.msk [vmem:[#allocation5 + $0x18] sm:$0xff] %vm911_vm10, %v884_v63  ;;  %2891 = vrot.lane.b32.xlu0 %v2888_v60, %s6003_s15  ;;  %v2270_v57 = vld [vmem:[#allocation3] sm:$0xff] }
 0x2b5   : > { %916 = vst [vmem:[#allocation5 + $0x20] sm:$0xff] %v4548_v4  ;;  %v947_v11 = vmul.f32 %v4415_v0, %v4548_v4 }
 0x2b6   : > { %v4559_v12 = vld [vmem:[#allocation5 + $0x28] sm:$0xff]  ;;  %v4561_v13 = vpop.permute.xlu1 %2214 }
 0x2b7   : > { %6005 = vst [vmem:[#allocation11_spill] sm:$0xff] %v4559_v12  ;;  %2991 = vrot.lane.b32.xlu1 %v2986_v3, %s6004_s24  ;;  %v888_v23 = vpop.permute.xlu0 %887  ;;  %955 = vst [vmem:[#allocation3 + $0x18] sm:$0xff] %v947_v11  ;;  %v3816_v26 = vpack.c.bf16 %v947_v11, %v4426_v9  ;;  %v2220_v38 = vsel %vm655_vm12, %v4561_v13, %v4526_v49 }
 0x2b8   : > { %2424 = vst.msk [vmem:[#allocation5 + $0x28] sm:$0xff] %vm678_vm1, %v4059_v1  ;;  %v4575_v27 = vsel %vm422_vm4, %v888_v23, %v890_v62  ;;  %2993 = vrot.lane.b32.xlu0 %v2990_v5, %s6004_s24  ;;  %2080 = vst [vmem:[#allocation3 + $0x18] sm:$0xf] %v2076_v19 }
 0x2b9   : > { %918 = vst.msk [vmem:[#allocation5 + $0x30] sm:$0xff] %vm911_vm10, %v888_v23  ;;  %2117 = vst [vmem:[#allocation3 + $0x18] sm:$0xf0] %v2113_v22  ;;  %3817 = vmatprep.subr.bf16.mxu1 %v3816_v26  ;;  %v949_v1 = vmul.f32 %v4415_v0, %v4575_v27 }
 0x2ba   : > { %919 = vst [vmem:[#allocation5 + $0x38] sm:$0xff] %v4575_v27  ;;  %v4586_v9 = vld [vmem:[#allocation5 + $0x40] sm:$0xff]  ;;  %v894_v28 = vpop.permute.xlu1 %893 }
 0x2bb   : > { %6006 = vst [vmem:[#allocation12_spill] sm:$0xff] %v4586_v9  ;;  %v4594_v33 = vld [vmem:[#allocation5 + $0x18] sm:$0xff]  ;;  %923 = vst.msk [vmem:[#allocation5 + $0x58] sm:$0xff] %vm422_vm4, %v894_v28  ;;  %1608 = vrot.lane.b32.xlu1 %v1605_v24, %s6008_s20  ;;  %v892_v34 = vpop.permute.xlu0 %891 }
 0x2bc   : > { %6007 = vst [vmem:[#allocation13_spill] sm:$0xff] %v4594_v33  ;;  %957 = vst [vmem:[#allocation3 + $0x28] sm:$0xff] %v949_v1  ;;  %v4604_v31 = vsel %vm422_vm4, %v892_v34, %v894_v28  ;;  %1606 = vrot.lane.b32.xlu0 %v1601_v15, %s6008_s20  ;;  %v946_v59 = vmul.f32 %v4594_v33, %v4430_v36  ;;  %v3799_v15 = vld [vmem:[%s5936_s6] sm:$0xff]  }
 0x2bd   : > { %2427 = vst.msk [vmem:[#allocation5 + $0x40] sm:$0xff] %vm678_vm1, %v4599_v39  ;;  %2134 = vst [vmem:[#allocation3 + $0x28] sm:$0xf] %v2130_v29  ;;  %v951_v40 = vmul.f32 %v4415_v0, %v4604_v31  ;;  %v3800_v20 = vunpack.c.l.bf16 %v3799_v15  ;;  %v3801_v29 = vunpack.c.h.bf16 %v3799_v15 }
 0x2be   : > { %921 = vst.msk [vmem:[#allocation5 + $0x48] sm:$0xff] %vm911_vm10, %v892_v34  ;;  %2171 = vst [vmem:[#allocation3 + $0x28] sm:$0xf0] %v2167_v30  ;;  %v3818_v45 = vpack.c.bf16 %v946_v59, %v4445_v18  ;;  %v2255_v63 = vpop.permute.xlu1 %2254  ;;  %v3807_v34 = vld [vmem:[%s5936_s6 + $0x8] sm:$0xff]  }
 0x2bf   : > { %2422 = vst [vmem:[#allocation5 + $0x18] sm:$0xff] %v4599_v39  ;;  %922 = vst [vmem:[#allocation5 + $0x50] sm:$0xff] %v4604_v31  ;;  %3167 = vrot.lane.b32.xlu1 %v3164_v35, %s6008_s20  ;;  %v3820_v17 = vpack.c.bf16 %v951_v40, %v949_v1  ;;  %v2197_v55 = vpop.permute.xlu0 %2196 }
 0x2c0   : > { %954 = vst [vmem:[#allocation3 + $0x10] sm:$0xff] %v946_v59  ;;  %v4628_v0 = vld [vmem:[#allocation5 + $0x30] sm:$0xff]  ;;  %959 = vst [vmem:[#allocation3 + $0x38] sm:$0xff] %v951_v40  ;;  %v2273_v25 = vld [vmem:[#allocation3 + $0x18] sm:$0xff]  ;;  %3165 = vrot.lane.b32.xlu0 %v3160_v37, %s6008_s20  ;;  %3819 = vmatpush1.bf16.msra.mxu1 %v3818_v45  ;;  %v2202_v53 = vsel %vm636_vm2, %v2197_v55, %v4515_v47  ;;  %v3804_v37 = vunpack.c.l.bf16 %v3807_v34 }
 0x2c1   : > { %6010 = vst [vmem:[#allocation15_spill] sm:$0xff] %v4628_v0  ;;  %2079 = vst [vmem:[#allocation3 + $0x10] sm:$0xf] %v2075_v43  ;;  %v3888_v18 = vpack.c.bf16 %v2273_v25, %v2271_v21  ;;  %v948_v32 = vmul.f32 %v4628_v0, %v4430_v36  ;;  %3821 = vmatprep.subr.bf16.mxu1 %v3820_v17  ;;  %v3805_v43 = vunpack.c.h.bf16 %v3807_v34 }
 0x2c2   : > { %2116 = vst [vmem:[#allocation3 + $0x10] sm:$0xf0] %v2112_v44  ;;  %2207 = vst [vmem:[#allocation3 + $0x38] sm:$0xf] %v2203_v48  ;;  %v4641_v52 = vld [vmem:[#allocation5 + $0x58] sm:$0xff] }
 0x2c3   : > { %2225 = vst [vmem:[#allocation3 + $0x38] sm:$0xf0] %v2221_v51  ;;  %2425 = vst [vmem:[#allocation5 + $0x30] sm:$0xff] %v4599_v39  ;;  %3889 = vmatprep.subr.bf16.mxu0 %v3888_v18  ;;  %1264 = vrot.lane.b32.xlu1 %v4437_v16, %s5997_s27  ;;  %v2253_v3 = vpop.permute.xlu0 %2252 }
 0x2c4   : > { %6011 = vst [vmem:[#allocation16_spill] sm:$0xff] %v4641_v52  ;;  %956 = vst [vmem:[#allocation3 + $0x20] sm:$0xff] %v948_v32  ;;  %1260 = vrot.lane.b32.xlu0 %v4433_v14, %s5997_s27  ;;  %v2257_v24 = vsel %vm693_vm3, %v2253_v3, %v2255_v63 }
 0x2c5   : > { %v4643_v54 = vld [vmem:[#allocation5 + $0x48] sm:$0xff]  ;;  %2133 = vst [vmem:[#allocation3 + $0x20] sm:$0xf] %v2129_v46  ;;  %2170 = vst [vmem:[#allocation3 + $0x20] sm:$0xf0] %v2166_v41 }
 0x2c6   : > { %6012 = vst [vmem:[#allocation17_spill] sm:$0xff] %v4643_v54  ;;  %2430 = vst.msk [vmem:[#allocation5 + $0x58] sm:$0xff] %vm678_vm1, %v4599_v39  ;;  %v950_v42 = vmul.f32 %v4643_v54, %v4430_v36  ;;  %v2275_v58 = vld [vmem:[#allocation3 + $0x28] sm:$0xff] }
 0x2c7   : > { %2428 = vst [vmem:[#allocation5 + $0x48] sm:$0xff] %v4599_v39  ;;  %1540 = vrot.lane.b32.xlu1 %v4437_v16, %s6000_s14  ;;  %v2251_v10 = vpop.permute.xlu0 %2250 }
 0x2c8   : > { %958 = vst [vmem:[#allocation3 + $0x30] sm:$0xff] %v950_v42  ;;  %v3822_v56 = vpack.c.bf16 %v950_v42, %v948_v32  ;;  %1536 = vrot.lane.b32.xlu0 %v4433_v14, %s6000_s14  ;;  %v2256_v26 = vsel %vm693_vm3, %v2251_v10, %v2253_v3 }
 0x2c9   : > { %v2272_v50 = vld [vmem:[#allocation3 + $0x10] sm:$0xff]  ;;  %2224 = vst [vmem:[#allocation3 + $0x30] sm:$0xf0] %v2220_v38  ;;  %2206 = vst [vmem:[#allocation3 + $0x30] sm:$0xf] %v2202_v53 }
 0x2ca   : > { %v3890_v36 = vpack.c.bf16 %v2272_v50, %v2270_v57  ;;  %v2277_v60 = vld [vmem:[#allocation3 + $0x38] sm:$0xff]  ;;  %3823 = vmatpush1.bf16.msra.mxu1 %v3822_v56 }
 0x2cb   : > { %v3892_v49 = vpack.c.bf16 %v2277_v60, %v2275_v58 }
 0x2cc   : > { %3891 = vmatpush1.bf16.msra.mxu0 %v3890_v36  ;;  %v2274_v61 = vld [vmem:[#allocation3 + $0x20] sm:$0xff] }
 0x2cd   : > { %3893 = vmatprep.subr.bf16.mxu0 %v3892_v49 }
 0x2cf   : > { %v4663_v5 = vpop.permute.xlu1 %2286 }
 0x2d0   : > { %v2276_v47 = vld [vmem:[#allocation3 + $0x30] sm:$0xff] }
 0x2d1   : > { %v3894_v62 = vpack.c.bf16 %v2276_v47, %v2274_v61 }
 0x2d3   : > { %3895 = vmatpush1.bf16.msra.mxu0 %v3894_v62 }
 0x301   : > { %v985_v11 = vpop.permute.xlu1 %984 }
 0x302   : > { %v989_v13 = vpop.permute.xlu0 %988 }
 0x305   : > { %v987_v19 = vpop.permute.xlu1 %986 }
 0x306   : > { %v4666_v22 = vsel %vm463_vm11, %v985_v11, %v987_v19  ;;  %v4669_v23 = vsel %vm463_vm11, %v987_v19, %v989_v13 }
 0x307   : > { %1024 = vst [vmem:[#allocation3 + $0x40] sm:$0xff] %v4666_v22  ;;  %1025 = vst [vmem:[#allocation3 + $0x48] sm:$0xff] %v4669_v23 }
 0x308   : > { %2260 = vst [vmem:[#allocation3 + $0x40] sm:$0xf] %v2256_v26  ;;  %2261 = vst [vmem:[#allocation3 + $0x48] sm:$0xf] %v2257_v24 }
 0x30f   : > { %v2279_v1 = vld [vmem:[#allocation3 + $0x48] sm:$0xf]  ;;  %v2278_v28 = vld [vmem:[#allocation3 + $0x40] sm:$0xf] }
 0x310   : > { %3772 = vmatprep.subr.msk.mxu0 %vm755_vm5, %v2279_v1 }
 0x311   : > { %3773 = vmatpush1.msk.msra.mxu0 %vm755_vm5, %v2278_v28  ;;  %vm6017_vm5 = vcmask 261120  }
 0x312   : > { %3774 = vmatmul.mubr.msk.f32.vlgmr.msra.gmra.mrb[0].mxu0 %vm742_vm6, %v3800_v20 }
 0x313   : > { %v4681_v30 = vpop.permute.xlu0 %2291  ;;  %2392 = vmatprep.mubr.f32.mxu0 %v4599_v39 }
 0x316   : > { %v4687_v35 = vpop.permute.xlu1 %2296  ;;  %3775 = vmatmul.mubr.msk.f32.gmra.mrb[2].mxu0 %vm742_vm6, %v3801_v29 }
 0x317   : > { %v4690_v59 = vpop.permute.xlu0 %2301  ;;  %2398 = vmatprep.mubr.f32.mxu0 %v4599_v39 }
 0x31a   : > { %v4693_v40 = vpop.permute.xlu1 %1054  ;;  %3776 = vmatmul.mubr.msk.f32.gmra.mrb[4].mxu0 %vm742_vm6, %v3804_v37 }
 0x31b   : > { %v4696_v44 = vpop.permute.xlu0 %1056  ;;  %v1062_v45 = vmul.f32 %v4433_v14, %v4693_v40  ;;  %2404 = vmatprep.mubr.f32.mxu0 %v4599_v39  ;;  %v1065_v10 = vmul.f32 %v4594_v33, %v4693_v40  ;;  %v1068_v37 = vmul.f32 %v4628_v0, %v4693_v40 }
 0x31c   : > { %v1064_v48 = vmul.f32 %v4437_v16, %v4696_v44  ;;  %v4749_v58 = vsel %vm487_vm8, %v4693_v40, %v4696_v44  ;;  %v1067_v26 = vmul.f32 %v4559_v12, %v4696_v44 }
 0x31d   : > { %1086 = vrot.lane.b32.xlu0 %v1062_v45, %s5995_s16  ;;  %v1063_v60 = vmul.f32 %v4749_v58, %v4420_v8  ;;  %v1066_v13 = vmul.f32 %v4749_v58, %v4548_v4 }
 0x31e   : > { %v4704_v51 = vpop.permute.xlu1 %1156  ;;  %1090 = vrot.lane.b32.xlu1 %v1064_v48, %s5995_s16  ;;  %3777 = vmatmul.mubr.msk.f32.gmra.mrb[6].mxu0 %vm742_vm6, %v3805_v43  ;;  %v1070_v48 = vmul.f32 %v4586_v9, %v4696_v44 }
 0x31f   : > { %v4708_v17 = vpop.permute.xlu0 %1158  ;;  %v1164_v21 = vmul.f32 %v4433_v14, %v4704_v51  ;;  %v1170_v45 = vmul.f32 %v4628_v0, %v4704_v51 }
 0x320   : > { %v1166_v25 = vmul.f32 %v4437_v16, %v4708_v17  ;;  %v4760_v49 = vsel %vm525_vm7, %v4704_v51, %v4708_v17  ;;  %v1169_v15 = vmul.f32 %v4559_v12, %v4708_v17 }
 0x321   : > { %1188 = vrot.lane.b32.xlu0 %v1164_v21, %s5996_s18  ;;  %v1165_v61 = vmul.f32 %v4760_v49, %v4420_v8  ;;  %v1168_v24 = vmul.f32 %v4760_v49, %v4548_v4 }
 0x322   : > { %v4715_v18 = vpop.permute.xlu1 %2613  ;;  %1192 = vrot.lane.b32.xlu1 %v1166_v25, %s5996_s18 }
 0x323   : > { %6013 = vst [vmem:[#allocation18_spill] sm:$0xff] %v4715_v18  ;;  %v4718_v32 = vpop.permute.xlu0 %2615 }
 0x324   : > { %6014 = vst [vmem:[#allocation19_spill] sm:$0xff] %v4718_v32 }
 0x325   : > { %1262 = vrot.lane.b32.xlu0 %v4420_v8, %s5997_s27 }
 0x326   : > { %v4722_v41 = vpop.permute.xlu1 %2715 }
 0x327   : > { %6015 = vst [vmem:[#allocation20_spill] sm:$0xff] %v4722_v41  ;;  %v4724_v46 = vpop.permute.xlu0 %2717 }
 0x328   : > { %6016 = vst [vmem:[#allocation21_spill] sm:$0xff] %v4724_v46 }
 0x32a   : > { %v4726_v55 = vpop.permute.xlu1 %1330 }
 0x32b   : > { %v4728_v42 = vpop.permute.xlu0 %1332  ;;  %v1338_v38 = vmul.f32 %v4433_v14, %v4726_v55  ;;  %v1341_v11 = vmul.f32 %v4594_v33, %v4726_v55 }
 0x32c   : > { %v1340_v53 = vmul.f32 %v4437_v16, %v4728_v42  ;;  %v4770_v47 = vsel %vm582_vm9, %v4726_v55, %v4728_v42  ;;  %v1343_v1 = vmul.f32 %v4559_v12, %v4728_v42 }
 0x32d   : > { %1362 = vrot.lane.b32.xlu0 %v1338_v38, %s5998_s28  ;;  %v1339_v62 = vmul.f32 %v4770_v47, %v4420_v8  ;;  %v1342_v20 = vmul.f32 %v4770_v47, %v4548_v4  ;;  %v1172_v38 = vmul.f32 %v4586_v9, %v4708_v17 }
 0x32e   : > { %v4735_v56 = vpop.permute.xlu1 %1432  ;;  %1366 = vrot.lane.b32.xlu1 %v1340_v53, %s5998_s28 }
 0x32f   : > { %v4738_v57 = vpop.permute.xlu0 %1434  ;;  %v1440_v50 = vmul.f32 %v4433_v14, %v4735_v56  ;;  %v1443_v19 = vmul.f32 %v4594_v33, %v4735_v56 }
 0x330   : > { %v1442_v36 = vmul.f32 %v4437_v16, %v4738_v57  ;;  %v4780_v63 = vsel %vm6017_vm5, %v4735_v56, %v4738_v57  ;;  %v1445_v29 = vmul.f32 %v4559_v12, %v4738_v57 }
 0x331   : > { %1464 = vrot.lane.b32.xlu0 %v1440_v50, %s5999_s29  ;;  %v1441_v3 = vmul.f32 %v4780_v63, %v4420_v8  ;;  %v1444_v28 = vmul.f32 %v4780_v63, %v4548_v4  ;;  %v1344_v50 = vmul.f32 %v4628_v0, %v4726_v55 }
 0x332   : > { %1468 = vrot.lane.b32.xlu1 %v1442_v36, %s5999_s29  ;;  %v4852_v43 = vpop.permute.xlu1 %2889 }
 0x333   : > { %v4838_v34 = vpop.permute.xlu0 %2891  ;;  %6020 = vst [vmem:[#allocation24_spill] sm:$0xff] %v4852_v43 }
 0x334   : > { %6018 = vst [vmem:[#allocation22_spill] sm:$0xff] %v4838_v34 }
 0x335   : > { %1538 = vrot.lane.b32.xlu0 %v4420_v8, %s6000_s14  ;;  %v1167_v8 = vmul.f32 %v4594_v33, %v4704_v51 }
 0x336   : > { %990 = vrot.lane.b32.xlu1 %v4594_v33, %s4069_s13  ;;  %v4864_v25 = vpop.permute.xlu1 %2991 }
 0x337   : > { %6022 = vst [vmem:[#allocation26_spill] sm:$0xff] %v4864_v25 }
 0x339   : > { %1088 = vrot.lane.b32.xlu0 %v1063_v60, %s5995_s16  ;;  %v1346_v60 = vmul.f32 %v4586_v9, %v4728_v42 }
 0x33a   : > { %1266 = vrot.lane.b32.xlu1 %v4594_v33, %s5997_s27  ;;  %v4876_v36 = vpop.permute.xlu1 %1608 }
 0x33b   : > { %6024 = vst [vmem:[#allocation28_spill] sm:$0xff] %v4876_v36 }
 0x33d   : > { %1190 = vrot.lane.b32.xlu0 %v1165_v61, %s5996_s18  ;;  %v1446_v61 = vmul.f32 %v4628_v0, %v4735_v56 }
 0x33e   : > { %1542 = vrot.lane.b32.xlu1 %v4594_v33, %s6000_s14 }
 0x341   : > { %1364 = vrot.lane.b32.xlu0 %v1339_v62, %s5998_s28  ;;  %v1448_v62 = vmul.f32 %v4586_v9, %v4738_v57 }
 0x342   : > { %1270 = vrot.lane.b32.xlu1 %v4559_v12, %s5997_s27 }
 0x345   : > { %1466 = vrot.lane.b32.xlu0 %v1441_v3, %s5999_s29 }
 0x346   : > { %1546 = vrot.lane.b32.xlu1 %v4559_v12, %s6000_s14 }
 0x349   : > { %994 = vrot.lane.b32.xlu0 %v4559_v12, %s4069_s13 }
 0x34a   : > { %992 = vrot.lane.b32.xlu1 %v4548_v4, %s4069_s13 }
 0x34d   : > { %1268 = vrot.lane.b32.xlu0 %v4548_v4, %s5997_s27 }
 0x34e   : > { %1092 = vrot.lane.b32.xlu1 %v1065_v10, %s5995_s16  ;;  %v4889_v10 = vpop.permute.xlu1 %3167 }
 0x34f   : > { %6025 = vst [vmem:[#allocation29_spill] sm:$0xff] %v4889_v10 }
 0x351   : > { %1544 = vrot.lane.b32.xlu0 %v4548_v4, %s6000_s14  ;;  %v4848_v4 = vpop.permute.xlu0 %2993 }
 0x352   : > { %1194 = vrot.lane.b32.xlu1 %v1167_v8, %s5996_s18  ;;  %6019 = vst [vmem:[#allocation23_spill] sm:$0xff] %v4848_v4 }
 0x355   : > { %996 = vrot.lane.b32.xlu0 %v4628_v0, %s4069_s13  ;;  %v4861_v21 = vpop.permute.xlu0 %1606 }
 0x356   : > { %1368 = vrot.lane.b32.xlu1 %v1341_v11, %s5998_s28  ;;  %6021 = vst [vmem:[#allocation25_spill] sm:$0xff] %v4861_v21  ;;  %v1069_v11 = vmul.f32 %v4749_v58, %v4575_v27 }
 0x359   : > { %1094 = vrot.lane.b32.xlu0 %v1066_v13, %s5995_s16  ;;  %v4872_v53 = vpop.permute.xlu0 %3165  ;;  %v4900_v13 = vpop.permute.xlu1 %1264 }
 0x35a   : > { %1470 = vrot.lane.b32.xlu1 %v1443_v19, %s5999_s29  ;;  %6023 = vst [vmem:[#allocation27_spill] sm:$0xff] %v4872_v53 }
 0x35d   : > { %1196 = vrot.lane.b32.xlu0 %v1168_v24, %s5996_s18  ;;  %v4886_v3 = vpop.permute.xlu0 %1260  ;;  %v1171_v24 = vmul.f32 %v4760_v49, %v4575_v27 }
 0x35e   : > { %1096 = vrot.lane.b32.xlu1 %v1067_v26, %s5995_s16  ;;  %v4910_v26 = vpop.permute.xlu1 %1540 }
 0x35f   : > { %6027 = vst [vmem:[#allocation31_spill] sm:$0xff] %v4910_v26 }
 0x361   : > { %1272 = vrot.lane.b32.xlu0 %v4628_v0, %s5997_s27  ;;  %v4896_v8 = vpop.permute.xlu0 %1536 }
 0x362   : > { %1198 = vrot.lane.b32.xlu1 %v1169_v15, %s5996_s18  ;;  %6026 = vst [vmem:[#allocation30_spill] sm:$0xff] %v4896_v8  ;;  %v1345_v15 = vmul.f32 %v4770_v47, %v4575_v27 }
 0x365   : > { %1370 = vrot.lane.b32.xlu0 %v1342_v20, %s5998_s28 }
 0x366   : > { %1372 = vrot.lane.b32.xlu1 %v1343_v1, %s5998_s28 }
 0x369   : > { %1472 = vrot.lane.b32.xlu0 %v1444_v28, %s5999_s29  ;;  %v1447_v28 = vmul.f32 %v4780_v63, %v4575_v27 }
 0x36a   : > { %1474 = vrot.lane.b32.xlu1 %v1445_v29, %s5999_s29 }
 0x36d   : > { %1548 = vrot.lane.b32.xlu0 %v4628_v0, %s6000_s14 }
 0x36e   : > { %1000 = vrot.lane.b32.xlu1 %v4586_v9, %s4069_s13 }
 0x371   : > { %998 = vrot.lane.b32.xlu0 %v4575_v27, %s4069_s13 }
 0x372   : > { %1276 = vrot.lane.b32.xlu1 %v4586_v9, %s5997_s27 }
 0x375   : > { %1098 = vrot.lane.b32.xlu0 %v1068_v37, %s5995_s16 }
 0x376   : > { %1552 = vrot.lane.b32.xlu1 %v4586_v9, %s6000_s14 }
 0x379   : > { %1200 = vrot.lane.b32.xlu0 %v1170_v45, %s5996_s18 }
 0x37a   : > { %1102 = vrot.lane.b32.xlu1 %v1070_v48, %s5995_s16 }
 0x37d   : > { %1274 = vrot.lane.b32.xlu0 %v4575_v27, %s5997_s27 }
 0x37e   : > { %1204 = vrot.lane.b32.xlu1 %v1172_v38, %s5996_s18 }
 0x381   : > { %1374 = vrot.lane.b32.xlu0 %v1344_v50, %s5998_s28 }
 0x382   : > { %1378 = vrot.lane.b32.xlu1 %v1346_v60, %s5998_s28  ;;  %v1173_v60 = vmul.f32 %v4643_v54, %v4704_v51  ;;  %v1174_v51 = vmul.f32 %v4760_v49, %v4604_v31 }
 0x385   : > { %1476 = vrot.lane.b32.xlu0 %v1446_v61, %s5999_s29 }
 0x386   : > { %1480 = vrot.lane.b32.xlu1 %v1448_v62, %s5999_s29 }
 0x389   : > { %1550 = vrot.lane.b32.xlu0 %v4575_v27, %s6000_s14  ;;  %v1071_v27 = vmul.f32 %v4643_v54, %v4693_v40  ;;  %v1072_v40 = vmul.f32 %v4749_v58, %v4604_v31 }
 0x38a   : > { %1002 = vrot.lane.b32.xlu1 %v4643_v54, %s4069_s13 }
 0x38d   : > { %1100 = vrot.lane.b32.xlu0 %v1069_v11, %s5995_s16  ;;  %v1347_v11 = vmul.f32 %v4643_v54, %v4726_v55  ;;  %v1348_v55 = vmul.f32 %v4770_v47, %v4604_v31 }
 0x38e   : > { %1278 = vrot.lane.b32.xlu1 %v4643_v54, %s5997_s27 }
 0x38f   : > { %v4905_v19 = vpop.permute.xlu0 %1086 }
 0x390   : > { %v4919_v1 = vpop.permute.xlu1 %1090 }
 0x391   : > { %1202 = vrot.lane.b32.xlu0 %v1171_v24, %s5996_s18 }
 0x392   : > { %1554 = vrot.lane.b32.xlu1 %v4643_v54, %s6000_s14 }
 0x393   : > { %v4916_v20 = vpop.permute.xlu0 %1188 }
 0x394   : > { %v4930_v37 = vpop.permute.xlu1 %1192 }
 0x395   : > { %1376 = vrot.lane.b32.xlu0 %v1345_v15, %s5998_s28 }
 0x396   : > { %1006 = vrot.lane.b32.xlu1 %v4641_v52, %s4069_s13 }
 0x397   : > { %v4928_v29 = vpop.permute.xlu0 %1262 }
 0x399   : > { %1478 = vrot.lane.b32.xlu0 %v1447_v28, %s5999_s29  ;;  %v1449_v28 = vmul.f32 %v4643_v54, %v4735_v56  ;;  %v1450_v56 = vmul.f32 %v4780_v63, %v4604_v31  ;;  %v1451_v63 = vmul.f32 %v4641_v52, %v4738_v57 }
 0x39a   : > { %1282 = vrot.lane.b32.xlu1 %v4641_v52, %s5997_s27 }
 0x39d   : > { %1004 = vrot.lane.b32.xlu0 %v4604_v31, %s4069_s13 }
 0x39e   : > { %1558 = vrot.lane.b32.xlu1 %v4641_v52, %s6000_s14 }
 0x39f   : > { %v4936_v45 = vpop.permute.xlu0 %1362 }
 0x3a0   : > { %v4938_v48 = vpop.permute.xlu1 %1366 }
 0x3a1   : > { %1280 = vrot.lane.b32.xlu0 %v4604_v31, %s5997_s27 }
 0x3a2   : > { %1104 = vrot.lane.b32.xlu1 %v1071_v27, %s5995_s16 }
 0x3a3   : > { %v4945_v38 = vpop.permute.xlu0 %1464 }
 0x3a4   : > { %v4947_v50 = vpop.permute.xlu1 %1468 }
 0x3a5   : > { %1556 = vrot.lane.b32.xlu0 %v4604_v31, %s6000_s14 }
 0x3a6   : > { %1206 = vrot.lane.b32.xlu1 %v1173_v60, %s5996_s18  ;;  %v1073_v60 = vmul.f32 %v4641_v52, %v4696_v44 }
 0x3a7   : > { %v4954_v61 = vpop.permute.xlu0 %1538 }
 0x3a8   : > { %6028 = vst [vmem:[#allocation32_spill] sm:$0xff] %v4954_v61  ;;  %v991_v62 = vpop.permute.xlu1 %990 }
 0x3a9   : > { %1106 = vrot.lane.b32.xlu0 %v1072_v40, %s5995_s16 }
 0x3aa   : > { %1380 = vrot.lane.b32.xlu1 %v1347_v11, %s5998_s28  ;;  %v1175_v11 = vmul.f32 %v4641_v52, %v4708_v17 }
 0x3ab   : > { %v4962_v24 = vpop.permute.xlu0 %1088 }
 0x3ac   : > { %v4966_v15 = vpop.permute.xlu1 %1266  ;;  %v1111_v26 = vsel %vm502_vm15, %v4962_v24, %v4919_v1 }
 0x3ad   : > { %1208 = vrot.lane.b32.xlu0 %v1174_v51, %s5996_s18  ;;  %v1349_v51 = vmul.f32 %v4641_v52, %v4728_v42 }
 0x3ae   : > { %1482 = vrot.lane.b32.xlu1 %v1449_v28, %s5999_s29 }
 0x3af   : > { %v4972_v58 = vpop.permute.xlu0 %1190 }
 0x3b0   : > { %v4976_v27 = vpop.permute.xlu1 %1542 }
 0x3b1   : > { %6029 = vst [vmem:[#allocation33_spill] sm:$0xff] %v4976_v27  ;;  %1382 = vrot.lane.b32.xlu0 %v1348_v55, %s5998_s28 }
 0x3b2   : > { %1108 = vrot.lane.b32.xlu1 %v1073_v60, %s5995_s16 }
 0x3b3   : > { %v4982_v49 = vpop.permute.xlu0 %1364 }
 0x3b4   : > { %v4986_v40 = vpop.permute.xlu1 %1270 }
 0x3b5   : > { %1484 = vrot.lane.b32.xlu0 %v1450_v56, %s5999_s29 }
 0x3b6   : > { %1210 = vrot.lane.b32.xlu1 %v1175_v11, %s5996_s18 }
 0x3b7   : > { %v4992_v47 = vpop.permute.xlu0 %1466 }
 0x3b8   : > { %v4994_v44 = vpop.permute.xlu1 %1546 }
 0x3ba   : > { %1384 = vrot.lane.b32.xlu1 %v1349_v51, %s5998_s28 }
 0x3bb   : > { %v995_v28 = vpop.permute.xlu0 %994 }
 0x3bc   : > { %v993_v31 = vpop.permute.xlu1 %992 }
 0x3bd   : > { %v1010_v17 = vsel %vm463_vm11, %v991_v62, %v993_v31  ;;  %v1011_v55 = vsel %vm463_vm11, %v993_v31, %v995_v28 }
 0x3be   : > { %1486 = vrot.lane.b32.xlu1 %v1451_v63, %s5999_s29  ;;  %v3824_v60 = vpack.c.bf16 %v1011_v55, %v4669_v23  ;;  %v3826_v56 = vpack.c.bf16 %v1010_v17, %v4666_v22 }
 0x3bf   : > { %v5006_v11 = vpop.permute.xlu0 %1268 }
 0x3c0   : > { %v5008_v42 = vpop.permute.xlu1 %1092  ;;  %3825 = vmatprep.subr.bf16.mxu1 %v3824_v60 }
 0x3c1   : > { %3827 = vmatpush1.bf16.msra.mxu1 %v3826_v56 }
 0x3c3   : > { %v5010_v51 = vpop.permute.xlu0 %1544 }
 0x3c4   : > { %v5012_v2 = vpop.permute.xlu1 %1194 }
 0x3c7   : > { %v5014_v57 = vpop.permute.xlu0 %996 }
 0x3c8   : > { %v5016_v62 = vpop.permute.xlu1 %1368 }
 0x3cb   : > { %v5018_v28 = vpop.permute.xlu0 %1094 }
 0x3cc   : > { %v5020_v31 = vpop.permute.xlu1 %1470 }
 0x3cf   : > { %v5022_v23 = vpop.permute.xlu0 %1196 }
 0x3d0   : > { %v5024_v22 = vpop.permute.xlu1 %1096 }
 0x3d3   : > { %v5026_v63 = vpop.permute.xlu0 %1272 }
 0x3d4   : > { %v5028_v17 = vpop.permute.xlu1 %1198 }
 0x3d7   : > { %v5030_v55 = vpop.permute.xlu0 %1370 }
 0x3d8   : > { %v5032_v60 = vpop.permute.xlu1 %1372 }
 0x3db   : > { %v5034_v56 = vpop.permute.xlu0 %1472 }
 0x3dc   : > { %v5036_v39 = vpop.permute.xlu1 %1474 }
 0x3df   : > { %v5038_v53 = vpop.permute.xlu0 %1548 }
 0x3e0   : > { %6030 = vst [vmem:[#allocation34_spill] sm:$0xff] %v5038_v53  ;;  %v1001_v10 = vpop.permute.xlu1 %1000 }
 0x3e3   : > { %v999_v54 = vpop.permute.xlu0 %998 }
 0x3e4   : > { %v5040_v0 = vpop.permute.xlu1 %1276  ;;  %v1012_v53 = vsel %vm463_vm11, %v5014_v57, %v999_v54 }
 0x3e5   : > { %v2388_v52 = vpop.f32.mrb[0].mxu0 }
 0x3e6   : > { %v2389_v9 = vadd.f32 %v2388_v52, %v4663_v5  ;;  %v2390_v33 = vpop.f32.mrb[1].mxu0 }
 0x3e7   : > { %v5043_v12 = vpop.permute.xlu0 %1098  ;;  %v2391_v16 = vadd.f32 %v2390_v33, %v4663_v5 }
 0x3e8   : > { %v5046_v14 = vpop.permute.xlu1 %1552  ;;  %v2411_v21 = vmax.f32 %v2389_v9, 0.0 }
 0x3e9   : > { %6031 = vst [vmem:[#allocation35_spill] sm:$0xff] %v5046_v14  ;;  %v2412_v36 = vmax.f32 %v2391_v16, 0.0  ;;  %v2394_v25 = vpop.f32.mrb[2].mxu0 }
 0x3ea   : > { %v2395_v43 = vadd.f32 %v2394_v25, %v4681_v30  ;;  %v2396_v4 = vpop.f32.mrb[3].mxu0  ;;  %2439 = vrot.lane.b32.xlu1 %v2411_v21, %s6032_s23 }
 0x3eb   : > { %v5050_v34 = vpop.permute.xlu0 %1200  ;;  %v2397_v41 = vadd.f32 %v2396_v4, %v4681_v30  ;;  %2441 = vrot.lane.b32.xlu0 %v2412_v36, %s6032_s23 }
 0x3ec   : > { %v5054_v52 = vpop.permute.xlu1 %1102  ;;  %v2413_v46 = vmax.f32 %v2395_v43, 0.0 }
 0x3ed   : > { %v2414_v33 = vmax.f32 %v2397_v41, 0.0  ;;  %v2400_v5 = vpop.f32.mrb[4].mxu0 }
 0x3ee   : > { %v2401_v9 = vadd.f32 %v2400_v5, %v4687_v35  ;;  %v2402_v16 = vpop.f32.mrb[5].mxu0  ;;  %2443 = vrot.lane.b32.xlu1 %v2413_v46, %s6032_s23 }
 0x3ef   : > { %v5058_v25 = vpop.permute.xlu0 %1274  ;;  %v2403_v21 = vadd.f32 %v2402_v16, %v4687_v35  ;;  %2445 = vrot.lane.b32.xlu0 %v2414_v33, %s6032_s23 }
 0x3f0   : > { %v5062_v18 = vpop.permute.xlu1 %1204  ;;  %v2415_v30 = vmax.f32 %v2401_v9, 0.0 }
 0x3f1   : > { %v2416_v4 = vmax.f32 %v2403_v21, 0.0  ;;  %v2406_v36 = vpop.f32.mrb[6].mxu0 }
 0x3f2   : > { %v2407_v43 = vadd.f32 %v2406_v36, %v4690_v59  ;;  %v2408_v41 = vpop.f32.mrb[7].mxu0  ;;  %2447 = vrot.lane.b32.xlu1 %v2415_v30, %s6032_s23 }
 0x3f3   : > { %v5066_v5 = vpop.permute.xlu0 %1374  ;;  %v2409_v46 = vadd.f32 %v2408_v41, %v4690_v59  ;;  %2449 = vrot.lane.b32.xlu0 %v2416_v4, %s6032_s23 }
 0x3f4   : > { %v5070_v32 = vpop.permute.xlu1 %1378  ;;  %v2417_v35 = vmax.f32 %v2407_v43, 0.0 }
 0x3f5   : > { %v2418_v33 = vmax.f32 %v2409_v46, 0.0 }
 0x3f6   : > { %2451 = vrot.lane.b32.xlu1 %v2417_v35, %s6032_s23 }
 0x3f7   : > { %v5073_v9 = vpop.permute.xlu0 %1476  ;;  %2453 = vrot.lane.b32.xlu0 %v2418_v33, %s6032_s23  ;;  %v1113_v33 = vsel %vm502_vm15, %v5018_v28, %v5024_v22  ;;  %v1112_v22 = vsel %vm502_vm15, %v5008_v42, %v5018_v28  ;;  %s3789_s23 = sshll.u32 %s6086_s22, 4 }
 0x3f8   : > { %6033 = vst [vmem:[#allocation36_spill] sm:$0xff] %v5073_v9  ;;  %v5076_v16 = vpop.permute.xlu1 %1480  ;;  %v3832_v57 = vpack.c.bf16 %v1113_v33, %v1111_v26 }
 0x3fb   : > { %v5078_v21 = vpop.permute.xlu0 %1550 }
 0x3fc   : > { %6034 = vst [vmem:[#allocation37_spill] sm:$0xff] %v5078_v21  ;;  %v1003_v30 = vpop.permute.xlu1 %1002  ;;  %v1013_v21 = vsel %vm463_vm11, %v999_v54, %v1001_v10 }
 0x3ff   : > { %v1101_v36 = vpop.permute.xlu0 %1100 }
 0x400   : > { %v5080_v6 = vpop.permute.xlu1 %1278  ;;  %v1114_v42 = vsel %vm502_vm15, %v5043_v12, %v1101_v36  ;;  %v1212_v12 = vsel %vm541_vm0, %v4916_v20, %v4972_v58  ;;  %v1285_v20 = vsel %vm559_vm13, %v4928_v29, %v4900_v13 }
 0x403   : > { %v1203_v59 = vpop.permute.xlu0 %1202 }
 0x404   : > { %v5082_v4 = vpop.permute.xlu1 %1554 }
 0x405   : > { %6035 = vst [vmem:[#allocation38_spill] sm:$0xff] %v5082_v4 }
 0x407   : > { %v5084_v41 = vpop.permute.xlu0 %1376 }
 0x408   : > { %v1007_v43 = vpop.permute.xlu1 %1006 }
 0x40b   : > { %v5086_v46 = vpop.permute.xlu0 %1478 }
 0x40c   : > { %v1283_v35 = vpop.permute.xlu1 %1282 }
 0x40f   : > { %v1005_v7 = vpop.permute.xlu0 %1004 }
 0x410   : > { %v1014_v14 = vsel %vm463_vm11, %v1003_v30, %v1005_v7  ;;  %v1015_v4 = vsel %vm463_vm11, %v1005_v7, %v1007_v43  ;;  %v5096_v8 = vpop.permute.xlu1 %1558  ;;  %v1110_v7 = vsel %vm502_vm15, %v4905_v19, %v4962_v24  ;;  %v1115_v19 = vsel %vm502_vm15, %v1101_v36, %v5054_v52 }
 0x411   : > { %v3828_v27 = vpack.c.bf16 %v1015_v4, %v1013_v21  ;;  %v3830_v61 = vpack.c.bf16 %v1014_v14, %v1012_v53  ;;  %v3834_v10 = vpack.c.bf16 %v1112_v22, %v1110_v7  ;;  %v1213_v4 = vsel %vm541_vm0, %v4972_v58, %v4930_v37 }
 0x412   : > { %v1217_v37 = vsel %vm541_vm0, %v1203_v59, %v5062_v18  ;;  %v1286_v18 = vsel %vm559_vm13, %v4966_v15, %v5006_v11  ;;  %v1389_v15 = vsel %vm598_vm14, %v5030_v55, %v5032_v60 }
 0x413   : > { %3829 = vmatprep.subr.bf16.mxu1 %v3828_v27  ;;  %v1281_v54 = vpop.permute.xlu0 %1280 }
 0x414   : > { %v1105_v9 = vpop.permute.xlu1 %1104  ;;  %3831 = vmatpush1.bf16.msra.mxu1 %v3830_v61  ;;  %v1215_v61 = vsel %vm541_vm0, %v5022_v23, %v5028_v17  ;;  %v1290_v13 = vsel %vm559_vm13, %v5080_v6, %v1281_v54  ;;  %v1388_v6 = vsel %vm598_vm14, %v5016_v62, %v5030_v55  ;;  %v1491_v62 = vsel %vm636_vm2, %v5034_v56, %v5036_v39 }
 0x415   : > { %3833 = vmatprep.subr.bf16.mxu1 %v3832_v57  ;;  %v3840_v22 = vpack.c.bf16 %v1215_v61, %v1213_v4  ;;  %v1390_v55 = vsel %vm598_vm14, %v5066_v5, %v5084_v41  ;;  %v1488_v5 = vsel %vm636_vm2, %v4945_v38, %v4992_v47  ;;  %v6037_v38 = vld [vmem:[#allocation31_spill] sm:$0xff] }
 0x417   : > { %v5107_v53 = vpop.permute.xlu0 %1556 }
 0x418   : > { %v1207_v14 = vpop.permute.xlu1 %1206  ;;  %3835 = vmatpush1.bf16.msra.mxu1 %v3834_v10 }
 0x41b   : > { %v1107_v30 = vpop.permute.xlu0 %1106 }
 0x41c   : > { %v1381_v1 = vpop.permute.xlu1 %1380  ;;  %v1116_v27 = vsel %vm502_vm15, %v1105_v9, %v1107_v30  ;;  %v1214_v9 = vsel %vm541_vm0, %v5012_v2, %v5022_v23  ;;  %v1287_v2 = vsel %vm559_vm13, %v5006_v11, %v4986_v40  ;;  %v1216_v23 = vsel %vm541_vm0, %v5050_v34, %v1203_v59 }
 0x41d   : > { %v3838_v43 = vpack.c.bf16 %v1116_v27, %v1114_v42  ;;  %v3842_v36 = vpack.c.bf16 %v1214_v9, %v1212_v12  ;;  %v3848_v10 = vpack.c.bf16 %v1287_v2, %v1285_v20  ;;  %v1284_v40 = vsel %vm559_vm13, %v4886_v3, %v4928_v29  ;;  %v2491_v2 = vld [vmem:[%s5931_s1] ss:$4 sm:$0x3] }
 0x41e   : > { %v1289_v34 = vsel %vm559_vm13, %v5058_v25, %v5040_v0  ;;  %v3850_v59 = vpack.c.bf16 %v1286_v18, %v1284_v40  ;;  %v1288_v11 = vsel %vm559_vm13, %v5026_v63, %v5058_v25  ;;  %v1387_v0 = vsel %vm598_vm14, %v4982_v49, %v4938_v48 }
 0x41f   : > { %v1209_v33 = vpop.permute.xlu0 %1208  ;;  %v3854_v29 = vpack.c.bf16 %v1290_v13, %v1288_v11  ;;  %v1386_v63 = vsel %vm598_vm14, %v4936_v45, %v4982_v49  ;;  %v1391_v25 = vsel %vm598_vm14, %v5084_v41, %v5070_v32  ;;  %v1489_v45 = vsel %vm636_vm2, %v4992_v47, %v4947_v50  ;;  %v6038_v47 = vld [vmem:[#allocation32_spill] sm:$0xff] }
 0x420   : > { %v5109_v21 = vpop.permute.xlu1 %1482  ;;  %v1218_v57 = vsel %vm541_vm0, %v1207_v14, %v1209_v33  ;;  %v1291_v14 = vsel %vm559_vm13, %v1281_v54, %v1283_v35  ;;  %v3856_v54 = vpack.c.bf16 %v1389_v15, %v1387_v0  ;;  %v3858_v48 = vpack.c.bf16 %v1388_v6, %v1386_v63 }
 0x421   : > { %v3846_v58 = vpack.c.bf16 %v1218_v57, %v1216_v23  ;;  %v1490_v49 = vsel %vm636_vm2, %v5020_v31, %v5034_v56  ;;  %v1493_v41 = vsel %vm636_vm2, %v5086_v46, %v5076_v16  ;;  %v1563_v31 = vsel %vm655_vm12, %v5010_v51, %v4994_v44  ;;  %v6036_v56 = vld [vmem:[#allocation36_spill] sm:$0xff]  ;;  %v6044_v57 = vld [vmem:[#allocation34_spill] sm:$0xff] }
 0x422   : > { %v3866_v50 = vpack.c.bf16 %v1490_v49, %v1488_v5  ;;  %v1561_v4 = vsel %vm655_vm12, %v6038_v47, %v6037_v38  ;;  %v1567_v44 = vsel %vm655_vm12, %v5107_v53, %v5096_v8  ;;  %v6045_v23 = vld [vmem:[#allocation8_spill] sm:$0xff]  ;;  %v6047_v5 = vld [vmem:[#allocation19_spill] sm:$0xff] }
 0x423   : > { %v1383_v35 = vpop.permute.xlu0 %1382  ;;  %v3872_v9 = vpack.c.bf16 %v1563_v31, %v1561_v4  ;;  %v2500_v20 = vrot.slane %v2491_v2, %v6045_v23  ;;  %v6050_v38 = vld [vmem:[#allocation20_spill] sm:$0xff]  ;;  %v6051_v4 = vld [vmem:[#allocation22_spill] sm:$0xff] }
 0x424   : > { %v1109_v26 = vpop.permute.xlu1 %1108  ;;  %v1392_v27 = vsel %vm598_vm14, %v1381_v1, %v1383_v35 }
 0x425   : > { %v1117_v24 = vsel %vm502_vm15, %v1107_v30, %v1109_v26  ;;  %v3852_v30 = vpack.c.bf16 %v1291_v14, %v1289_v34  ;;  %v3862_v32 = vpack.c.bf16 %v1392_v27, %v1390_v55  ;;  %v6046_v34 = vld [vmem:[#allocation7_spill] sm:$0xff]  ;;  %v5268_v55 = vld [vmem:[#allocation5 + $0x50] sm:$0xff] }
 0x426   : > { %v3836_v28 = vpack.c.bf16 %v1117_v24, %v1115_v19  ;;  %v3864_v19 = vpack.c.bf16 %v1491_v62, %v1489_v45 }
 0x427   : > { %v1485_v1 = vpop.permute.xlu0 %1484 }
 0x428   : > { %v1211_v17 = vpop.permute.xlu1 %1210  ;;  %3837 = vmatprep.subr.bf16.mxu1 %v3836_v28  ;;  %v1494_v24 = vsel %vm636_vm2, %v5109_v21, %v1485_v1  ;;  %v1492_v28 = vsel %vm636_vm2, %v6036_v56, %v5086_v46  ;;  %v6049_v56 = vld [vmem:[#allocation21_spill] sm:$0xff] }
 0x429   : > { %v1219_v52 = vsel %vm541_vm0, %v1209_v33, %v1211_v17  ;;  %3839 = vmatpush1.bf16.msra.mxu1 %v3838_v43  ;;  %v3870_v16 = vpack.c.bf16 %v1494_v24, %v1492_v28  ;;  %v6039_v43 = vld [vmem:[#allocation33_spill] sm:$0xff]  ;;  %v6040_v33 = vld [vmem:[#allocation30_spill] sm:$0xff]  ;;  %v6041_v17 = vld [vmem:[#allocation35_spill] sm:$0xff] }
 0x42a   : > { %3841 = vmatprep.subr.bf16.mxu1 %v3840_v22  ;;  %v3844_v7 = vpack.c.bf16 %v1219_v52, %v1217_v37  ;;  %v1562_v21 = vsel %vm655_vm12, %v6039_v43, %v5010_v51  ;;  %v1560_v46 = vsel %vm655_vm12, %v6040_v33, %v6038_v47  ;;  %v6042_v22 = vld [vmem:[#allocation37_spill] sm:$0xff]  ;;  %v6043_v37 = vld [vmem:[#allocation38_spill] sm:$0xff]  ;;  %v6052_v43 = vld [vmem:[#allocation23_spill] sm:$0xff] }
 0x42b   : > { %v1565_v52 = vsel %vm655_vm12, %v6042_v22, %v6041_v17  ;;  %v3874_v12 = vpack.c.bf16 %v1562_v21, %v1560_v46  ;;  %v1566_v51 = vsel %vm655_vm12, %v6043_v37, %v5107_v53  ;;  %v1564_v8 = vsel %vm655_vm12, %v6044_v57, %v6042_v22  ;;  %v5226_v53 = vld [vmem:[#allocation5 + $0x8] sm:$0xff]  ;;  %v6048_v24 = vld [vmem:[#allocation18_spill] sm:$0xff] }
 0x42c   : > { %v1385_v3 = vpop.permute.xlu1 %1384  ;;  %v6054_v33 = vld [vmem:[#allocation26_spill] sm:$0xff]  ;;  %v5327_v17 = vsel %vm487_vm8, %v6048_v24, %v6047_v5 }
 0x42d   : > { %3843 = vmatpush1.bf16.msra.mxu1 %v3842_v36  ;;  %v1393_v60 = vsel %vm598_vm14, %v1383_v35, %v1385_v3  ;;  %v3876_v36 = vpack.c.bf16 %v1567_v44, %v1565_v52 }
 0x42e   : > { %3845 = vmatprep.subr.bf16.mxu1 %v3844_v7  ;;  %v3860_v26 = vpack.c.bf16 %v1393_v60, %v1391_v25  ;;  %v3878_v7 = vpack.c.bf16 %v1566_v51, %v1564_v8  ;;  %v5252_v60 = vld [vmem:[#allocation5 + $0x38] sm:$0xff] }
 0x430   : > { %v1487_v61 = vpop.permute.xlu1 %1486 }
 0x431   : > { %3847 = vmatpush1.bf16.msra.mxu1 %v3846_v58  ;;  %v1495_v39 = vsel %vm636_vm2, %v1485_v1, %v1487_v61 }
 0x432   : > { %3849 = vmatprep.subr.bf16.mxu1 %v3848_v10  ;;  %v3868_v42 = vpack.c.bf16 %v1495_v39, %v1493_v41 }
 0x435   : > { %3851 = vmatpush1.bf16.msra.mxu1 %v3850_v59  ;;  %v2496_v59 = vrot.slane %v2491_v2, %v6046_v34 }
 0x436   : > { %3853 = vmatprep.subr.bf16.mxu1 %v3852_v30  ;;  %v5236_v30 = vld [vmem:[#allocation5 + $0x20] sm:$0xff] }
 0x439   : > { %3855 = vmatpush1.bf16.msra.mxu1 %v3854_v29 }
 0x43a   : > { %3857 = vmatprep.subr.bf16.mxu1 %v3856_v54 }
 0x43d   : > { %3859 = vmatpush1.bf16.msra.mxu1 %v3858_v48 }
 0x43e   : > { %3861 = vmatprep.subr.bf16.mxu1 %v3860_v26 }
 0x441   : > { %3863 = vmatpush1.bf16.msra.mxu1 %v3862_v32 }
 0x442   : > { %3865 = vmatprep.subr.bf16.mxu1 %v3864_v19 }
 0x445   : > { %3867 = vmatpush1.bf16.msra.mxu1 %v3866_v50 }
 0x446   : > { %3869 = vmatprep.subr.bf16.mxu1 %v3868_v42 }
 0x449   : > { %3871 = vmatpush1.bf16.msra.mxu1 %v3870_v16 }
 0x44a   : > { %3873 = vmatprep.subr.bf16.mxu1 %v3872_v9  ;;  %v6053_v9 = vld [vmem:[#allocation24_spill] sm:$0xff] }
 0x44b   : > { %v5349_v51 = vsel %vm582_vm9, %v6053_v9, %v6051_v4 }
 0x44d   : > { %3875 = vmatpush1.bf16.msra.mxu1 %v3874_v12  ;;  %v5339_v12 = vsel %vm525_vm7, %v6050_v38, %v6049_v56 }
 0x44e   : > { %3877 = vmatprep.subr.bf16.mxu1 %v3876_v36 }
 0x451   : > { %3879 = vmatpush1.bf16.msra.mxu1 %v3878_v7 }
 0x45c   : > { %v2440_v58 = vpop.permute.xlu1 %2439 }
 0x45d   : > { %2471 = vst.msk [vmem:[#allocation5] sm:$0xff] %vm911_vm10, %v2440_v58  ;;  %v2442_v18 = vpop.permute.xlu0 %2441 }
 0x45e   : > { %v5229_v10 = vsel %vm422_vm4, %v2440_v58, %v2442_v18  ;;  %2473 = vst.msk [vmem:[#allocation5 + $0x10] sm:$0xff] %vm422_vm4, %v2442_v18 }
 0x45f   : > { %2472 = vst [vmem:[#allocation5 + $0x8] sm:$0xff] %v5229_v10  ;;  %v2504_v14 = vmul.f32 %v2500_v20, %v5229_v10  ;;  %v2622_v22 = vmul.f32 %v5327_v17, %v5229_v10  ;;  %v2724_v37 = vmul.f32 %v5339_v12, %v5229_v10  ;;  %v2898_v36 = vmul.f32 %v5349_v51, %v5229_v10 }
 0x460   : > { %v2444_v40 = vpop.permute.xlu1 %2443 }
 0x461   : > { %2512 = vst [vmem:[#allocation3 + $0x8] sm:$0xff] %v2504_v14  ;;  %2474 = vst.msk [vmem:[#allocation5 + $0x18] sm:$0xff] %vm911_vm10, %v2444_v40  ;;  %v2446_v13 = vpop.permute.xlu0 %2445 }
 0x462   : > { %v5239_v15 = vsel %vm422_vm4, %v2444_v40, %v2446_v13  ;;  %2476 = vst.msk [vmem:[#allocation5 + $0x28] sm:$0xff] %vm422_vm4, %v2446_v13 }
 0x463   : > { %2475 = vst [vmem:[#allocation5 + $0x20] sm:$0xff] %v5239_v15  ;;  %v2506_v11 = vmul.f32 %v2500_v20, %v5239_v15  ;;  %v2625_v18 = vmul.f32 %v5327_v17, %v5239_v15  ;;  %v2727_v40 = vmul.f32 %v5339_v12, %v5239_v15  ;;  %v2901_v13 = vmul.f32 %v5349_v51, %v5239_v15 }
 0x464   : > { %v5244_v3 = vld [vmem:[#allocation5] sm:$0xff]  ;;  %v2448_v0 = vpop.permute.xlu1 %2447 }
 0x465   : > { %v2503_v29 = vmul.f32 %v2496_v59, %v5244_v3  ;;  %2514 = vst [vmem:[#allocation3 + $0x18] sm:$0xff] %v2506_v11  ;;  %2477 = vst.msk [vmem:[#allocation5 + $0x30] sm:$0xff] %vm911_vm10, %v2448_v0  ;;  %2543 = vrot.lane.b32.xlu0 %v5244_v3, %s4069_s13  ;;  %v2450_v6 = vpop.permute.xlu0 %2449  ;;  %v5250_v35 = vld [vmem:[#allocation5 + $0x10] sm:$0xff]  ;;  %v3896_v54 = vpack.c.bf16 %v2506_v11, %v2504_v14  ;;  %v2621_v42 = vmul.f32 %v6048_v24, %v5244_v3 }
 0x466   : > { %v5255_v63 = vsel %vm422_vm4, %v2448_v0, %v2450_v6  ;;  %2479 = vst.msk [vmem:[#allocation5 + $0x40] sm:$0xff] %vm422_vm4, %v2450_v6  ;;  %2547 = vrot.lane.b32.xlu1 %v5250_v35, %s4069_s13  ;;  %v2623_v41 = vmul.f32 %v6047_v5, %v5250_v35  ;;  %v2725_v28 = vmul.f32 %v6049_v56, %v5250_v35 }
 0x467   : > { %2511 = vst [vmem:[#allocation3] sm:$0xff] %v2503_v29  ;;  %2478 = vst [vmem:[#allocation5 + $0x38] sm:$0xff] %v5255_v63  ;;  %v2508_v25 = vmul.f32 %v2500_v20, %v5255_v63  ;;  %3897 = vmatprep.subr.bf16.mxu0 %v3896_v54  ;;  %v2723_v47 = vmul.f32 %v6050_v38, %v5244_v3  ;;  %v2899_v16 = vmul.f32 %v6051_v4, %v5250_v35 }
 0x468   : > { %v5262_v48 = vld [vmem:[#allocation5 + $0x18] sm:$0xff]  ;;  %v2452_v27 = vpop.permute.xlu1 %2451  ;;  %v3001_v21 = vmul.f32 %v6052_v43, %v5250_v35  ;;  %v2897_v44 = vmul.f32 %v6053_v9, %v5244_v3  ;;  %v2999_v46 = vmul.f32 %v6054_v33, %v5244_v3 }
 0x469   : > { %v2505_v26 = vmul.f32 %v2496_v59, %v5262_v48  ;;  %2516 = vst [vmem:[#allocation3 + $0x28] sm:$0xff] %v2508_v25  ;;  %2480 = vst.msk [vmem:[#allocation5 + $0x48] sm:$0xff] %vm911_vm10, %v2452_v27  ;;  %2819 = vrot.lane.b32.xlu0 %v5244_v3, %s5997_s27  ;;  %v2454_v62 = vpop.permute.xlu0 %2453  ;;  %v5332_v52 = vld [vmem:[#allocation5 + $0x28] sm:$0xff]  ;;  %v2624_v7 = vmul.f32 %v6048_v24, %v5262_v48  ;;  %v2726_v2 = vmul.f32 %v6050_v38, %v5262_v48 }
 0x46a   : > { %v5271_v61 = vsel %vm422_vm4, %v2452_v27, %v2454_v62  ;;  %2482 = vst.msk [vmem:[#allocation5 + $0x58] sm:$0xff] %vm422_vm4, %v2454_v62  ;;  %2823 = vrot.lane.b32.xlu1 %v5250_v35, %s5997_s27  ;;  %vm6055_vm4 = vmmov %vm6017_vm5  ;;  %v2900_v23 = vmul.f32 %v6053_v9, %v5262_v48  ;;  %v2626_v58 = vmul.f32 %v6047_v5, %v5332_v52 }
 0x46b   : > { %2513 = vst [vmem:[#allocation3 + $0x10] sm:$0xff] %v2505_v26  ;;  %2481 = vst [vmem:[#allocation5 + $0x50] sm:$0xff] %v5271_v61  ;;  %v2510_v45 = vmul.f32 %v2500_v20, %v5271_v61  ;;  %v3898_v32 = vpack.c.bf16 %v2505_v26, %v2503_v29  ;;  %v5359_v57 = vsel %vm6055_vm4, %v6054_v33, %v6052_v43 }
 0x46c   : > { %v5278_v49 = vld [vmem:[#allocation5 + $0x30] sm:$0xff]  ;;  %v3000_v8 = vmul.f32 %v5359_v57, %v5229_v10  ;;  %v3002_v20 = vmul.f32 %v6054_v33, %v5262_v48  ;;  %v2728_v14 = vmul.f32 %v6049_v56, %v5332_v52  ;;  %v2902_v34 = vmul.f32 %v6051_v4, %v5332_v52 }
 0x46d   : > { %v2507_v1 = vmul.f32 %v2496_v59, %v5278_v49  ;;  %2518 = vst [vmem:[#allocation3 + $0x38] sm:$0xff] %v2510_v45  ;;  %3095 = vrot.lane.b32.xlu0 %v5244_v3, %s6000_s14  ;;  %3899 = vmatpush1.bf16.msra.mxu0 %v3898_v32  ;;  %v3900_v19 = vpack.c.bf16 %v2510_v45, %v2508_v25  ;;  %v5407_v11 = vld [vmem:[#allocation5 + $0x40] sm:$0xff] }
 0x46e   : > { %3099 = vrot.lane.b32.xlu1 %v5250_v35, %s6000_s14  ;;  %v3003_v0 = vmul.f32 %v5359_v57, %v5239_v15  ;;  %v2629_v29 = vmul.f32 %v6047_v5, %v5407_v11  ;;  %v2627_v6 = vmul.f32 %v6048_v24, %v5278_v49  ;;  %v2731_v54 = vmul.f32 %v6049_v56, %v5407_v11 }
 0x46f   : > { %2515 = vst [vmem:[#allocation3 + $0x20] sm:$0xff] %v2507_v1  ;;  %3901 = vmatprep.subr.bf16.mxu0 %v3900_v19  ;;  %v2729_v25 = vmul.f32 %v6050_v38, %v5278_v49  ;;  %v2905_v27 = vmul.f32 %v6051_v4, %v5407_v11  ;;  %v3007_v26 = vmul.f32 %v6052_v43, %v5407_v11 }
 0x470   : > { %v5285_v39 = vld [vmem:[#allocation5 + $0x48] sm:$0xff]  ;;  %v2903_v62 = vmul.f32 %v6053_v9, %v5278_v49  ;;  %v3005_v32 = vmul.f32 %v6054_v33, %v5278_v49 }
 0x471   : > { %v2509_v50 = vmul.f32 %v2496_v59, %v5285_v39  ;;  %2545 = vrot.lane.b32.xlu0 %v5229_v10, %s4069_s13  ;;  %v3004_v59 = vmul.f32 %v6052_v43, %v5332_v52 }
 0x472   : > { %2649 = vrot.lane.b32.xlu1 %v2623_v41, %s5995_s16 }
 0x473   : > { %2517 = vst [vmem:[#allocation3 + $0x30] sm:$0xff] %v2509_v50  ;;  %v3902_v31 = vpack.c.bf16 %v2509_v50, %v2507_v1 }
 0x475   : > { %2645 = vrot.lane.b32.xlu0 %v2621_v42, %s5995_s16  ;;  %3903 = vmatpush1.bf16.msra.mxu0 %v3902_v31  ;;  %v2628_v42 = vmul.f32 %v5327_v17, %v5255_v63 }
 0x476   : > { %2751 = vrot.lane.b32.xlu1 %v2725_v28, %s5996_s18  ;;  %v5459_v28 = vld [vmem:[#allocation5 + $0x58] sm:$0xff] }
 0x479   : > { %2747 = vrot.lane.b32.xlu0 %v2723_v47, %s5996_s18 }
 0x47a   : > { %2925 = vrot.lane.b32.xlu1 %v2899_v16, %s5998_s28  ;;  %v2730_v16 = vmul.f32 %v5339_v12, %v5255_v63 }
 0x47d   : > { %2821 = vrot.lane.b32.xlu0 %v5229_v10, %s5997_s27 }
 0x47e   : > { %3027 = vrot.lane.b32.xlu1 %v3001_v21, %s5999_s29 }
 0x481   : > { %2921 = vrot.lane.b32.xlu0 %v2897_v44, %s5998_s28 }
 0x482   : > { %2549 = vrot.lane.b32.xlu1 %v5262_v48, %s4069_s13 }
 0x485   : > { %3023 = vrot.lane.b32.xlu0 %v2999_v46, %s5999_s29 }
 0x486   : > { %2825 = vrot.lane.b32.xlu1 %v5262_v48, %s5997_s27 }
 0x489   : > { %3097 = vrot.lane.b32.xlu0 %v5229_v10, %s6000_s14 }
 0x48a   : > { %3101 = vrot.lane.b32.xlu1 %v5262_v48, %s6000_s14 }
 0x48d   : > { %2647 = vrot.lane.b32.xlu0 %v2622_v22, %s5995_s16 }
 0x48e   : > { %2553 = vrot.lane.b32.xlu1 %v5332_v52, %s4069_s13 }
 0x491   : > { %2749 = vrot.lane.b32.xlu0 %v2724_v37, %s5996_s18  ;;  %v2904_v37 = vmul.f32 %v5349_v51, %v5255_v63 }
 0x492   : > { %2829 = vrot.lane.b32.xlu1 %v5332_v52, %s5997_s27 }
 0x495   : > { %2923 = vrot.lane.b32.xlu0 %v2898_v36, %s5998_s28 }
 0x496   : > { %3105 = vrot.lane.b32.xlu1 %v5332_v52, %s6000_s14 }
 0x499   : > { %3025 = vrot.lane.b32.xlu0 %v3000_v8, %s5999_s29 }
 0x49a   : > { %2651 = vrot.lane.b32.xlu1 %v2624_v7, %s5995_s16  ;;  %v3006_v7 = vmul.f32 %v5359_v57, %v5255_v63 }
 0x49d   : > { %2551 = vrot.lane.b32.xlu0 %v5239_v15, %s4069_s13 }
 0x49e   : > { %2753 = vrot.lane.b32.xlu1 %v2726_v2, %s5996_s18 }
 0x4a1   : > { %2827 = vrot.lane.b32.xlu0 %v5239_v15, %s5997_s27 }
 0x4a2   : > { %2927 = vrot.lane.b32.xlu1 %v2900_v23, %s5998_s28  ;;  %v2630_v23 = vmul.f32 %v6048_v24, %v5285_v39 }
 0x4a5   : > { %3103 = vrot.lane.b32.xlu0 %v5239_v15, %s6000_s14 }
 0x4a6   : > { %3029 = vrot.lane.b32.xlu1 %v3002_v20, %s5999_s29 }
 0x4a9   : > { %2555 = vrot.lane.b32.xlu0 %v5278_v49, %s4069_s13 }
 0x4aa   : > { %2655 = vrot.lane.b32.xlu1 %v2626_v58, %s5995_s16 }
 0x4ad   : > { %2653 = vrot.lane.b32.xlu0 %v2625_v18, %s5995_s16 }
 0x4ae   : > { %2757 = vrot.lane.b32.xlu1 %v2728_v14, %s5996_s18 }
 0x4b1   : > { %2755 = vrot.lane.b32.xlu0 %v2727_v40, %s5996_s18  ;;  %v2732_v40 = vmul.f32 %v6050_v38, %v5285_v39  ;;  %v3008_v38 = vmul.f32 %v6054_v33, %v5285_v39  ;;  %v2632_v33 = vmul.f32 %v6047_v5, %v5459_v28 }
 0x4b2   : > { %2931 = vrot.lane.b32.xlu1 %v2902_v34, %s5998_s28 }
 0x4b5   : > { %2831 = vrot.lane.b32.xlu0 %v5278_v49, %s5997_s27 }
 0x4b6   : > { %3033 = vrot.lane.b32.xlu1 %v3004_v59, %s5999_s29  ;;  %v2906_v59 = vmul.f32 %v6053_v9, %v5285_v39 }
 0x4b9   : > { %2929 = vrot.lane.b32.xlu0 %v2901_v13, %s5998_s28 }
 0x4ba   : > { %2559 = vrot.lane.b32.xlu1 %v5407_v11, %s4069_s13 }
 0x4bd   : > { %3031 = vrot.lane.b32.xlu0 %v3003_v0, %s5999_s29 }
 0x4be   : > { %2835 = vrot.lane.b32.xlu1 %v5407_v11, %s5997_s27 }
 0x4c1   : > { %3107 = vrot.lane.b32.xlu0 %v5278_v49, %s6000_s14 }
 0x4c2   : > { %3111 = vrot.lane.b32.xlu1 %v5407_v11, %s6000_s14 }
 0x4c5   : > { %2557 = vrot.lane.b32.xlu0 %v5255_v63, %s4069_s13 }
 0x4c6   : > { %2661 = vrot.lane.b32.xlu1 %v2629_v29, %s5995_s16 }
 0x4c9   : > { %2657 = vrot.lane.b32.xlu0 %v2627_v6, %s5995_s16  ;;  %v2631_v6 = vmul.f32 %v5327_v17, %v5271_v61 }
 0x4ca   : > { %2763 = vrot.lane.b32.xlu1 %v2731_v54, %s5996_s18 }
 0x4cd   : > { %2759 = vrot.lane.b32.xlu0 %v2729_v25, %s5996_s18 }
 0x4ce   : > { %2937 = vrot.lane.b32.xlu1 %v2905_v27, %s5998_s28  ;;  %v6056_v27 = vld [vmem:[#allocation28_spill] sm:$0xff] }
 0x4d1   : > { %2833 = vrot.lane.b32.xlu0 %v5255_v63, %s5997_s27 }
 0x4d2   : > { %3039 = vrot.lane.b32.xlu1 %v3007_v26, %s5999_s29  ;;  %v6057_v26 = vld [vmem:[#allocation25_spill] sm:$0xff] }
 0x4d5   : > { %2933 = vrot.lane.b32.xlu0 %v2903_v62, %s5998_s28  ;;  %v5523_v62 = vsel %vm678_vm1, %v6057_v26, %v6056_v27 }
 0x4d6   : > { %2561 = vrot.lane.b32.xlu1 %v5285_v39, %s4069_s13 }
 0x4d7   : > { %v2544_v45 = vpop.permute.xlu0 %2543 }
 0x4d8   : > { %v2548_v1 = vpop.permute.xlu1 %2547 }
 0x4d9   : > { %3035 = vrot.lane.b32.xlu0 %v3005_v32, %s5999_s29 }
 0x4da   : > { %2837 = vrot.lane.b32.xlu1 %v5285_v39, %s5997_s27 }
 0x4db   : > { %v2820_v19 = vpop.permute.xlu0 %2819 }
 0x4dc   : > { %v2824_v41 = vpop.permute.xlu1 %2823 }
 0x4dd   : > { %3109 = vrot.lane.b32.xlu0 %v5255_v63, %s6000_s14 }
 0x4de   : > { %3113 = vrot.lane.b32.xlu1 %v5285_v39, %s6000_s14 }
 0x4df   : > { %v3096_v50 = vpop.permute.xlu0 %3095 }
 0x4e0   : > { %v3100_v31 = vpop.permute.xlu1 %3099 }
 0x4e1   : > { %2659 = vrot.lane.b32.xlu0 %v2628_v42, %s5995_s16 }
 0x4e2   : > { %2565 = vrot.lane.b32.xlu1 %v5459_v28, %s4069_s13 }
 0x4e3   : > { %v2546_v47 = vpop.permute.xlu0 %2545 }
 0x4e4   : > { %v5466_v21 = vsel %vm463_vm11, %v2544_v45, %v2546_v47  ;;  %v5469_v44 = vsel %vm463_vm11, %v2546_v47, %v2548_v1  ;;  %v2650_v46 = vpop.permute.xlu1 %2649  ;;  %v1615_v45 = vmul.f32 %v5523_v62, %v5226_v53  ;;  %v2908_v47 = vmul.f32 %v6051_v4, %v5459_v28 }
 0x4e5   : > { %2583 = vst [vmem:[#allocation3 + $0x40] sm:$0xff] %v5466_v21  ;;  %2584 = vst [vmem:[#allocation3 + $0x48] sm:$0xff] %v5469_v44  ;;  %2761 = vrot.lane.b32.xlu0 %v2730_v16, %s5996_s18  ;;  %v1618_v16 = vmul.f32 %v5523_v62, %v5236_v30 }
 0x4e6   : > { %2841 = vrot.lane.b32.xlu1 %v5459_v28, %s5997_s27 }
 0x4e7   : > { %v2646_v22 = vpop.permute.xlu0 %2645 }
 0x4e8   : > { %v2752_v36 = vpop.permute.xlu1 %2751 }
 0x4e9   : > { %2935 = vrot.lane.b32.xlu0 %v2904_v37, %s5998_s28  ;;  %v3010_v37 = vmul.f32 %v6052_v43, %v5459_v28 }
 0x4ea   : > { %3117 = vrot.lane.b32.xlu1 %v5459_v28, %s6000_s14 }
 0x4eb   : > { %v2748_v8 = vpop.permute.xlu0 %2747 }
 0x4ec   : > { %v2926_v2 = vpop.permute.xlu1 %2925 }
 0x4ed   : > { %3037 = vrot.lane.b32.xlu0 %v3006_v7, %s5999_s29 }
 0x4ee   : > { %2663 = vrot.lane.b32.xlu1 %v2630_v23, %s5995_s16  ;;  %v6059_v23 = vld [vmem:[#allocation10_spill] sm:$0xff] }
 0x4ef   : > { %v2822_v20 = vpop.permute.xlu0 %2821 }
 0x4f0   : > { %v5488_v58 = vsel %vm559_vm13, %v2820_v19, %v2822_v20  ;;  %v5491_v18 = vsel %vm559_vm13, %v2822_v20, %v2824_v41  ;;  %v3028_v14 = vpop.permute.xlu1 %3027  ;;  %v2734_v19 = vmul.f32 %v6049_v56, %v5459_v28  ;;  %v1616_v20 = vmul.f32 %v6056_v27, %v6059_v23 }
 0x4f1   : > { %2563 = vrot.lane.b32.xlu0 %v5271_v61, %s4069_s13  ;;  %s413_s13 = scalar_lea.vmem %s5942_s12, %s3789_s23 }
 0x4f2   : > { %2765 = vrot.lane.b32.xlu1 %v2732_v40, %s5996_s18  ;;  %v1621_v40 = vmul.f32 %v5523_v62, %v5252_v60 }
 0x4f3   : > { %v2922_v24 = vpop.permute.xlu0 %2921 }
 0x4f4   : > { %v2550_v34 = vpop.permute.xlu1 %2549 }
 0x4f5   : > { %2839 = vrot.lane.b32.xlu0 %v5271_v61, %s5997_s27 }
 0x4f6   : > { %2939 = vrot.lane.b32.xlu1 %v2906_v59, %s5998_s28 }
 0x4f7   : > { %v3024_v13 = vpop.permute.xlu0 %3023 }
 0x4f8   : > { %v2826_v0 = vpop.permute.xlu1 %2825 }
 0x4f9   : > { %3115 = vrot.lane.b32.xlu0 %v5271_v61, %s6000_s14 }
 0x4fa   : > { %3041 = vrot.lane.b32.xlu1 %v3008_v38, %s5999_s29 }
 0x4fb   : > { %v3098_v29 = vpop.permute.xlu0 %3097 }
 0x4fc   : > { %v5511_v9 = vsel %vm655_vm12, %v3096_v50, %v3098_v29  ;;  %v5514_v54 = vsel %vm655_vm12, %v3098_v29, %v3100_v31  ;;  %v5516_v25 = vpop.permute.xlu1 %3101  ;;  %v2733_v50 = vmul.f32 %v5339_v12, %v5271_v61 }
 0x4fd   : > { %2665 = vrot.lane.b32.xlu0 %v2631_v6, %s5995_s16 }
 0x4fe   : > { %2667 = vrot.lane.b32.xlu1 %v2632_v33, %s5995_s16  ;;  %v1686_v33 = vld [vmem:[%s5934_s4] sm:$0xff] }
 0x4ff   : > { %v2648_v17 = vpop.permute.xlu0 %2647  ;;  %v1694_v60 = vunpack.c.l.bf16 %v1686_v33 }
 0x500   : > { %v5530_v32 = vsel %vm502_vm15, %v2646_v22, %v2648_v17  ;;  %v5533_v1 = vsel %vm502_vm15, %v2648_v17, %v2650_v46  ;;  %v2554_v5 = vpop.permute.xlu1 %2553 }
 0x501   : > { %1640 = vrot.lane.b32.xlu0 %v1615_v45, %s4074_s19  ;;  %v2907_v45 = vmul.f32 %v5349_v51, %v5271_v61 }
 0x502   : > { %2769 = vrot.lane.b32.xlu1 %v2734_v19, %s5996_s18  ;;  %v6061_v19 = vld [vmem:[#allocation13_spill] sm:$0xff] }
 0x503   : > { %v2750_v41 = vpop.permute.xlu0 %2749 }
 0x504   : > { %v5542_v53 = vsel %vm541_vm0, %v2748_v8, %v2750_v41  ;;  %v5545_v42 = vsel %vm541_vm0, %v2750_v41, %v2752_v36  ;;  %v2830_v31 = vpop.permute.xlu1 %2829  ;;  %v6058_v36 = vld [vmem:[#allocation9_spill] sm:$0xff]  ;;  %v1617_v41 = vmul.f32 %v6057_v26, %v6061_v19 }
 0x505   : > { %2767 = vrot.lane.b32.xlu0 %v2733_v50, %s5996_s18  ;;  %v1614_v8 = vmul.f32 %v6057_v26, %v6058_v36 }
 0x506   : > { %2943 = vrot.lane.b32.xlu1 %v2908_v47, %s5998_s28 }
 0x507   : > { %v2924_v56 = vpop.permute.xlu0 %2923 }
 0x508   : > { %v5554_v12 = vsel %vm598_vm14, %v2922_v24, %v2924_v56  ;;  %v5557_v46 = vsel %vm598_vm14, %v2924_v56, %v2926_v2  ;;  %v3106_v22 = vpop.permute.xlu1 %3105 }
 0x509   : > { %1646 = vrot.lane.b32.xlu0 %v1618_v16, %s4074_s19  ;;  %v1624_v16 = vmul.f32 %v5523_v62, %v5268_v55 }
 0x50a   : > { %3045 = vrot.lane.b32.xlu1 %v3010_v37, %s5999_s29 }
 0x50b   : > { %v3026_v4 = vpop.permute.xlu0 %3025 }
 0x50c   : > { %v5566_v30 = vsel %vm636_vm2, %v3024_v13, %v3026_v4  ;;  %v5569_v7 = vsel %vm636_vm2, %v3026_v4, %v3028_v14  ;;  %v5571_v2 = vpop.permute.xlu1 %2651  ;;  %v6060_v14 = vld [vmem:[#allocation11_spill] sm:$0xff] }
 0x50d   : > { %1638 = vrot.lane.b32.xlu0 %v1614_v8, %s4074_s19  ;;  %v1619_v38 = vmul.f32 %v6056_v27, %v6060_v14  ;;  %v6062_v8 = vld [vmem:[#allocation12_spill] sm:$0xff] }
 0x50e   : > { %1642 = vrot.lane.b32.xlu1 %v1616_v20, %s4074_s19  ;;  %v1622_v23 = vmul.f32 %v6056_v27, %v6062_v8 }
 0x50f   : > { %v2552_v43 = vpop.permute.xlu0 %2551 }
 0x510   : > { %v2569_v24 = vsel %vm463_vm11, %v2550_v34, %v2552_v43  ;;  %v2570_v59 = vsel %vm463_vm11, %v2552_v43, %v2554_v5  ;;  %v5581_v13 = vpop.permute.xlu1 %2753  ;;  %v1695_v34 = vunpack.c.h.bf16 %v1686_v33 }
 0x511   : > { %1652 = vrot.lane.b32.xlu0 %v1621_v40, %s4074_s19  ;;  %v3904_v29 = vpack.c.bf16 %v2570_v59, %v5469_v44  ;;  %v3906_v6 = vpack.c.bf16 %v2569_v24, %v5466_v21  ;;  %v6063_v59 = vld [vmem:[#allocation16_spill] sm:$0xff] }
 0x512   : > { %1648 = vrot.lane.b32.xlu1 %v1619_v38, %s4074_s19  ;;  %1878 = vmatprep.mubr.f32.mxu1 %v1695_v34  ;;  %v1625_v14 = vmul.f32 %v6056_v27, %v6063_v59  ;;  %v1692_v38 = vld [vmem:[%s5934_s4 + $0x24] sm:$0xff] }
 0x513   : > { %v2828_v17 = vpop.permute.xlu0 %2827  ;;  %3905 = vmatprep.subr.bf16.mxu0 %v3904_v29  ;;  %1879 = vmatmul.mubr.f32.vlgmr.msra.gmra.mrb[8].mxu1 %v1694_v60  ;;  %v1704_v33 = vunpack.c.h.bf16 %v1692_v38  ;;  %v1703_v60 = vunpack.c.l.bf16 %v1692_v38 }
 0x514   : > { %v5595_v5 = vsel %vm559_vm13, %v2826_v0, %v2828_v17  ;;  %v5598_v44 = vsel %vm559_vm13, %v2828_v17, %v2830_v31  ;;  %v5600_v21 = vpop.permute.xlu1 %2927  ;;  %3907 = vmatpush1.bf16.msra.mxu0 %v3906_v6  ;;  %v1688_v0 = vld [vmem:[%s5934_s4 + $0xc] sm:$0xff]  ;;  %v6064_v6 = vld [vmem:[#allocation15_spill] sm:$0xff] }
 0x515   : > { %2941 = vrot.lane.b32.xlu0 %v2907_v45, %s5998_s28  ;;  %v3928_v50 = vpack.c.bf16 %v5598_v44, %v5491_v18  ;;  %v1698_v31 = vunpack.c.h.bf16 %v1688_v0  ;;  %v1697_v47 = vunpack.c.l.bf16 %v1688_v0  ;;  %v6065_v45 = vld [vmem:[#allocation17_spill] sm:$0xff] }
 0x516   : > { %1644 = vrot.lane.b32.xlu1 %v1617_v41, %s4074_s19  ;;  %v1623_v19 = vmul.f32 %v6057_v26, %v6065_v45 }
 0x517   : > { %v3104_v56 = vpop.permute.xlu0 %3103  ;;  %1884 = vmatprep.mubr.f32.mxu1 %v1698_v31  ;;  %v6067_v31 = vld [vmem:[#allocation27_spill] sm:$0xff] }
 0x518   : > { %v5617_v37 = vsel %vm655_vm12, %v5516_v25, %v3104_v56  ;;  %v5620_v4 = vsel %vm655_vm12, %v3104_v56, %v3106_v22  ;;  %v5622_v36 = vpop.permute.xlu1 %3029  ;;  %1885 = vmatmul.mubr.f32.gmra.mrb[10].mxu1 %v1697_v47  ;;  %v1690_v25 = vld [vmem:[%s5934_s4 + $0x18] sm:$0xff]  ;;  %v3009_v22 = vmul.f32 %v5359_v57, %v5271_v61  ;;  %v1620_v57 = vmul.f32 %v6057_v26, %v6064_v6  ;;  %v6068_v26 = vld [vmem:[#allocation14_spill] sm:$0xff] }
 0x519   : > { %1658 = vrot.lane.b32.xlu0 %v1624_v16, %s4074_s19  ;;  %v1701_v43 = vunpack.c.h.bf16 %v1690_v25  ;;  %v1700_v40 = vunpack.c.l.bf16 %v1690_v25  ;;  %v3173_v38 = vmul.f32 %v6067_v31, %v5244_v3 }
 0x51a   : > { %1654 = vrot.lane.b32.xlu1 %v1622_v23, %s4074_s19 }
 0x51b   : > { %v5635_v62 = vpop.permute.xlu0 %2555  ;;  %1890 = vmatprep.mubr.f32.mxu1 %v1701_v43 }
 0x51c   : > { %v2656_v24 = vpop.permute.xlu1 %2655  ;;  %1891 = vmatmul.mubr.f32.gmra.mrb[12].mxu1 %v1700_v40 }
 0x51d   : > { %3043 = vrot.lane.b32.xlu0 %v3009_v22, %s5999_s29  ;;  %1896 = vmatprep.mubr.f32.mxu1 %v1704_v33 }
 0x51e   : > { %1660 = vrot.lane.b32.xlu1 %v1625_v14, %s4074_s19 }
 0x51f   : > { %v2654_v29 = vpop.permute.xlu0 %2653 }
 0x520   : > { %v5650_v34 = vsel %vm502_vm15, %v5571_v2, %v2654_v29  ;;  %v5653_v27 = vsel %vm502_vm15, %v2654_v29, %v2656_v24  ;;  %v2758_v17 = vpop.permute.xlu1 %2757  ;;  %v6066_v2 = vld [vmem:[#allocation29_spill] sm:$0xff]  ;;  %1897 = vmatmul.mubr.f32.gmra.mrb[14].mxu1 %v1703_v60 }
 0x521   : > { %1650 = vrot.lane.b32.xlu0 %v1620_v57, %s4074_s19  ;;  %v3912_v41 = vpack.c.bf16 %v5653_v27, %v5533_v1  ;;  %v3914_v0 = vpack.c.bf16 %v5650_v34, %v5530_v32  ;;  %v3169_v47 = vsel %vm678_vm1, %v6067_v31, %v6066_v2  ;;  %1967 = vmatprep.mubr.f32.mxu1 %v6068_v26  ;;  %vm6076_vm1 = vmmov %vm6055_vm4 }
 0x522   : > { %1656 = vrot.lane.b32.xlu1 %v1623_v19, %s4074_s19  ;;  %v3174_v16 = vmul.f32 %v3169_v47, %v5229_v10  ;;  %v3175_v22 = vmul.f32 %v6066_v2, %v5250_v35  ;;  %v3178_v59 = vmul.f32 %v6066_v2, %v5332_v52  ;;  %v5691_v35 = vld [vmem:[%s5938_s8] sm:$0xff]  ;;  %v3176_v57 = vmul.f32 %v6067_v31, %v5262_v48  ;;  %vm6077_vm7 = vmmov %vm6076_vm1 }
 0x523   : > { %v2756_v56 = vpop.permute.xlu0 %2755  ;;  %v3254_v29 = vunpack.c.h.bf16 %v5691_v35  ;;  %v3180_v60 = vmul.f32 %v3169_v47, %v5255_v63  ;;  %v3181_v19 = vmul.f32 %v6066_v2, %v5407_v11  ;;  %vm6078_vm8 = vmmov %vm6076_vm1 }
 0x524   : > { %v5670_v8 = vsel %vm541_vm0, %v5581_v13, %v2756_v56  ;;  %v5673_v23 = vsel %vm541_vm0, %v2756_v56, %v2758_v17  ;;  %v2932_v25 = vpop.permute.xlu1 %2931  ;;  %v3177_v13 = vmul.f32 %v3169_v47, %v5239_v15  ;;  %vm6079_vm9 = vmmov %vm6076_vm1 }
 0x525   : > { %3199 = vrot.lane.b32.xlu0 %v3174_v16, %s4074_s19  ;;  %v3920_v43 = vpack.c.bf16 %v5673_v23, %v5545_v42  ;;  %v3922_v10 = vpack.c.bf16 %v5670_v8, %v5542_v53  ;;  %3437 = vmatprep.mubr.f32.mxu0 %v3254_v29  ;;  %v3337_v29 = vld [vmem:[%s5939_s9] sm:$0xff]  ;;  %vm6080_vm10 = vmmov %vm6076_vm1 }
 0x526   : > { %3201 = vrot.lane.b32.xlu1 %v3175_v22, %s4074_s19  ;;  %v3184_v22 = vmul.f32 %v6066_v2, %v5459_v28  ;;  %v1778_v28 = vld [vmem:[%s5935_s5] sm:$0xff] }
 0x527   : > { %v2832_v40 = vpop.permute.xlu0 %2831 }
 0x528   : > { %v3034_v24 = vpop.permute.xlu1 %3033 }
 0x529   : > { %3205 = vrot.lane.b32.xlu0 %v3177_v13, %s4074_s19  ;;  %v3179_v13 = vmul.f32 %v6067_v31, %v5278_v49  ;;  %v1779_v49 = vld [vmem:[%s5935_s5 + $0x8] sm:$0xff] }
 0x52a   : > { %3207 = vrot.lane.b32.xlu1 %v3178_v59, %s4074_s19 }
 0x52b   : > { %v2930_v14 = vpop.permute.xlu0 %2929 }
 0x52c   : > { %v5698_v15 = vsel %vm598_vm14, %v5600_v21, %v2930_v14  ;;  %v5701_v52 = vsel %vm598_vm14, %v2930_v14, %v2932_v25  ;;  %v2560_v6 = vpop.permute.xlu1 %2559 }
 0x52d   : > { %3197 = vrot.lane.b32.xlu0 %v3173_v38, %s4074_s19  ;;  %v6070_v18 = vpack.c.bf16 %v5701_v52, %v5557_v46 }
 0x52e   : > { %3203 = vrot.lane.b32.xlu1 %v3176_v57, %s4074_s19  ;;  %v3338_v57 = vld [vmem:[%s5939_s9 + $0x8] sm:$0xff] }
 0x52f   : > { %v3032_v21 = vpop.permute.xlu0 %3031 }
 0x530   : > { %v5714_v17 = vsel %vm636_vm2, %v5622_v36, %v3032_v21  ;;  %v5717_v48 = vsel %vm636_vm2, %v3032_v21, %v3034_v24  ;;  %v2836_v45 = vpop.permute.xlu1 %2835  ;;  %v3183_v36 = vmul.f32 %v3169_v47, %v5271_v61  ;;  %v3182_v61 = vmul.f32 %v6067_v31, %v5285_v39  ;;  %v1780_v39 = vld [vmem:[%s5935_s5 + $0x10] sm:$0xff]  ;;  %v1781_v47 = vld [vmem:[%s5935_s5 + $0x18] sm:$0xff] }
 0x531   : > { %3211 = vrot.lane.b32.xlu0 %v3180_v60, %s4074_s19 }
 0x532   : > { %3213 = vrot.lane.b32.xlu1 %v3181_v19, %s4074_s19 }
 0x533   : > { %v3108_v63 = vpop.permute.xlu0 %3107 }
 0x534   : > { %v3112_v25 = vpop.permute.xlu1 %3111 }
 0x535   : > { %3217 = vrot.lane.b32.xlu0 %v3183_v36, %s4074_s19  ;;  %v3339_v36 = vld [vmem:[%s5939_s9 + $0x10] sm:$0xff] }
 0x536   : > { %3219 = vrot.lane.b32.xlu1 %v3184_v22, %s4074_s19 }
 0x537   : > { %v2558_v11 = vpop.permute.xlu0 %2557 }
 0x538   : > { %v5736_v24 = vsel %vm463_vm11, %v5635_v62, %v2558_v11  ;;  %v2572_v59 = vsel %vm463_vm11, %v2558_v11, %v2560_v6  ;;  %v2662_v14 = vpop.permute.xlu1 %2661  ;;  %v3340_v11 = vld [vmem:[%s5939_s9 + $0x18] sm:$0xff] }
 0x539   : > { %3209 = vrot.lane.b32.xlu0 %v3179_v13, %s4074_s19 }
 0x53a   : > { %3215 = vrot.lane.b32.xlu1 %v3182_v61, %s4074_s19 }
 0x53b   : > { %v2658_v2 = vpop.permute.xlu0 %2657 }
 0x53c   : > { %v2764_v62 = vpop.permute.xlu1 %2763 }
 0x53d   : > { %1784 = vperm.xlu0 %4040, %v1778_v28  }
 0x53e   : > { %1789 = vperm.xlu1 %4041, %v1779_v49  }
 0x53f   : > { %v2760_v31 = vpop.permute.xlu0 %2759 }
 0x540   : > { %v2938_v38 = vpop.permute.xlu1 %2937 }
 0x541   : > { %1794 = vperm.xlu0 %4040, %v1780_v39  }
 0x542   : > { %1799 = vperm.xlu1 %4041, %v1781_v47  }
 0x543   : > { %v2834_v6 = vpop.permute.xlu0 %2833 }
 0x544   : > { %v5762_v21 = vsel %vm559_vm13, %v2832_v40, %v2834_v6  ;;  %v5765_v60 = vsel %vm559_vm13, %v2834_v6, %v2836_v45  ;;  %v3040_v19 = vpop.permute.xlu1 %3039  ;;  %v3585_v40 = vld [vmem:[%s5941_s11] sm:$0xff] }
 0x545   : > { %3343 = vperm.xlu0 %4040, %v3337_v29  }
 0x546   : > { %3348 = vperm.xlu1 %4041, %v3338_v57  }
 0x547   : > { %v2934_v22 = vpop.permute.xlu0 %2933 }
 0x548   : > { %v2562_v13 = vpop.permute.xlu1 %2561 }
 0x549   : > { %3353 = vperm.xlu0 %4040, %v3339_v36  }
 0x54a   : > { %3358 = vperm.xlu1 %4041, %v3340_v11  }
 0x54b   : > { %v3036_v45 = vpop.permute.xlu0 %3035 }
 0x54c   : > { %v2838_v61 = vpop.permute.xlu1 %2837 }
 0x54d   : > { %3588 = vperm.xlu0 %4040, %v3585_v40  }
 0x54f   : > { %v3110_v28 = vpop.permute.xlu0 %3109 }
 0x550   : > { %v5777_v49 = vsel %vm655_vm12, %v3108_v63, %v3110_v28  ;;  %v5780_v39 = vsel %vm655_vm12, %v3110_v28, %v3112_v25  ;;  %v3114_v47 = vpop.permute.xlu1 %3113 }
 0x553   : > { %v2660_v29 = vpop.permute.xlu0 %2659 }
 0x554   : > { %v2673_v6 = vsel %vm502_vm15, %v2658_v2, %v2660_v29  ;;  %v2674_v57 = vsel %vm502_vm15, %v2660_v29, %v2662_v14  ;;  %v2566_v36 = vpop.permute.xlu1 %2565 }
 0x557   : > { %v2762_v11 = vpop.permute.xlu0 %2761 }
 0x558   : > { %v2775_v55 = vsel %vm541_vm0, %v2760_v31, %v2762_v11  ;;  %v2776_v20 = vsel %vm541_vm0, %v2762_v11, %v2764_v62  ;;  %v2842_v40 = vpop.permute.xlu1 %2841 }
 0x55b   : > { %v2936_v16 = vpop.permute.xlu0 %2935 }
 0x55c   : > { %v5787_v63 = vsel %vm598_vm14, %v2934_v22, %v2936_v16  ;;  %v5790_v25 = vsel %vm598_vm14, %v2936_v16, %v2938_v38  ;;  %v3118_v28 = vpop.permute.xlu1 %3117 }
 0x55f   : > { %v3038_v56 = vpop.permute.xlu0 %3037 }
 0x560   : > { %v5793_v2 = vsel %vm636_vm2, %v3036_v45, %v3038_v56  ;;  %v5796_v14 = vsel %vm636_vm2, %v3038_v56, %v3040_v19  ;;  %v2664_v29 = vpop.permute.xlu1 %2663 }
 0x563   : > { %v2564_v31 = vpop.permute.xlu0 %2563 }
 0x564   : > { %v2573_v62 = vsel %vm463_vm11, %v2562_v13, %v2564_v31  ;;  %v2574_v11 = vsel %vm463_vm11, %v2564_v31, %v2566_v36  ;;  %v2766_v3 = vpop.permute.xlu1 %2765  ;;  %vm6081_vm11 = vmmov %vm6076_vm1 }
 0x565   : > { %v3908_v22 = vpack.c.bf16 %v2574_v11, %v2572_v59  ;;  %v3910_v33 = vpack.c.bf16 %v2573_v62, %v5736_v24  ;;  %v6071_v62 = vpack.c.bf16 %v5698_v15, %v5554_v12 }
 0x567   : > { %v2840_v16 = vpop.permute.xlu0 %2839  ;;  %3909 = vmatprep.subr.bf16.mxu0 %v3908_v22 }
 0x568   : > { %v2849_v38 = vsel %vm559_vm13, %v2838_v61, %v2840_v16  ;;  %v2850_v45 = vsel %vm559_vm13, %v2840_v16, %v2842_v40  ;;  %v2940_v51 = vpop.permute.xlu1 %2939  ;;  %3911 = vmatpush1.bf16.msra.mxu0 %v3910_v33  ;;  %v6072_v16 = vpack.c.bf16 %v5717_v48, %v5569_v7  ;;  %vm6083_vm13 = vmmov %vm6076_vm1 }
 0x569   : > { %3913 = vmatprep.subr.bf16.mxu0 %v3912_v41 }
 0x56b   : > { %v3116_v56 = vpop.permute.xlu0 %3115 }
 0x56c   : > { %v5807_v19 = vsel %vm655_vm12, %v3114_v47, %v3116_v56  ;;  %v5810_v59 = vsel %vm655_vm12, %v3116_v56, %v3118_v28  ;;  %v3042_v24 = vpop.permute.xlu1 %3041  ;;  %3915 = vmatpush1.bf16.msra.mxu0 %v3914_v0  ;;  %vm6082_vm12 = vmmov %vm6076_vm1 }
 0x56f   : > { %v2666_v13 = vpop.permute.xlu0 %2665 }
 0x570   : > { %v2675_v61 = vsel %vm502_vm15, %v2664_v29, %v2666_v13  ;;  %v2668_v33 = vpop.permute.xlu1 %2667 }
 0x571   : > { %v2676_v36 = vsel %vm502_vm15, %v2666_v13, %v2668_v33  ;;  %v3918_v41 = vpack.c.bf16 %v2675_v61, %v2673_v6 }
 0x572   : > { %v3916_v1 = vpack.c.bf16 %v2676_v36, %v2674_v57  ;;  %v1687_v36 = vld [vmem:[%s5934_s4 + $0x8] ss:$12 sps:$4 sm:$0xff]  }
 0x573   : > { %v1641_v27 = vpop.permute.xlu0 %1640 }
 0x574   : > { %v2770_v40 = vpop.permute.xlu1 %2769  ;;  %3917 = vmatprep.subr.bf16.mxu0 %v3916_v1 }
 0x575   : > { %3919 = vmatpush1.bf16.msra.mxu0 %v3918_v41 }
 0x576   : > { %3921 = vmatprep.subr.bf16.mxu0 %v3920_v43  ;;  %v3932_v43 = vpack.c.bf16 %v2850_v45, %v5765_v60 }
 0x577   : > { %v2768_v47 = vpop.permute.xlu0 %2767 }
 0x578   : > { %v2777_v32 = vsel %vm541_vm0, %v2766_v3, %v2768_v47  ;;  %v2778_v34 = vsel %vm541_vm0, %v2768_v47, %v2770_v40  ;;  %v2944_v0 = vpop.permute.xlu1 %2943  ;;  %v6069_v3 = vpack.c.bf16 %v5595_v5, %v5488_v58  ;;  %v6075_v47 = vpack.c.bf16 %v5617_v37, %v5511_v9  ;;  %v1691_v9 = vld [vmem:[%s5934_s4 + $0x20] ss:$12 sps:$4 sm:$0xff]  }
 0x579   : > { %3923 = vmatpush1.bf16.msra.mxu0 %v3922_v10  ;;  %v3924_v57 = vpack.c.bf16 %v2778_v34, %v2776_v20  ;;  %v3926_v6 = vpack.c.bf16 %v2777_v32, %v2775_v55  ;;  %v3934_v20 = vpack.c.bf16 %v2849_v38, %v5762_v21  ;;  %v3247_v34 = vld [vmem:[%s5938_s8 + $0xc] sm:$0xff] }
 0x57b   : > { %v1647_v28 = vpop.permute.xlu0 %1646  ;;  %3925 = vmatprep.subr.bf16.mxu0 %v3924_v57  ;;  %v3257_v57 = vunpack.c.h.bf16 %v3247_v34 }
 0x57c   : > { %v3046_v29 = vpop.permute.xlu1 %3045 }
 0x57d   : > { %3927 = vmatpush1.bf16.msra.mxu0 %v3926_v6 }
 0x57e   : > { %3929 = vmatprep.subr.bf16.mxu0 %v3928_v50 }
 0x57f   : > { %v1639_v42 = vpop.permute.xlu0 %1638 }
 0x580   : > { %v1643_v23 = vpop.permute.xlu1 %1642  ;;  %v1662_v21 = vsel %vm693_vm3, %v1639_v42, %v1641_v27 }
 0x581   : > { %3931 = vmatpush1.bf16.msra.mxu0 %v6069_v3  ;;  %v1663_v55 = vsel %vm693_vm3, %v1641_v27, %v1643_v23  ;;  %v1696_v27 = vunpack.c.l.bf16 %v1687_v36 }
 0x582   : > { %3933 = vmatprep.subr.bf16.mxu0 %v3932_v43 }
 0x583   : > { %v1653_v53 = vpop.permute.xlu0 %1652 }
 0x584   : > { %v1649_v8 = vpop.permute.xlu1 %1648 }
 0x585   : > { %v1665_v10 = vsel %vm693_vm3, %v1647_v28, %v1649_v8  ;;  %3935 = vmatpush1.bf16.msra.mxu0 %v3934_v20  ;;  %v3251_v20 = vld [vmem:[%s5938_s8 + $0x24] sm:$0xff] }
 0x586   : > { %3937 = vmatprep.subr.bf16.mxu0 %v6070_v18  ;;  %v3880_v44 = vpack.c.bf16 %v1665_v10, %v1663_v55  ;;  %v3263_v18 = vunpack.c.h.bf16 %v3251_v20 }
 0x587   : > { %v2942_v50 = vpop.permute.xlu0 %2941 }
 0x588   : > { %v2951_v60 = vsel %vm598_vm14, %v2940_v51, %v2942_v50  ;;  %v2952_v58 = vsel %vm598_vm14, %v2942_v50, %v2944_v0  ;;  %v1645_v5 = vpop.permute.xlu1 %1644  ;;  %3881 = vmatprep.subr.bf16.mxu1 %v3880_v44  ;;  %vm3591_vm14 = vcmask 523264  }
 0x589   : > { %v1664_v31 = vsel %vm693_vm3, %v1645_v5, %v1647_v28  ;;  %3939 = vmatpush1.bf16.msra.mxu0 %v6071_v62  ;;  %v3940_v11 = vpack.c.bf16 %v2952_v58, %v5790_v25  ;;  %v3942_v22 = vpack.c.bf16 %v2951_v60, %v5787_v63  ;;  %v6073_v63 = vpack.c.bf16 %v5714_v17, %v5566_v30  ;;  %v3249_v28 = vld [vmem:[%s5938_s8 + $0x18] sm:$0xff] }
 0x58a   : > { %v3882_v46 = vpack.c.bf16 %v1664_v31, %v1662_v21  ;;  %v6074_v30 = vpack.c.bf16 %v5620_v4, %v5514_v54  ;;  %v3958_v54 = vpack.c.bf16 %v5807_v19, %v5777_v49  ;;  %v1699_v4 = vunpack.c.h.bf16 %v1687_v36 }
 0x58b   : > { %v1659_v52 = vpop.permute.xlu0 %1658  ;;  %3941 = vmatprep.subr.bf16.mxu0 %v3940_v11  ;;  %v1702_v19 = vunpack.c.l.bf16 %v1691_v9  ;;  %v3260_v43 = vunpack.c.h.bf16 %v3249_v28  ;;  %v3259_v10 = vunpack.c.l.bf16 %v3249_v28  ;;  %v3262_v58 = vunpack.c.l.bf16 %v3251_v20  ;;  %v3246_v11 = vld [vmem:[%s5938_s8 + $0x8] ss:$12 sps:$4 sm:$0xff]  }
 0x58c   : > { %v1655_v51 = vpop.permute.xlu1 %1654  ;;  %3883 = vmatpush1.bf16.msra.mxu1 %v3882_v46 }
 0x58d   : > { %3943 = vmatpush1.bf16.msra.mxu0 %v3942_v22  ;;  %v1667_v25 = vsel %vm693_vm3, %v1653_v53, %v1655_v51  ;;  %v3255_v22 = vunpack.c.l.bf16 %v3246_v11  ;;  %v3258_v51 = vunpack.c.h.bf16 %v3246_v11 }
 0x58e   : > { %3945 = vmatprep.subr.bf16.mxu0 %v6072_v16  ;;  %v3250_v16 = vld [vmem:[%s5938_s8 + $0x20] ss:$12 sps:$4 sm:$0xff]  }
 0x58f   : > { %v3044_v38 = vpop.permute.xlu0 %3043 }
 0x590   : > { %v3053_v45 = vsel %vm636_vm2, %v3042_v24, %v3044_v38  ;;  %v3054_v12 = vsel %vm636_vm2, %v3044_v38, %v3046_v29  ;;  %v1661_v15 = vpop.permute.xlu1 %1660  ;;  %v3261_v38 = vunpack.c.l.bf16 %v3250_v16 }
 0x591   : > { %v1669_v56 = vsel %vm693_vm3, %v1659_v52, %v1661_v15  ;;  %3947 = vmatpush1.bf16.msra.mxu0 %v6073_v63  ;;  %v3948_v13 = vpack.c.bf16 %v3054_v12, %v5796_v14  ;;  %v3950_v7 = vpack.c.bf16 %v3053_v45, %v5793_v2  ;;  %v3956_v2 = vpack.c.bf16 %v5810_v59, %v5780_v39 }
 0x592   : > { %v3884_v61 = vpack.c.bf16 %v1669_v56, %v1667_v25  ;;  %v3253_v39 = vunpack.c.l.bf16 %v5691_v35  ;;  %v3256_v35 = vunpack.c.l.bf16 %v3247_v34  ;;  %v3264_v45 = vunpack.c.h.bf16 %v3250_v16 }
 0x593   : > { %v1651_v33 = vpop.permute.xlu0 %1650  ;;  %3949 = vmatprep.subr.bf16.mxu0 %v3948_v13 }
 0x594   : > { %v1666_v48 = vsel %vm693_vm3, %v1651_v33, %v1653_v53  ;;  %v1657_v24 = vpop.permute.xlu1 %1656  ;;  %3885 = vmatprep.subr.bf16.mxu1 %v3884_v61  ;;  %v1705_v53 = vunpack.c.h.bf16 %v1691_v9 }
 0x595   : > { %v1668_v1 = vsel %vm693_vm3, %v1657_v24, %v1659_v52  ;;  %3951 = vmatpush1.bf16.msra.mxu0 %v3950_v7 }
 0x596   : > { %3953 = vmatprep.subr.bf16.mxu0 %v6074_v30  ;;  %v3886_v17 = vpack.c.bf16 %v1668_v1, %v1666_v48 }
 0x597   : > { %v3200_v14 = vpop.permute.xlu0 %3199 }
 0x598   : > { %v3202_v41 = vpop.permute.xlu1 %3201  ;;  %3887 = vmatpush1.bf16.msra.mxu1 %v3886_v17 }
 0x599   : > { %v3222_v40 = vsel %vm693_vm3, %v3200_v14, %v3202_v41  ;;  %3955 = vmatpush1.bf16.msra.mxu0 %v6075_v47 }
 0x59a   : > { %3957 = vmatprep.subr.bf16.mxu0 %v3956_v2 }
 0x59b   : > { %v3206_v32 = vpop.permute.xlu0 %3205  ;;  %3765 = vmatmul.mubr.msk.f32.vlgmr.msra.gmra.mrb[8].mxu1 %vm6076_vm1, %v1696_v27 }
 0x59c   : > { %v3208_v0 = vpop.permute.xlu1 %3207  ;;  %1973 = vmatprep.mubr.f32.mxu1 %v6068_v26 }
 0x59d   : > { %v3224_v37 = vsel %vm693_vm3, %v3206_v32, %v3208_v0  ;;  %3959 = vmatpush1.bf16.msra.mxu0 %v3958_v54 }
 0x59e   : > { %v3960_v59 = vpack.c.bf16 %v3224_v37, %v3222_v40 }
 0x59f   : > { %v3198_v49 = vpop.permute.xlu0 %3197  ;;  %3766 = vmatmul.mubr.msk.f32.gmra.mrb[10].mxu1 %vm6077_vm7, %v1699_v4 }
 0x5a0   : > { %v3221_v6 = vsel %vm693_vm3, %v3198_v49, %v3200_v14  ;;  %v3204_v29 = vpop.permute.xlu1 %3203  ;;  %3961 = vmatprep.subr.bf16.mxu0 %v3960_v59  ;;  %1979 = vmatprep.mubr.f32.mxu1 %v6068_v26 }
 0x5a1   : > { %v3223_v42 = vsel %vm693_vm3, %v3204_v29, %v3206_v32  ;;  %3438 = vmatmul.mubr.f32.vlgmr.msra.gmra.mrb[8].mxu0 %v3253_v39 }
 0x5a2   : > { %v3962_v23 = vpack.c.bf16 %v3223_v42, %v3221_v6  ;;  %3443 = vmatprep.mubr.f32.mxu0 %v3257_v57 }
 0x5a3   : > { %v3212_v3 = vpop.permute.xlu0 %3211  ;;  %3767 = vmatmul.mubr.msk.f32.gmra.mrb[12].mxu1 %vm6078_vm8, %v1702_v19 }
 0x5a4   : > { %v3214_v8 = vpop.permute.xlu1 %3213  ;;  %3963 = vmatpush1.bf16.msra.mxu0 %v3962_v23  ;;  %1985 = vmatprep.mubr.f32.mxu1 %v6068_v26 }
 0x5a5   : > { %v3226_v55 = vsel %vm693_vm3, %v3212_v3, %v3214_v8  ;;  %3444 = vmatmul.mubr.f32.gmra.mrb[10].mxu0 %v3256_v35 }
 0x5a6   : > { %3449 = vmatprep.mubr.f32.mxu0 %v3260_v43 }
 0x5a7   : > { %v3218_v44 = vpop.permute.xlu0 %3217  ;;  %3768 = vmatmul.mubr.msk.f32.gmra.mrb[14].mxu1 %vm6079_vm9, %v1705_v53 }
 0x5a8   : > { %v3220_v50 = vpop.permute.xlu1 %3219  ;;  %3659 = vmatprep.mubr.f32.mxu1 %v6068_v26 }
 0x5a9   : > { %v3228_v60 = vsel %vm693_vm3, %v3218_v44, %v3220_v50  ;;  %3450 = vmatmul.mubr.f32.gmra.mrb[12].mxu0 %v3259_v10 }
 0x5aa   : > { %v3964_v5 = vpack.c.bf16 %v3228_v60, %v3226_v55  ;;  %3455 = vmatprep.mubr.f32.mxu0 %v3263_v18 }
 0x5ab   : > { %v3210_v21 = vpop.permute.xlu0 %3209 }
 0x5ac   : > { %v3225_v31 = vsel %vm693_vm3, %v3210_v21, %v3212_v3  ;;  %v3216_v62 = vpop.permute.xlu1 %3215  ;;  %3965 = vmatprep.subr.bf16.mxu0 %v3964_v5 }
 0x5ad   : > { %v3227_v46 = vsel %vm693_vm3, %v3216_v62, %v3218_v44  ;;  %3456 = vmatmul.mubr.f32.gmra.mrb[14].mxu0 %v3262_v58 }
 0x5ae   : > { %v3966_v52 = vpack.c.bf16 %v3227_v46, %v3225_v31  ;;  %3526 = vmatprep.mubr.f32.mxu0 %v6068_v26 }
 0x5b0   : > { %3967 = vmatpush1.bf16.msra.mxu0 %v3966_v52 }
 0x5b3   : > { %3781 = vmatmul.mubr.msk.f32.vlgmr.msra.gmra.mrb[8].mxu0 %vm6080_vm10, %v3255_v22 }
 0x5b4   : > { %3532 = vmatprep.mubr.f32.mxu0 %v6068_v26 }
 0x5b7   : > { %3782 = vmatmul.mubr.msk.f32.gmra.mrb[10].mxu0 %vm6081_vm11, %v3258_v51 }
 0x5b8   : > { %3538 = vmatprep.mubr.f32.mxu0 %v6068_v26 }
 0x5bb   : > { %3783 = vmatmul.mubr.msk.f32.gmra.mrb[12].mxu0 %vm6082_vm12, %v3261_v38 }
 0x5bc   : > { %3544 = vmatprep.mubr.f32.mxu0 %v6068_v26  ;;  %v1785_v25 = vpop.permute.xlu0 %1784 }
 0x5bd   : > { %v1790_v63 = vpop.permute.xlu1 %1789 }
 0x5bf   : > { %3784 = vmatmul.mubr.msk.f32.gmra.mrb[14].mxu0 %vm6083_vm13, %v3264_v45  ;;  %v3567_v45 = vld [vmem:[%s5940_s10] sm:$0xf] }
 0x5c0   : > { %v1795_v26 = vpop.permute.xlu0 %1794 }
 0x5c1   : > { %v1800_v40 = vpop.permute.xlu1 %1799 }
 0x5c4   : > { %v3344_v28 = vpop.permute.xlu0 %3343 }
 0x5c5   : > { %v3349_v29 = vpop.permute.xlu1 %3348 }
 0x5c8   : > { %v3354_v50 = vpop.permute.xlu0 %3353 }
 0x5c9   : > { %v3359_v5 = vpop.permute.xlu1 %3358 }
 0x66e   : > { %v1969_v12 = vpop.f32.mrb[8].mxu1 }
 0x66f   : > { %v1971_v15 = vpop.f32.mrb[9].mxu1  ;;  %v3984_v56 = vadd.f32 %v1969_v12, %v1785_v25 }
 0x670   : > { %v3985_v13 = vadd.f32 %v1971_v15, %v1785_v25  ;;  %v3568_v15 = vunpack.c.l.bf16 %v3567_v45  ;;  %v3589_v25 = vpop.permute.xlu0 %3588 }
 0x671   : > { %v1992_v24 = vmax.f32 %v3984_v56, 0.0 }
 0x672   : > { %v1975_v61 = vpop.f32.mrb[10].mxu1  ;;  %v1993_v1 = vmax.f32 %v3985_v13, 0.0 }
 0x673   : > { %v3986_v33 = vadd.f32 %v1975_v61, %v1790_v63  ;;  %v1977_v7 = vpop.f32.mrb[11].mxu1 }
 0x674   : > { %v3987_v48 = vadd.f32 %v1977_v7, %v1790_v63 }
 0x675   : > { %v1994_v36 = vmax.f32 %v3986_v33, 0.0 }
 0x676   : > { %v1995_v30 = vmax.f32 %v3987_v48, 0.0  ;;  %v1981_v17 = vpop.f32.mrb[12].mxu1 }
 0x677   : > { %v3970_v14 = vpack.c.bf16 %v1994_v36, %v1992_v24  ;;  %v1983_v27 = vpop.f32.mrb[13].mxu1  ;;  %v3988_v2 = vadd.f32 %v1981_v17, %v1795_v26 }
 0x678   : > { %v3968_v41 = vpack.c.bf16 %v1995_v30, %v1993_v1  ;;  %v3989_v47 = vadd.f32 %v1983_v27, %v1795_v26  ;;  %v6084_v1 = vld [vmem:[#allocation6_spill] sm:$0xff] }
 0x679   : > { %v1996_v0 = vmax.f32 %v3988_v2, 0.0  ;;  %vm3679_vm15 = vcmp.lt.s32.totalorder %v6084_v1, 3  ;;  %vm3678_vm0 = vcmp.lt.s32.totalorder %v6084_v1, 1  ;;  %vm3684_vm2 = vcmp.lt.s32.totalorder %v6084_v1, 5 }
 0x67a   : > { %v1987_v32 = vpop.f32.mrb[14].mxu1  ;;  %3969 = vmatprep.subr.bf16.mxu1 %v3968_v41  ;;  %v1997_v37 = vmax.f32 %v3989_v47, 0.0 }
 0x67b   : > { %v3990_v54 = vadd.f32 %v1987_v32, %v1800_v40  ;;  %v1989_v4 = vpop.f32.mrb[15].mxu1  ;;  %3971 = vmatpush1.bf16.msra.mxu1 %v3970_v14 }
 0x67c   : > { %v3991_v34 = vadd.f32 %v1989_v4, %v1800_v40 }
 0x67d   : > { %v1998_v9 = vmax.f32 %v3990_v54, 0.0 }
 0x67e   : > { %v1999_v39 = vmax.f32 %v3991_v34, 0.0 }
 0x67f   : > { %v3974_v59 = vpack.c.bf16 %v1998_v9, %v1996_v0 }
 0x680   : > { %v3972_v57 = vpack.c.bf16 %v1999_v39, %v1997_v37 }
 0x682   : > { %3973 = vmatprep.subr.bf16.mxu1 %v3972_v57 }
 0x683   : > { %3975 = vmatpush1.bf16.msra.mxu1 %v3974_v59 }
 0x686   : > { %v3528_v49 = vpop.f32.mrb[8].mxu0 }
 0x687   : > { %v3530_v19 = vpop.f32.mrb[9].mxu0  ;;  %v3992_v6 = vadd.f32 %v3528_v49, %v3344_v28 }
 0x688   : > { %v3993_v42 = vadd.f32 %v3530_v19, %v3344_v28 }
 0x689   : > { %v3551_v53 = vmax.f32 %v3992_v6, 0.0 }
 0x68a   : > { %v3534_v35 = vpop.f32.mrb[10].mxu0  ;;  %v3552_v8 = vmax.f32 %v3993_v42, 0.0 }
 0x68b   : > { %v3994_v23 = vadd.f32 %v3534_v35, %v3349_v29  ;;  %v3536_v43 = vpop.f32.mrb[11].mxu0 }
 0x68c   : > { %v3995_v3 = vadd.f32 %v3536_v43, %v3349_v29 }
 0x68d   : > { %v3553_v20 = vmax.f32 %v3994_v23, 0.0 }
 0x68e   : > { %v3554_v55 = vmax.f32 %v3995_v3, 0.0  ;;  %v3540_v10 = vpop.f32.mrb[12].mxu0 }
 0x68f   : > { %v3978_v18 = vpack.c.bf16 %v3553_v20, %v3551_v53  ;;  %v3542_v44 = vpop.f32.mrb[13].mxu0  ;;  %v3996_v58 = vadd.f32 %v3540_v10, %v3354_v50 }
 0x690   : > { %v3976_v60 = vpack.c.bf16 %v3554_v55, %v3552_v8  ;;  %v3997_v21 = vadd.f32 %v3542_v44, %v3354_v50 }
 0x691   : > { %v3555_v52 = vmax.f32 %v3996_v58, 0.0 }
 0x692   : > { %v3546_v31 = vpop.f32.mrb[14].mxu0  ;;  %3977 = vmatprep.subr.bf16.mxu1 %v3976_v60  ;;  %v3556_v51 = vmax.f32 %v3997_v21, 0.0 }
 0x693   : > { %v3998_v62 = vadd.f32 %v3546_v31, %v3359_v5  ;;  %v3548_v11 = vpop.f32.mrb[15].mxu0  ;;  %3979 = vmatpush1.bf16.msra.mxu1 %v3978_v18 }
 0x694   : > { %v3999_v46 = vadd.f32 %v3548_v11, %v3359_v5 }
 0x695   : > { %v3557_v22 = vmax.f32 %v3998_v62, 0.0 }
 0x696   : > { %v3558_v16 = vmax.f32 %v3999_v46, 0.0 }
 0x697   : > { %v3982_v38 = vpack.c.bf16 %v3557_v22, %v3555_v52 }
 0x698   : > { %v3980_v12 = vpack.c.bf16 %v3558_v16, %v3556_v51 }
 0x69a   : > { %3981 = vmatprep.subr.bf16.mxu1 %v3980_v12 }
 0x69b   : > { %3983 = vmatpush1.bf16.msra.mxu1 %v3982_v38 }
 0x69e   : > { %3785 = vmatmul.mubr.msk.f32.vlgmr.msra.gmra.mrb[16].mxu1 %vm3591_vm14, %v3568_v15 }
 0x771   : > { %v3661_v56 = vpop.f32.mrb[16].mxu1 }
 0x772   : > { %v3662_v63 = vadd.f32 %v3661_v56, %v3589_v25  ;;  %v3663_v13 = vpop.f32.mrb[17].mxu1 }
 0x773   : > { %v3664_v61 = vadd.f32 %v3663_v13, %v3589_v25 }
 0x774   : > { %4046 = vtanh.f32 %v3662_v63  ;;  %v3674_v14 = vmax.f32 %v3662_v63, 1e-05 }
 0x775   : > { %4048 = vtanh.f32 %v3664_v61  ;;  %v3675_v26 = vmax.f32 %v3664_v61, 1e-05 }
 0x77e   : > { %v4047_v33 = vpop.eup %4046 }
 0x77f   : > { %v4049_v7 = vpop.eup %4048  ;;  %v3668_v48 = vadd.f32 -1.0, %v4047_v33 }
 0x780   : > { %v3669_v24 = vadd.f32 -1.0, %v4049_v7 }
 0x781   : > { %v3670_v36 = vadd.f32 1.0, %v3668_v48 }
 0x782   : > { %v3671_v30 = vadd.f32 1.0, %v3669_v24 }
 0x783   : > { %v3672_v17 = vmul.f32 2.0, %v3670_v36 }
 0x784   : > { %v3673_v27 = vmul.f32 2.0, %v3671_v30 }
 0x785   : > { %v3680_v41 = vsel %vm3679_vm15, %v3672_v17, %v3674_v14 }
 0x786   : > { %v3682_v2 = vsel %vm3678_vm0, %v3662_v63, %v3680_v41  ;;  %v3681_v40 = vsel %vm3679_vm15, %v3673_v27, %v3675_v26 }
 0x787   : > { %v3685_v47 = vsel %vm3684_vm2, %v3682_v2, 0.0  ;;  %v3683_v32 = vsel %vm3678_vm0, %v3664_v61, %v3681_v40 }
 0x788   : > { %3687 = vst [vmem:[%s413_s13] sm:$0xff] %v3685_v47  ;;  %v3686_v54 = vsel %vm3684_vm2, %v3683_v32, 0.0 }
 0x789   : > { %3688 = vst [vmem:[%s413_s13 + $0x8] sm:$0xff] %v3686_v54 }
 0x78a PF: > { %s22_s21 = sadd.s32 1, %s4057_s21  }
 0x78b   : > { %p19_p4 = scmp.ge.s32.totalorder %s22_s21, 4  }
 0x78d   :  { %21 = sbr.rel (!%p19_p4) target bundleno = 1 (0x1), region = 99 }

</bundles_post_ra>
